<compile_context>
chip_gen: v7x
topology: tpu7x:2x2x1
jax: 0.10.0
libtpu: 0.0.40
codegen_flags: <defaults>
</compile_context>

<pallas_src>
import jax
import jax.numpy as jnp
from jax.experimental import pallas as pl
from jax.experimental.pallas import tpu as pltpu

BETA = 0.01

# true (PyTorch) dims
D_IN = 14 * 14          # 196
H1, H2, H3, H4, H5 = 150, 100, 3, 100, 150
D_OUT = 14 * 14         # 196


def _pad_to(n, m=128):
    return ((n + m - 1) // m) * m


# lane-padded dims
P_IN = _pad_to(D_IN)    # 256
P1 = _pad_to(H1)        # 256
P2 = _pad_to(H2)        # 128
P3 = _pad_to(H3)        # 128  (code dim padded)
P4 = _pad_to(H4)        # 128
P5 = _pad_to(H5)        # 256
P_OUT = _pad_to(D_OUT)  # 256

BIAS_LANES = max(P1, P2, P3, P4, P5, P_OUT)   # 256: lane width of packed bias slab
N_LAYERS = 6


def _leaky_relu(x):
    return jnp.where(x >= 0, x, BETA * x)


def autoencoder_kernel(x_ref,
                       w1_ref, w2_ref, w3_ref, w4_ref, w5_ref, w6_ref,
                       b_ref, out_ref, code_ref):
    # Packed bias slab: (8, 256) f32, rows 0..5 hold bias_1..bias_6 (lane-padded with 0).
    b_all = b_ref[...]

    def dense(h_f32, w_ref, row, width):
        # bf16 matmul inputs, f32 MXU accumulation; bias add stays in f32.
        y = jnp.dot(h_f32.astype(jnp.bfloat16), w_ref[...],
                    preferred_element_type=jnp.float32)
        return y + b_all[row:row + 1, :width]

    x = x_ref[...].astype(jnp.float32)

    # encoder: Linear -> LeakyReLU -> Linear -> LeakyReLU -> Linear
    h = _leaky_relu(dense(x, w1_ref, 0, P1))
    h = _leaky_relu(dense(h, w2_ref, 1, P2))
    code = dense(h, w3_ref, 2, P3)
    code_ref[...] = code.astype(code_ref.dtype)

    # decoder: LeakyReLU -> Linear -> LeakyReLU -> Linear -> LeakyReLU -> Linear
    h = _leaky_relu(code)
    h = _leaky_relu(dense(h, w4_ref, 3, P4))
    h = _leaky_relu(dense(h, w5_ref, 4, P5))
    out = dense(h, w6_ref, 5, P_OUT)
    out_ref[...] = out.astype(out_ref.dtype)


def init_params(key):
    """Deterministic parameter init mimicking nn.Linear default (uniform +-1/sqrt(fan_in)).
    Returns weights already transposed to (in, out), f32."""
    dims = [(D_IN, H1), (H1, H2), (H2, H3), (H3, H4), (H4, H5), (H5, D_OUT)]
    params = []
    for i, (fin, fout) in enumerate(dims):
        kw, kb = jax.random.split(jax.random.fold_in(key, i))
        bound = 1.0 / (fin ** 0.5)
        w = jax.random.uniform(kw, (fin, fout), jnp.float32, -bound, bound)
        b = jax.random.uniform(kb, (fout,), jnp.float32, -bound, bound)
        params.append((w, b))
    return params


def _pad2(a, rows, cols):
    return jnp.pad(a, ((0, rows - a.shape[0]), (0, cols - a.shape[1])))


def _prepare_params(params):
    """Lane-pad weights (bf16) and pack the six biases into one (8, 256) f32 slab."""
    padded_dims = [(P_IN, P1), (P1, P2), (P2, P3), (P3, P4), (P4, P5), (P5, P_OUT)]
    weights, bias_rows = [], []
    for (w, b), (pin, pout) in zip(params, padded_dims):
        weights.append(_pad2(w.astype(jnp.float32), pin, pout).astype(jnp.bfloat16))
        bias_rows.append(jnp.pad(b.astype(jnp.float32), (0, BIAS_LANES - b.shape[0])))
    bias_slab = jnp.pad(jnp.stack(bias_rows, axis=0),
                        ((0, 8 - N_LAYERS), (0, 0)))          # (8, 256) f32
    return weights, bias_slab


def neural_network_forward(x, params, block_b=256, trim=True):
    """x: (B, 196) float32.  Returns (reconstruction (B,196), code (B,3)).

    block_b: batch rows per grid step (multiple of 8). 256 default keeps VMEM use
    ~2.5 MiB (fits every generation's scoped default) while filling the MXU; it can
    be raised to 512-1024 on v6e/v7x for large batches.
    If trim=False the lane-/batch-padded outputs (Bp, 256)/(Bp, 128) are returned,
    avoiding the post-kernel HBM copy for the trim.
    """
    assert block_b % 8 == 0, "block_b must be a multiple of 8 (sublane alignment)"
    B = x.shape[0]
    Bp = _pad_to(B, block_b)                 # pad ragged batches with zero rows

    weights, bias_slab = _prepare_params(params)
    x_p = _pad2(x.astype(jnp.float32), Bp, P_IN)

    grid = (Bp // block_b,)

    def tile_spec(cols):
        return pl.BlockSpec((block_b, cols), lambda i: (i, 0))

    def const_spec(shape):
        # Constant block index -> Pallas skips the re-DMA on every grid step after the first.
        return pl.BlockSpec(shape, lambda i: (0, 0))

    in_specs = ([tile_spec(P_IN)]
                + [const_spec(w.shape) for w in weights]
                + [const_spec(bias_slab.shape)])

    out_shape = (jax.ShapeDtypeStruct((Bp, P_OUT), jnp.float32),
                 jax.ShapeDtypeStruct((Bp, P3), jnp.float32))
    out_specs = (tile_spec(P_OUT), tile_spec(P3))

    out_p, code_p = pl.pallas_call(
        autoencoder_kernel,
        out_shape=out_shape,
        grid_spec=pltpu.PrefetchScalarGridSpec(
            num_scalar_prefetch=0,
            grid=grid,
            in_specs=in_specs,
            out_specs=out_specs,
        ),
        compiler_params=pltpu.CompilerParams(
            dimension_semantics=("parallel",)),
    )(x_p, *weights, bias_slab)

    if trim:
        return out_p[:B, :D_OUT], code_p[:B, :H3]
    return out_p, code_p


# ---------------- references for verification ----------------

def _reference_f32(x, params):
    """Pure f32 reference (original module semantics)."""
    h = x
    h = _leaky_relu(h @ params[0][0] + params[0][1])
    h = _leaky_relu(h @ params[1][0] + params[1][1])
    code = h @ params[2][0] + params[2][1]
    h = _leaky_relu(code)
    h = _leaky_relu(h @ params[3][0] + params[3][1])
    h = _leaky_relu(h @ params[4][0] + params[4][1])
    out = h @ params[5][0] + params[5][1]
    return out, code


def _reference_bf16(x, params):
    """Reference with the same bf16-matmul / f32-accumulate casts the kernel uses."""
    def dense(h, w, b):
        return jnp.dot(h.astype(jnp.bfloat16), w.astype(jnp.bfloat16),
                       preferred_element_type=jnp.float32) + b
    h = x.astype(jnp.float32)
    h = _leaky_relu(dense(h, *params[0]))
    h = _leaky_relu(dense(h, *params[1]))
    code = dense(h, *params[2])
    h = _leaky_relu(code)
    h = _leaky_relu(dense(h, *params[3]))
    h = _leaky_relu(dense(h, *params[4]))
    out = dense(h, *params[5])
    return out, code


if __name__ == "__main__":
    key = jax.random.PRNGKey(0)
    k_param, k_x = jax.random.split(key)

    params = init_params(k_param)

    # B=512 -> 2 grid steps (exercises multi-step pipeline / both v7x TCs);
    # B=10  -> ragged batch (padded to one 256-row tile, trimmed on return).
    for B in (512, 10):
        x = jax.random.normal(jax.random.fold_in(k_x, B), (B, D_IN), jnp.float32)

        out, code = neural_network_forward(x, params, block_b=256)
        out = jax.block_until_ready(out)
        code = jax.block_until_ready(code)
        assert out.shape == (B, D_OUT) and code.shape == (B, H3)

        # Exact-path check vs. a reference using the identical bf16/f32 casts.
        ref_out_bf, ref_code_bf = _reference_bf16(x, params)
        assert jnp.allclose(out, ref_out_bf, atol=2e-3, rtol=2e-3)
        assert jnp.allclose(code, ref_code_bf, atol=2e-3, rtol=2e-3)

        # Semantics check vs. the full-f32 original module (loose tol for bf16 matmul inputs).
        ref_out, ref_code = _reference_f32(x, params)
        assert jnp.allclose(out, ref_out, atol=5e-2, rtol=5e-2)
        assert jnp.allclose(code, ref_code, atol=5e-2, rtol=5e-2)

    print("KERNEL_OK")
</pallas_src>

<mosaic_0001>
module attributes {stable_mosaic.version = 11 : i64} {
  func.func @autoencoder_kernel(%arg0: i32, %arg1: memref<256x256xf32, #tpu.memory_space<vmem>>, %arg2: memref<256x256xbf16, #tpu.memory_space<vmem>>, %arg3: memref<256x128xbf16, #tpu.memory_space<vmem>>, %arg4: memref<128x128xbf16, #tpu.memory_space<vmem>>, %arg5: memref<128x128xbf16, #tpu.memory_space<vmem>>, %arg6: memref<128x256xbf16, #tpu.memory_space<vmem>>, %arg7: memref<256x256xbf16, #tpu.memory_space<vmem>>, %arg8: memref<8x256xf32, #tpu.memory_space<vmem>>, %arg9: memref<256x256xf32, #tpu.memory_space<vmem>>, %arg10: memref<256x128xf32, #tpu.memory_space<vmem>>) attributes {dimension_semantics = [#tpu.dimension_semantics<parallel>], iteration_bounds = array<i64: 2>, scalar_prefetch = 0 : i64, scratch_operands = 0 : i64, tpu.core_type = #tpu.core_type<tc>, window_params = [{transform_indices = @transform_0, window_bounds = array<i64: 256, 256>}, {pipeline_mode = #tpu.pipeline_mode<synchronous>, transform_indices = @transform_1, window_bounds = array<i64: 256, 256>}, {pipeline_mode = #tpu.pipeline_mode<synchronous>, transform_indices = @transform_2, window_bounds = array<i64: 256, 128>}, {pipeline_mode = #tpu.pipeline_mode<synchronous>, transform_indices = @transform_3, window_bounds = array<i64: 128, 128>}, {pipeline_mode = #tpu.pipeline_mode<synchronous>, transform_indices = @transform_4, window_bounds = array<i64: 128, 128>}, {pipeline_mode = #tpu.pipeline_mode<synchronous>, transform_indices = @transform_5, window_bounds = array<i64: 128, 256>}, {pipeline_mode = #tpu.pipeline_mode<synchronous>, transform_indices = @transform_6, window_bounds = array<i64: 256, 256>}, {pipeline_mode = #tpu.pipeline_mode<synchronous>, transform_indices = @transform_7, window_bounds = array<i64: 8, 256>}, {transform_indices = @transform_8, window_bounds = array<i64: 256, 256>}, {transform_indices = @transform_9, window_bounds = array<i64: 256, 128>}]} {
    %c0 = arith.constant 0 : index
    %c0_0 = arith.constant 0 : index
    %0 = vector.load %arg8[%c0, %c0_0] : memref<8x256xf32, #tpu.memory_space<vmem>>, vector<8x256xf32>
    %c0_1 = arith.constant 0 : index
    %c0_2 = arith.constant 0 : index
    %1 = vector.load %arg1[%c0_1, %c0_2] : memref<256x256xf32, #tpu.memory_space<vmem>>, vector<256x256xf32>
    %2 = arith.truncf %1 : vector<256x256xf32> to vector<256x256xbf16>
    %c0_3 = arith.constant 0 : index
    %c0_4 = arith.constant 0 : index
    %3 = vector.load %arg2[%c0_3, %c0_4] : memref<256x256xbf16, #tpu.memory_space<vmem>>, vector<256x256xbf16>
    %cst = arith.constant dense<0.000000e+00> : vector<256x256xf32>
    %4 = tpu.matmul %2, %3, %cst {dimension_numbers = #tpu.dot_dimension_numbers<[1], [0], [0], [1], [0, 0, 1, 1], [], []>} : vector<256x256xbf16>, vector<256x256xbf16>, vector<256x256xf32> -> vector<256x256xf32>
    %5 = vector.extract_strided_slice %0 {offsets = [0, 0], sizes = [1, 256], strides = [1, 1]} : vector<8x256xf32> to vector<1x256xf32>
    %6 = vector.broadcast %5 : vector<1x256xf32> to vector<256x256xf32>
    %7 = arith.addf %4, %6 : vector<256x256xf32>
    %cst_5 = arith.constant 0.000000e+00 : f32
    %8 = vector.broadcast %cst_5 : f32 to vector<256x256xf32>
    %9 = arith.cmpf oge, %7, %8 : vector<256x256xf32>
    %cst_6 = arith.constant 0.00999999977 : f32
    %10 = vector.broadcast %cst_6 : f32 to vector<256x256xf32>
    %11 = arith.mulf %10, %7 : vector<256x256xf32>
    %12 = arith.select %9, %7, %11 : vector<256x256xi1>, vector<256x256xf32>
    %13 = arith.truncf %12 : vector<256x256xf32> to vector<256x256xbf16>
    %c0_7 = arith.constant 0 : index
    %c0_8 = arith.constant 0 : index
    %14 = vector.load %arg3[%c0_7, %c0_8] : memref<256x128xbf16, #tpu.memory_space<vmem>>, vector<256x128xbf16>
    %cst_9 = arith.constant dense<0.000000e+00> : vector<256x128xf32>
    %15 = tpu.matmul %13, %14, %cst_9 {dimension_numbers = #tpu.dot_dimension_numbers<[1], [0], [0], [1], [0, 0, 1, 1], [], []>} : vector<256x256xbf16>, vector<256x128xbf16>, vector<256x128xf32> -> vector<256x128xf32>
    %16 = vector.extract_strided_slice %0 {offsets = [1, 0], sizes = [1, 128], strides = [1, 1]} : vector<8x256xf32> to vector<1x128xf32>
    %17 = vector.broadcast %16 : vector<1x128xf32> to vector<256x128xf32>
    %18 = arith.addf %15, %17 : vector<256x128xf32>
    %cst_10 = arith.constant 0.000000e+00 : f32
    %19 = vector.broadcast %cst_10 : f32 to vector<256x128xf32>
    %20 = arith.cmpf oge, %18, %19 : vector<256x128xf32>
    %cst_11 = arith.constant 0.00999999977 : f32
    %21 = vector.broadcast %cst_11 : f32 to vector<256x128xf32>
    %22 = arith.mulf %21, %18 : vector<256x128xf32>
    %23 = arith.select %20, %18, %22 : vector<256x128xi1>, vector<256x128xf32>
    %24 = arith.truncf %23 : vector<256x128xf32> to vector<256x128xbf16>
    %c0_12 = arith.constant 0 : index
    %c0_13 = arith.constant 0 : index
    %25 = vector.load %arg4[%c0_12, %c0_13] : memref<128x128xbf16, #tpu.memory_space<vmem>>, vector<128x128xbf16>
    %cst_14 = arith.constant dense<0.000000e+00> : vector<256x128xf32>
    %26 = tpu.matmul %24, %25, %cst_14 {dimension_numbers = #tpu.dot_dimension_numbers<[1], [0], [0], [1], [0, 0, 1, 1], [], []>} : vector<256x128xbf16>, vector<128x128xbf16>, vector<256x128xf32> -> vector<256x128xf32>
    %27 = vector.extract_strided_slice %0 {offsets = [2, 0], sizes = [1, 128], strides = [1, 1]} : vector<8x256xf32> to vector<1x128xf32>
    %28 = vector.broadcast %27 : vector<1x128xf32> to vector<256x128xf32>
    %29 = arith.addf %26, %28 : vector<256x128xf32>
    %c0_15 = arith.constant 0 : index
    %c0_16 = arith.constant 0 : index
    %30 = vector.load %arg10[%c0_15, %c0_16] : memref<256x128xf32, #tpu.memory_space<vmem>>, vector<256x128xf32>
    tpu.vector_store %arg10[%c0_15, %c0_16], %29 {strides = array<i32>} : memref<256x128xf32, #tpu.memory_space<vmem>>, vector<256x128xf32>,
    %cst_17 = arith.constant 0.000000e+00 : f32
    %31 = vector.broadcast %cst_17 : f32 to vector<256x128xf32>
    %32 = arith.cmpf oge, %29, %31 : vector<256x128xf32>
    %cst_18 = arith.constant 0.00999999977 : f32
    %33 = vector.broadcast %cst_18 : f32 to vector<256x128xf32>
    %34 = arith.mulf %33, %29 : vector<256x128xf32>
    %35 = arith.select %32, %29, %34 : vector<256x128xi1>, vector<256x128xf32>
    %36 = arith.truncf %35 : vector<256x128xf32> to vector<256x128xbf16>
    %c0_19 = arith.constant 0 : index
    %c0_20 = arith.constant 0 : index
    %37 = vector.load %arg5[%c0_19, %c0_20] : memref<128x128xbf16, #tpu.memory_space<vmem>>, vector<128x128xbf16>
    %cst_21 = arith.constant dense<0.000000e+00> : vector<256x128xf32>
    %38 = tpu.matmul %36, %37, %cst_21 {dimension_numbers = #tpu.dot_dimension_numbers<[1], [0], [0], [1], [0, 0, 1, 1], [], []>} : vector<256x128xbf16>, vector<128x128xbf16>, vector<256x128xf32> -> vector<256x128xf32>
    %39 = vector.extract_strided_slice %0 {offsets = [3, 0], sizes = [1, 128], strides = [1, 1]} : vector<8x256xf32> to vector<1x128xf32>
    %40 = vector.broadcast %39 : vector<1x128xf32> to vector<256x128xf32>
    %41 = arith.addf %38, %40 : vector<256x128xf32>
    %cst_22 = arith.constant 0.000000e+00 : f32
    %42 = vector.broadcast %cst_22 : f32 to vector<256x128xf32>
    %43 = arith.cmpf oge, %41, %42 : vector<256x128xf32>
    %cst_23 = arith.constant 0.00999999977 : f32
    %44 = vector.broadcast %cst_23 : f32 to vector<256x128xf32>
    %45 = arith.mulf %44, %41 : vector<256x128xf32>
    %46 = arith.select %43, %41, %45 : vector<256x128xi1>, vector<256x128xf32>
    %47 = arith.truncf %46 : vector<256x128xf32> to vector<256x128xbf16>
    %c0_24 = arith.constant 0 : index
    %c0_25 = arith.constant 0 : index
    %48 = vector.load %arg6[%c0_24, %c0_25] : memref<128x256xbf16, #tpu.memory_space<vmem>>, vector<128x256xbf16>
    %cst_26 = arith.constant dense<0.000000e+00> : vector<256x256xf32>
    %49 = tpu.matmul %47, %48, %cst_26 {dimension_numbers = #tpu.dot_dimension_numbers<[1], [0], [0], [1], [0, 0, 1, 1], [], []>} : vector<256x128xbf16>, vector<128x256xbf16>, vector<256x256xf32> -> vector<256x256xf32>
    %50 = vector.extract_strided_slice %0 {offsets = [4, 0], sizes = [1, 256], strides = [1, 1]} : vector<8x256xf32> to vector<1x256xf32>
    %51 = vector.broadcast %50 : vector<1x256xf32> to vector<256x256xf32>
    %52 = arith.addf %49, %51 : vector<256x256xf32>
    %cst_27 = arith.constant 0.000000e+00 : f32
    %53 = vector.broadcast %cst_27 : f32 to vector<256x256xf32>
    %54 = arith.cmpf oge, %52, %53 : vector<256x256xf32>
    %cst_28 = arith.constant 0.00999999977 : f32
    %55 = vector.broadcast %cst_28 : f32 to vector<256x256xf32>
    %56 = arith.mulf %55, %52 : vector<256x256xf32>
    %57 = arith.select %54, %52, %56 : vector<256x256xi1>, vector<256x256xf32>
    %58 = arith.truncf %57 : vector<256x256xf32> to vector<256x256xbf16>
    %c0_29 = arith.constant 0 : index
    %c0_30 = arith.constant 0 : index
    %59 = vector.load %arg7[%c0_29, %c0_30] : memref<256x256xbf16, #tpu.memory_space<vmem>>, vector<256x256xbf16>
    %cst_31 = arith.constant dense<0.000000e+00> : vector<256x256xf32>
    %60 = tpu.matmul %58, %59, %cst_31 {dimension_numbers = #tpu.dot_dimension_numbers<[1], [0], [0], [1], [0, 0, 1, 1], [], []>} : vector<256x256xbf16>, vector<256x256xbf16>, vector<256x256xf32> -> vector<256x256xf32>
    %61 = vector.extract_strided_slice %0 {offsets = [5, 0], sizes = [1, 256], strides = [1, 1]} : vector<8x256xf32> to vector<1x256xf32>
    %62 = vector.broadcast %61 : vector<1x256xf32> to vector<256x256xf32>
    %63 = arith.addf %60, %62 : vector<256x256xf32>
    %c0_32 = arith.constant 0 : index
    %c0_33 = arith.constant 0 : index
    %64 = vector.load %arg9[%c0_32, %c0_33] : memref<256x256xf32, #tpu.memory_space<vmem>>, vector<256x256xf32>
    tpu.vector_store %arg9[%c0_32, %c0_33], %63 {strides = array<i32>} : memref<256x256xf32, #tpu.memory_space<vmem>>, vector<256x256xf32>,
    return
  }
  func.func @transform_0(%arg0: i32) -> (i32, i32) {
    %c0_i32 = arith.constant 0 : i32
    %c0_i32_0 = arith.constant 0 : i32
    return %arg0, %c0_i32 : i32, i32
  }
  func.func @transform_1(%arg0: i32) -> (i32, i32) {
    %c0_i32 = arith.constant 0 : i32
    %c0_i32_0 = arith.constant 0 : i32
    %c0_i32_1 = arith.constant 0 : i32
    return %c0_i32, %c0_i32_0 : i32, i32
  }
  func.func @transform_2(%arg0: i32) -> (i32, i32) {
    %c0_i32 = arith.constant 0 : i32
    %c0_i32_0 = arith.constant 0 : i32
    %c0_i32_1 = arith.constant 0 : i32
    return %c0_i32, %c0_i32_0 : i32, i32
  }
  func.func @transform_3(%arg0: i32) -> (i32, i32) {
    %c0_i32 = arith.constant 0 : i32
    %c0_i32_0 = arith.constant 0 : i32
    %c0_i32_1 = arith.constant 0 : i32
    return %c0_i32, %c0_i32_0 : i32, i32
  }
  func.func @transform_4(%arg0: i32) -> (i32, i32) {
    %c0_i32 = arith.constant 0 : i32
    %c0_i32_0 = arith.constant 0 : i32
    %c0_i32_1 = arith.constant 0 : i32
    return %c0_i32, %c0_i32_0 : i32, i32
  }
  func.func @transform_5(%arg0: i32) -> (i32, i32) {
    %c0_i32 = arith.constant 0 : i32
    %c0_i32_0 = arith.constant 0 : i32
    %c0_i32_1 = arith.constant 0 : i32
    return %c0_i32, %c0_i32_0 : i32, i32
  }
  func.func @transform_6(%arg0: i32) -> (i32, i32) {
    %c0_i32 = arith.constant 0 : i32
    %c0_i32_0 = arith.constant 0 : i32
    %c0_i32_1 = arith.constant 0 : i32
    return %c0_i32, %c0_i32_0 : i32, i32
  }
  func.func @transform_7(%arg0: i32) -> (i32, i32) {
    %c0_i32 = arith.constant 0 : i32
    %c0_i32_0 = arith.constant 0 : i32
    %c0_i32_1 = arith.constant 0 : i32
    return %c0_i32, %c0_i32_0 : i32, i32
  }
  func.func @transform_8(%arg0: i32) -> (i32, i32) {
    %c0_i32 = arith.constant 0 : i32
    %c0_i32_0 = arith.constant 0 : i32
    return %arg0, %c0_i32 : i32, i32
  }
  func.func @transform_9(%arg0: i32) -> (i32, i32) {
    %c0_i32 = arith.constant 0 : i32
    %c0_i32_0 = arith.constant 0 : i32
    return %arg0, %c0_i32 : i32, i32
  }
}

</mosaic_0001>

<bundles_post_ra>
// kernel: tpu_custom_call.1
= control target key start
LH: loop header
LB: loop body
LE: loop exit
PB: predicated region body
PF: predicated region fallthrough
CT: control target
= control target key end

     0   :  { %s5464_s0 = inlined_call_operand.hbm [shape: f32[512,256], index: 0, kind: input, shape index: {}]   ;;  %s5465_s1 = inlined_call_operand.hbm [shape: bf16[256,256], index: 1, kind: input, shape index: {}]   ;;  %s5466_s2 = inlined_call_operand.hbm [shape: bf16[256,128], index: 2, kind: input, shape index: {}]   ;;  %s5467_s3 = inlined_call_operand.hbm [shape: bf16[128,128], index: 3, kind: input, shape index: {}]   ;;  %s5468_s4 = inlined_call_operand.hbm [shape: bf16[128,128], index: 4, kind: input, shape index: {}]   ;;  %s5469_s5 = inlined_call_operand.hbm [shape: bf16[128,256], index: 5, kind: input, shape index: {}]   ;;  %s5470_s6 = inlined_call_operand.hbm [shape: bf16[256,256], index: 6, kind: input, shape index: {}]   ;;  %s5471_s7 = inlined_call_operand.vmem [shape: f32[8,256], index: 7, kind: input, shape index: {}]   ;;  %s5472_s8 = inlined_call_operand.hbm [shape: f32[512,256], index: 8, kind: output, shape index: {0}]   ;;  %s5473_s9 = inlined_call_operand.hbm [shape: f32[512,128], index: 9, kind: output, shape index: {1}]  }
   0x1   :  { %5485 = sst [smem:[#allocation23_spill]] %s5465_s1 }
   0x2   :  { %5486 = sst [smem:[#allocation24_spill]] %s5472_s8 }
   0x3   :  { %15 = vsyncpa [#allocation3], 0 }
   0x4   :  { %17 = vsyncpa [#allocation3 + $0x1], 0 }
   0x5   :  { %18 = vsyncpa [#allocation6], 0 }
   0x6   :  { %19 = vsyncpa [#allocation9], 0 }
   0x7   :  { %20 = vsyncpa [#allocation12], 0 }
   0x8   :  { %21 = vsyncpa [#allocation4], 0 }
   0x9   :  { %23 = vsyncpa [#allocation4 + $0x1], 0 }
   0xa   :  { %24 = vsyncpa [#allocation16], 0 }
   0xb   :  { %26 = vsyncpa [#allocation16 + $0x1], 0  ;;  %s4559_s30 = smov 0   ;;  %s4561_s10 = smov 0  }
   0xc   :  { %s4563_s11 = smov 0   ;;  %s4565_s12 = smov 0  }
   0xd LB: > { %s4489_s13 = smov [#allocation5]   ;;  %s4580_s15 = sadd.s32 4294967295, %s4487_s12   ;;  %s4487_s12 = sphi %s4565_s12, %s5515_s12   ;;  %s4483_s11 = sphi %s4563_s11, %s5514_s11   ;;  %s4479_s10 = sphi %s4561_s10, %s5513_s10   ;;  %s4475_s30 = sphi %s4559_s30, %s5512_s30  }
   0xe   : > { %s274_s14 = sshll.u32 %s4489_s13, 4  ;;  %p3465_p0 = scmp.ge.s32.totalorder %s4487_s12, 1  ;;  %s4585_s14 = int_to_ptr.vmem [resolvable:$true] %s274_s14 }
   0xf   : > { %p5477_p1 = scmp.eq.s32.totalorder %s4580_s15, 0  ;;  %p262_p2 = scmp.lt.s32.totalorder %s4487_s12, 3 }
  0x10   : > { %s4490_s18 = smov [#allocation8]   ;;  %s4491_s20 = smov [#allocation11]  }
  0x11   : > { %p4587_p3 = pnand %p3465_p0, %p262_p2  ;;  %s300_s19 = sshll.u32 %s4490_s18, 4  ;;  %s4600_s19 = int_to_ptr.vmem [resolvable:$true] %s300_s19 }
  0x12   : > { %s4602_s21 = sshll.u32 %s4491_s20, 4  ;;  %s5489_s1 = sld [smem:[#allocation23_spill]]  ;;  %s327_s21 = int_to_ptr.vmem [resolvable:$true] %s4602_s21 }
  0x13   : > { %s5487_s16 = scalar_select %p4587_p3, 1, 0 }
  0x14   : > { %p3931_p5 = pneg %p4587_p3 }
  0x16   : > { %p4596_p6 = pnand %p3931_p5, %p5477_p1 }
  0x18   : > { %s4179_s24 = scalar_lea.hbm %s5489_s1, 4096  ;;  %p4612_p8 = pneg %p4596_p6 }
  0x19   : > { %p4180_p7 = scmp.ne.s32.totalorder %s5489_s1, %s4179_s24  ;;  %p4186_p11 = scmp.lt.u32.totalorder %s4179_s24, %s5489_s1 }
  0x1b   : > { %p4182_p9 = pnand %p4612_p8, %p4180_p7 }
  0x1d   : > { %p4183_p10 = pneg %p4182_p9 }
  0x1f   : > { %p4188_p12 = pnand %p4186_p11, %p4183_p10 }
  0x21   : > { %4191 = shalt.err (!%p4188_p12)
}
  0x22   : > { %s4192_s13 = scalar_lea.vmem %s4585_s14, 4096  ;;  %p4200_p5 = scmp.lt.s32.totalorder %s4585_s14, %s4585_s14 }
  0x23   : > { %p4193_p13 = scmp.ne.s32.totalorder %s4585_s14, %s4192_s13  ;;  %p4201_p4 = scmp.lt.s32.totalorder %s4192_s13, %s4192_s13 }
  0x25   : > { %p4195_p0 = pnand %p4193_p13, %p4612_p8  ;;  %p4202_p7 = por %p4201_p4, %p4200_p5 }
  0x27   : > { %p4196_p2 = pneg %p4195_p0 }
  0x29   : > { %p4203_p9 = pnand %p4202_p7, %p4196_p2 }
  0x2b   : > { %4206 = shalt.err (!%p4203_p9)
}
  0x2c   : > { %s5475_s18 = smov 128   ;;  %s5483_s20 = smov 8  }
  0x2d   : > { %3934 = dma.hbm_to_vmem [thread:$0]  (!%p4596_p6), %s5489_s1, 4096, %s4585_s14, [#allocation6], %s5475_s18, %s5475_s18, %s5483_s20  }
  0x2e   : > { %s4207_s26 = scalar_lea.hbm %s5467_s3, 1024 }
  0x2f   : > { %p4208_p4 = scmp.ne.s32.totalorder %s5467_s3, %s4207_s26  ;;  %p4214_p12 = scmp.lt.u32.totalorder %s4207_s26, %s5467_s3 }
  0x31   : > { %p4210_p10 = pnand %p4208_p4, %p4612_p8 }
  0x33   : > { %p4211_p11 = pneg %p4210_p10 }
  0x35   : > { %p4216_p13 = pnand %p4214_p12, %p4211_p11 }
  0x37   : > { %4219 = shalt.err (!%p4216_p13)
}
  0x38   : > { %s4220_s14 = scalar_lea.vmem %s4600_s19, 1024  ;;  %p4228_p7 = scmp.lt.s32.totalorder %s4600_s19, %s4600_s19 }
  0x39   : > { %p4221_p0 = scmp.ne.s32.totalorder %s4600_s19, %s4220_s14  ;;  %p4229_p9 = scmp.lt.s32.totalorder %s4220_s14, %s4220_s14 }
  0x3b   : > { %p4223_p2 = pnand %p4221_p0, %p4612_p8  ;;  %p4230_p4 = por %p4229_p9, %p4228_p7 }
  0x3d   : > { %p4224_p5 = pneg %p4223_p2 }
  0x3f   : > { %p4231_p10 = pnand %p4230_p4, %p4224_p5 }
  0x41   : > { %4234 = shalt.err (!%p4231_p10)
}
  0x42   : > { %s5479_s22 = smov 64   ;;  %s5481_s8 = smov 4  }
  0x43   : > { %3940 = dma.hbm_to_vmem [thread:$0]  (!%p4596_p6), %s5467_s3, 1024, %s4600_s19, [#allocation9], %s5479_s22, %s5479_s22, %s5481_s8  }
  0x44   : > { %s4235_s28 = scalar_lea.hbm %s5469_s5, 2048 }
  0x45   : > { %p4236_p11 = scmp.ne.s32.totalorder %s5469_s5, %s4235_s28  ;;  %p4242_p0 = scmp.lt.u32.totalorder %s4235_s28, %s5469_s5 }
  0x47   : > { %p4238_p12 = pnand %p4236_p11, %p4612_p8 }
  0x49   : > { %p4239_p13 = pneg %p4238_p12 }
  0x4b   : > { %p4244_p2 = pnand %p4242_p0, %p4239_p13 }
  0x4d   : > { %4247 = shalt.err (!%p4244_p2)
}
  0x4e   : > { %s4248_s23 = scalar_lea.vmem %s327_s21, 2048  ;;  %p4256_p4 = scmp.lt.s32.totalorder %s327_s21, %s327_s21 }
  0x4f   : > { %p4249_p5 = scmp.ne.s32.totalorder %s327_s21, %s4248_s23  ;;  %p4257_p10 = scmp.lt.s32.totalorder %s4248_s23, %s4248_s23 }
  0x51   : > { %p4251_p7 = pnand %p4249_p5, %p4612_p8  ;;  %p4258_p1 = por %p4257_p10, %p4256_p4 }
  0x53   : > { %p4252_p9 = pneg %p4251_p7 }
  0x55   : > { %p4259_p3 = pnand %p4258_p1, %p4252_p9 }
  0x57   : > { %4262 = shalt.err (!%p4259_p3)
}
  0x58   : > { %s5491_s19 = smov 128   ;;  %s4496_s25 = smov [#allocation7]  }
  0x59   : > { %3946 = dma.hbm_to_vmem [thread:$0]  (!%p4596_p6), %s5469_s5, 2048, %s327_s21, [#allocation12], %s5491_s19, %s5491_s19, %s5483_s20  }
  0x5a   : > { %s287_s26 = sshll.u32 %s4496_s25, 4  ;;  %s4497_s28 = smov [#allocation10]   ;;  %s288_s26 = int_to_ptr.vmem [resolvable:$true] %s287_s26 }
  0x5b   : > { %s313_s29 = sshll.u32 %s4497_s28, 4  ;;  %s4263_s23 = scalar_lea.hbm %s5466_s2, 2048  ;;  %s314_s29 = int_to_ptr.vmem [resolvable:$true] %s313_s29 }
  0x5c   : > { %p4264_p1 = scmp.ne.s32.totalorder %s5466_s2, %s4263_s23  ;;  %p4270_p12 = scmp.lt.u32.totalorder %s4263_s23, %s5466_s2 }
  0x5e   : > { %p4266_p3 = pnand %p4264_p1, %p4612_p8 }
  0x60   : > { %p4267_p11 = pneg %p4266_p3 }
  0x62   : > { %p4272_p13 = pnand %p4270_p12, %p4267_p11 }
  0x64   : > { %4275 = shalt.err (!%p4272_p13)
}
  0x65   : > { %s4276_s21 = scalar_lea.vmem %s288_s26, 2048  ;;  %p4284_p7 = scmp.lt.s32.totalorder %s288_s26, %s288_s26 }
  0x66   : > { %p4277_p0 = scmp.ne.s32.totalorder %s288_s26, %s4276_s21  ;;  %p4285_p9 = scmp.lt.s32.totalorder %s4276_s21, %s4276_s21 }
  0x68   : > { %p4279_p2 = pnand %p4277_p0, %p4612_p8  ;;  %p4286_p4 = por %p4285_p9, %p4284_p7 }
  0x6a   : > { %p4280_p5 = pneg %p4279_p2 }
  0x6c   : > { %p4287_p10 = pnand %p4286_p4, %p4280_p5 }
  0x6e   : > { %4290 = shalt.err (!%p4287_p10)
}
  0x6f   : > { %s5492_s22 = smov 4   ;;  %s5493_s8 = smov 64  }
  0x70   : > { %3937 = dma.hbm_to_vmem [thread:$0]  (!%p4596_p6), %s5466_s2, 2048, %s288_s26, [#allocation6], %s5493_s8, %s5493_s8, %s5492_s22  }
  0x71   : > { %s4291_s13 = scalar_lea.hbm %s5468_s4, 1024 }
  0x72   : > { %p4292_p1 = scmp.ne.s32.totalorder %s5468_s4, %s4291_s13  ;;  %p4298_p12 = scmp.lt.u32.totalorder %s4291_s13, %s5468_s4 }
  0x74   : > { %p4294_p3 = pnand %p4292_p1, %p4612_p8 }
  0x76   : > { %p4295_p11 = pneg %p4294_p3 }
  0x78   : > { %p4300_p13 = pnand %p4298_p12, %p4295_p11 }
  0x7a   : > { %4303 = shalt.err (!%p4300_p13)
}
  0x7b   : > { %s4304_s1 = scalar_lea.vmem %s314_s29, 1024  ;;  %p4312_p7 = scmp.lt.s32.totalorder %s314_s29, %s314_s29 }
  0x7c   : > { %p4305_p0 = scmp.ne.s32.totalorder %s314_s29, %s4304_s1  ;;  %p4313_p9 = scmp.lt.s32.totalorder %s4304_s1, %s4304_s1 }
  0x7e   : > { %p4307_p2 = pnand %p4305_p0, %p4612_p8  ;;  %p4314_p4 = por %p4313_p9, %p4312_p7 }
  0x80   : > { %p4308_p5 = pneg %p4307_p2 }
  0x82   : > { %p4315_p10 = pnand %p4314_p4, %p4308_p5 }
  0x84   : > { %4318 = shalt.err (!%p4315_p10)
}
  0x85   : > { %3943 = dma.hbm_to_vmem [thread:$0]  (!%p4596_p6), %s5468_s4, 1024, %s314_s29, [#allocation9], %s5493_s8, %s5493_s8, %s5492_s22  }
  0x86   : > { %s4498_s25 = smov [#allocation13]   ;;  %s4319_s23 = scalar_lea.hbm %s5470_s6, 4096 }
  0x87   : > { %s339_s28 = sshll.u32 %s4498_s25, 4  ;;  %p4320_p1 = scmp.ne.s32.totalorder %s5470_s6, %s4319_s23  ;;  %s340_s28 = int_to_ptr.vmem [resolvable:$true] %s339_s28 }
  0x88   : > { %p4326_p12 = scmp.lt.u32.totalorder %s4319_s23, %s5470_s6 }
  0x89   : > { %p4322_p3 = pnand %p4320_p1, %p4612_p8 }
  0x8b   : > { %p4323_p11 = pneg %p4322_p3 }
  0x8d   : > { %p4328_p13 = pnand %p4326_p12, %p4323_p11 }
  0x8f   : > { %4331 = shalt.err (!%p4328_p13)
}
  0x90   : > { %s4332_s29 = scalar_lea.vmem %s340_s28, 4096  ;;  %p4340_p7 = scmp.lt.s32.totalorder %s340_s28, %s340_s28 }
  0x91   : > { %p4333_p0 = scmp.ne.s32.totalorder %s340_s28, %s4332_s29  ;;  %p4341_p9 = scmp.lt.s32.totalorder %s4332_s29, %s4332_s29 }
  0x93   : > { %p4335_p2 = pnand %p4333_p0, %p4612_p8  ;;  %p4342_p4 = por %p4341_p9, %p4340_p7 }
  0x95   : > { %p4336_p5 = pneg %p4335_p2 }
  0x97   : > { %p4343_p10 = pnand %p4342_p4, %p4336_p5 }
  0x99   : > { %4346 = shalt.err (!%p4343_p10)
}
  0x9a   : > { %s5494_s22 = smov 8   ;;  %s3464_s17 = sadd.s32 4294967294, %s4487_s12  }
  0x9b   : > { %3949 = dma.hbm_to_vmem [thread:$0]  (!%p4596_p6), %s5470_s6, 4096, %s340_s28, [#allocation12], %s5491_s19, %s5491_s19, %s5494_s22  }
  0x9c   : > { %s4749_s27 = sadd.s32 1, %s4487_s12   ;;  %s39_s24 = sadd.s32 1, %s4483_s11 }
  0x9d   : > { %s36_s26 = ssub.s32 %s4487_s12, %s4749_s27  ;;  %p46_p1 = scmp.ne.s32.totalorder %s4483_s11, %s4479_s10 }
  0x9e   : > { %p37_p8 = scmp.eq.s32.totalorder %s36_s26, 0  ;;  %p47_p3 = scmp.eq.s32.totalorder %s4487_s12, 0 }
  0x9f   : > { %p52_p11 = scmp.ne.s32.totalorder %s4479_s10, %s4475_s30  ;;  %p5496_p13 = scmp.eq.s32.totalorder %s4580_s15, 0 }
  0xa0   : > { %s4760_s25 = scalar_select %p37_p8, %s4483_s11, %s39_s24  }
  0xa1   : > { %p4762_p12 = por %p47_p3, %p46_p1  ;;  %p4768_p6 = por %p5496_p13, %p52_p11 }
  0xa2   : > { %p223_p0 = scmp.eq.s32.totalorder %s4580_s15, 1  ;;  %p229_p2 = scmp.eq.s32.totalorder %s3464_s17, 1 }
  0xa3   : > { %p3967_p5 = scmp.lt.s32.totalorder %s4487_s12, 2  ;;  %s356_s28 = sand.u32 1, %s4483_s11  }
  0xa4   : > { %p4775_p7 = por %p223_p0, %p46_p1  ;;  %p4779_p9 = por %p229_p2, %p52_p11 }
  0xa5   : > { %s3473_s18 = sshll.u32 %s356_s28, 9  ;;  %s3609_s21 = sshll.u32 %s4487_s12, 13 }
  0xa6   : > { %s5498_s14 = scalar_select %p4775_p7, 1, 0 }
  0xa7   : > { %s5499_s23 = scalar_select %p4779_p9, 1, 0 }
  0xa8   : > { %s4787_s22 = scalar_lea.hbm %s5464_s0, %s3609_s21  ;;  %s360_s20 = scalar_lea.vmem [#allocation2], %s3473_s18 }
  0xa9   : > { %s368_s8 = sshll.u32 %s360_s20, 4  ;;  %p4793_p4 = pnand %p3967_p5, %p4762_p12  ;;  %s4789_s8 = int_to_ptr.vmem [resolvable:$true] %s368_s8 }
  0xaa   : > { %s4797_s26 = scalar_lea.sflag [#allocation3], %s356_s28  ;;  %s4347_s24 = scalar_lea.hbm %s4787_s22, 8192 }
  0xab   : > { %p4348_p10 = scmp.ne.s32.totalorder %s4787_s22, %s4347_s24  ;;  %p4349_p8 = pneg %p4793_p4 }
  0xac   : > { %s4352_s13 = scalar_lea.hbm %s5464_s0, 16384  ;;  %p4353_p11 = scmp.lt.u32.totalorder %s4787_s22, %s5464_s0 }
  0xad   : > { %p4350_p1 = pnand %p4349_p8, %p4348_p10  ;;  %p4354_p12 = scmp.lt.u32.totalorder %s4352_s13, %s4347_s24 }
  0xae   : > { %p4356_p0 = scmp.lt.u32.totalorder %s4347_s24, %s4787_s22 }
  0xaf   : > { %p4351_p3 = pneg %p4350_p1  ;;  %p4355_p13 = por %p4354_p12, %p4353_p11 }
  0xb1   : > { %p4357_p2 = por %p4356_p0, %p4355_p13 }
  0xb3   : > { %p4358_p5 = pnand %p4357_p2, %p4351_p3 }
  0xb5   : > { %4361 = shalt.err (!%p4358_p5)
}
  0xb6   : > { %s4362_s28 = scalar_lea.vmem %s4789_s8, 8192  ;;  %s4499_s20 = smov [#allocation2]  }
  0xb7   : > { %p4363_p10 = scmp.ne.s32.totalorder %s4789_s8, %s4362_s28  ;;  %s4367_s18 = sshll.u32 %s4499_s20, 4  ;;  %s4368_s18 = int_to_ptr.vmem [resolvable:$false] %s4367_s18 }
  0xb8   : > { %s4369_s21 = scalar_lea.vmem %s4368_s18, 16384  ;;  %p4370_p7 = scmp.lt.s32.totalorder %s4789_s8, %s4368_s18 }
  0xb9   : > { %p4365_p1 = pnand %p4363_p10, %p4349_p8  ;;  %p4371_p11 = scmp.lt.s32.totalorder %s4369_s21, %s4362_s28 }
  0xbb   : > { %p4366_p9 = pneg %p4365_p1  ;;  %p4372_p12 = por %p4371_p11, %p4370_p7 }
  0xbd   : > { %p4373_p13 = pnand %p4372_p12, %p4366_p9 }
  0xbf   : > { %4376 = shalt.err (!%p4373_p13)
}
  0xc0   : > { %s4500_s24 = smov 256   ;;  %s4501_s13 = smov 16  }
  0xc1   : > { %3953 = dma.hbm_to_vmem [thread:$0]  (!%p4793_p4), %s4787_s22, 8192, %s4789_s8, %s4797_s26, %s4500_s24, %s4500_s24, %s4501_s13  }
  0xc2   : > { %p5501_p8 = scmp.ne.s32.totalorder %s5487_s16, 0 }
  0xc3   : > { %s4828_s1 = sand.u32 (!%p5501_p8), 1, %s4479_s10  }
  0xc4   : > { %380 = sbr.rel (%p5501_p8) target bundleno = 1754 (0x6da), region = 52  ;;  %s3478_s29 = sshll.u32 (!%p5501_p8), %s4828_s1, 9 }
  0xc5   : > { %s383_s28 = scalar_lea.sflag (!%p5501_p8), [#allocation3], %s4828_s1  ;;  %s4834_s20 = scalar_lea.vmem (!%p5501_p8), [#allocation2], %s3478_s29 }
  0xcb   : > { %4450 = dma.done.wait (%p4768_p6), %s383_s28, 8192  }
  0xcc   : > { %4452 = vsyncadd (%p4768_p6), %s383_s28, 4294959104  ;;  %p5502_p7 = scmp.eq.s32.totalorder %s4580_s15, 0 }
  0xce   : > { %4454 = dma.done.wait (%p5502_p7), [#allocation6], 6144   ;;  %p5503_p9 = pmov %p5502_p7 }
  0xcf   : > { %p5504_p4 = pmov %p5502_p7 }
  0xd0   : > { %4456 = vsyncadd (%p5503_p9), [#allocation6], 4294961152 }
  0xd1   : > { %4458 = dma.done.wait (%p5504_p4), [#allocation9], 2048   ;;  %p5505_p3 = pmov %p5504_p4 }
  0xd3   : > { %4460 = vsyncadd (%p5505_p3), [#allocation9], 4294965248  ;;  %p5506_p0 = pmov %p5505_p3 }
  0xd5   : > { %4462 = dma.done.wait (%p5506_p0), [#allocation12], 6144   ;;  %p5507_p2 = pmov %p5506_p0 }
  0xd6   : > { %v4024_v0 = vld [vmem:[#allocation5 + $0x4] ss:$8 sps:$4 sm:$0xff]   ;;  %v4026_v1 = vld [vmem:[#allocation5] ss:$8 sps:$4 sm:$0xff]   ;;  %v4027_v2 = vld [vmem:[#allocation5 + $0x14] ss:$8 sps:$4 sm:$0xff]  }
  0xd7   : > { %4464 = vsyncadd (%p5507_p2), [#allocation12], 4294961152  ;;  %752 = vmatprep.subr.bf16.mxu0 %v4024_v0  ;;  %v4029_v3 = vld [vmem:[#allocation5 + $0x10] ss:$8 sps:$4 sm:$0xff]   ;;  %v4030_v4 = vld [vmem:[#allocation5 + $0x24] ss:$8 sps:$4 sm:$0xff]  }
  0xd8   : > { %753 = vmatpush1.bf16.msra.mxu0 %v4026_v1  ;;  %v4032_v5 = vld [vmem:[#allocation5 + $0x20] ss:$8 sps:$4 sm:$0xff]   ;;  %v4033_v6 = vld [vmem:[#allocation5 + $0x34] ss:$8 sps:$4 sm:$0xff]   ;;  %v4035_v7 = vld [vmem:[#allocation5 + $0x30] ss:$8 sps:$4 sm:$0xff]  }
  0xd9   : > { %754 = vmatprep.subr.bf16.mxu0 %v4027_v2  ;;  %v4036_v8 = vld [vmem:[#allocation5 + $0x44] ss:$8 sps:$4 sm:$0xff]   ;;  %v4038_v9 = vld [vmem:[#allocation5 + $0x40] ss:$8 sps:$4 sm:$0xff]   ;;  %v4039_v10 = vld [vmem:[#allocation5 + $0x54] ss:$8 sps:$4 sm:$0xff]  }
  0xda   : > { %v4041_v11 = vld [vmem:[#allocation5 + $0x50] ss:$8 sps:$4 sm:$0xff]   ;;  %v4042_v12 = vld [vmem:[#allocation5 + $0x64] ss:$8 sps:$4 sm:$0xff]   ;;  %v4044_v16 = vld [vmem:[#allocation5 + $0x60] ss:$8 sps:$4 sm:$0xff]  }
  0xdb   : > { %v457_v13 = vld [vmem:[%s4834_s20 + $0x8] sm:$0xff]  ;;  %v459_v14 = vld [vmem:[%s4834_s20 + $0x18] sm:$0xff]  ;;  %v4072_v34 = vld [vmem:[#allocation7 + $0x40] sm:$0xff]   ;;  %s3486_s17 = sshll.u32 %s4828_s1, 8  ;;  %s3612_s16 = sshll.u32 %s4580_s15, 12 }
  0xdc   : > { %755 = vmatpush1.bf16.msra.mxu0 %v4029_v3  ;;  %v521_v15 = vpack.c.bf16 %v459_v14, %v457_v13  ;;  %v4045_v17 = vld [vmem:[#allocation5 + $0x74] ss:$8 sps:$4 sm:$0xff]   ;;  %v4047_v18 = vld [vmem:[#allocation5 + $0x70] ss:$8 sps:$4 sm:$0xff]   ;;  %v4048_v19 = vld [vmem:[#allocation5 + $0x84] ss:$8 sps:$4 sm:$0xff]   ;;  %3613 = vmatprep.subr.bf16.mxu1 %v4072_v34 }
  0xdd   : > { %756 = vmatprep.subr.bf16.mxu0 %v4030_v4  ;;  %v4050_v20 = vld [vmem:[#allocation5 + $0x80] ss:$8 sps:$4 sm:$0xff]   ;;  %v4051_v21 = vld [vmem:[#allocation5 + $0x94] ss:$8 sps:$4 sm:$0xff]   ;;  %v4053_v22 = vld [vmem:[#allocation5 + $0x90] ss:$8 sps:$4 sm:$0xff]  }
  0xde   : > { %784 = vmatprep.mubr.bf16.mxu0 %v521_v15  ;;  %v4054_v23 = vld [vmem:[#allocation5 + $0xa4] ss:$8 sps:$4 sm:$0xff]   ;;  %v4056_v24 = vld [vmem:[#allocation5 + $0xa0] ss:$8 sps:$4 sm:$0xff]   ;;  %v4057_v25 = vld [vmem:[#allocation5 + $0xb4] ss:$8 sps:$4 sm:$0xff]  }
  0xdf   : > { %v4059_v26 = vld [vmem:[#allocation5 + $0xb0] ss:$8 sps:$4 sm:$0xff]   ;;  %v4060_v27 = vld [vmem:[#allocation5 + $0xc4] ss:$8 sps:$4 sm:$0xff]   ;;  %v4062_v28 = vld [vmem:[#allocation5 + $0xc0] ss:$8 sps:$4 sm:$0xff]  }
  0xe0   : > { %757 = vmatpush1.bf16.msra.mxu0 %v4032_v5  ;;  %v4063_v29 = vld [vmem:[#allocation5 + $0xd4] ss:$8 sps:$4 sm:$0xff]   ;;  %v4065_v30 = vld [vmem:[#allocation5 + $0xd0] ss:$8 sps:$4 sm:$0xff]   ;;  %v4066_v31 = vld [vmem:[#allocation5 + $0xe4] ss:$8 sps:$4 sm:$0xff]  }
  0xe1   : > { %758 = vmatprep.subr.bf16.mxu0 %v4033_v6  ;;  %v4068_v32 = vld [vmem:[#allocation5 + $0xe0] ss:$8 sps:$4 sm:$0xff]   ;;  %v4069_v33 = vld [vmem:[#allocation5 + $0xf4] ss:$8 sps:$4 sm:$0xff]   ;;  %v4071_v37 = vld [vmem:[#allocation5 + $0xf0] ss:$8 sps:$4 sm:$0xff]  }
  0xe2   : > { %v4073_v35 = vld [vmem:[#allocation7] sm:$0xff]   ;;  %v4074_v36 = vld [vmem:[#allocation7 + $0x48] sm:$0xff]   ;;  %v458_v39 = vld [vmem:[%s4834_s20 + $0x10] sm:$0xff]  ;;  %s5044_s21 = scalar_lea.vmem [#allocation15], %s3486_s17  ;;  %s5255_s17 = scalar_lea.hbm %s5473_s9, %s3612_s16 }
  0xe3   : > { %v456_v38 = vld [vmem:[%s4834_s20] sm:$0xff]  ;;  %v461_v40 = vld [vmem:[%s4834_s20 + $0x28] sm:$0xff]  ;;  %v463_v41 = vld [vmem:[%s4834_s20 + $0x38] sm:$0xff]  ;;  %3614 = vmatpush3.bf16.msra.mxu1 %v4073_v35  ;;  %s3302_s19 = sshll.u32 %s5044_s21, 4  ;;  %s5261_s26 = scalar_lea.vmem [#allocation14], %s3478_s29  ;;  %s5257_s19 = int_to_ptr.vmem [resolvable:$true] %s3302_s19 }
  0xe4   : > { %759 = vmatpush1.bf16.msra.mxu0 %v4035_v7  ;;  %v4075_v42 = vld [vmem:[#allocation7 + $0x8] sm:$0xff]   ;;  %v4076_v43 = vld [vmem:[#allocation7 + $0x50] sm:$0xff]   ;;  %v520_v44 = vpack.c.bf16 %v458_v39, %v456_v38  ;;  %3615 = vmatprep.subr.bf16.mxu1 %v4074_v36  ;;  %v523_v45 = vpack.c.bf16 %v463_v41, %v461_v40  ;;  %v4078_v47 = vld [vmem:[#allocation7 + $0x58] sm:$0xff]   ;;  %s3272_s18 = scalar_lea.sflag [#allocation16], %s4828_s1  ;;  %p5508_p5 = scmp.ne.s32.totalorder %s5498_s14, 0 }
  0xe5   : > { %760 = vmatprep.subr.bf16.mxu0 %v4036_v8  ;;  %v4077_v46 = vld [vmem:[#allocation7 + $0x10] sm:$0xff]   ;;  %v460_v48 = vld [vmem:[%s4834_s20 + $0x20] sm:$0xff]  ;;  %v465_v50 = vld [vmem:[%s4834_s20 + $0x48] sm:$0xff]  ;;  %s4503_s24 = smov [#allocation15]  }
  0xe6   : > { %v462_v49 = vld [vmem:[%s4834_s20 + $0x30] sm:$0xff]  ;;  %v467_v51 = vld [vmem:[%s4834_s20 + $0x58] sm:$0xff]  ;;  %v4080_v53 = vld [vmem:[#allocation7 + $0x60] sm:$0xff]   ;;  %s4381_s13 = sshll.u32 %s4503_s24, 4  ;;  %s4382_s13 = int_to_ptr.vmem [resolvable:$false] %s4381_s13 }
  0xe7   : > { %3616 = vmatpush3.bf16.msra.mxu1 %v4075_v42  ;;  %v4079_v52 = vld [vmem:[#allocation7 + $0x18] sm:$0xff]   ;;  %v522_v54 = vpack.c.bf16 %v462_v49, %v460_v48  ;;  %v525_v55 = vpack.c.bf16 %v467_v51, %v465_v50  ;;  %v4081_v56 = vld [vmem:[#allocation7 + $0x20] sm:$0xff]   ;;  %v466_v58 = vld [vmem:[%s4834_s20 + $0x50] sm:$0xff]  ;;  %s4383_s29 = scalar_lea.vmem %s4382_s13, 8192  ;;  %p4384_p11 = scmp.lt.s32.totalorder %s5257_s19, %s4382_s13 }
  0xe8   : > { %761 = vmatpush1.bf16.msra.mxu0 %v4038_v9  ;;  %3617 = vmatprep.subr.bf16.mxu1 %v4076_v43  ;;  %v464_v57 = vld [vmem:[%s4834_s20 + $0x40] sm:$0xff]  ;;  %v469_v59 = vld [vmem:[%s4834_s20 + $0x68] sm:$0xff]  ;;  %v471_v60 = vld [vmem:[%s4834_s20 + $0x78] sm:$0xff] }
  0xe9   : > { %762 = vmatprep.subr.bf16.mxu0 %v4039_v10  ;;  %v524_v61 = vpack.c.bf16 %v466_v58, %v464_v57  ;;  %v527_v62 = vpack.c.bf16 %v471_v60, %v469_v59  ;;  %v468_v63 = vld [vmem:[%s4834_s20 + $0x60] sm:$0xff]  ;;  %v470_v0 = vld [vmem:[%s4834_s20 + $0x70] sm:$0xff]  ;;  %v473_v1 = vld [vmem:[%s4834_s20 + $0x88] sm:$0xff] }
  0xea   : > { %v475_v2 = vld [vmem:[%s4834_s20 + $0x98] sm:$0xff]  ;;  %v526_v3 = vpack.c.bf16 %v470_v0, %v468_v63  ;;  %v472_v5 = vld [vmem:[%s4834_s20 + $0x80] sm:$0xff]  ;;  %v474_v6 = vld [vmem:[%s4834_s20 + $0x90] sm:$0xff] }
  0xeb   : > { %3618 = vmatpush3.bf16.msra.mxu1 %v4077_v46  ;;  %v529_v4 = vpack.c.bf16 %v475_v2, %v473_v1  ;;  %v477_v7 = vld [vmem:[%s4834_s20 + $0xa8] sm:$0xff]  ;;  %v479_v8 = vld [vmem:[%s4834_s20 + $0xb8] sm:$0xff]  ;;  %v528_v9 = vpack.c.bf16 %v474_v6, %v472_v5  ;;  %v492_v35 = vld [vmem:[%s4834_s20 + $0x120] sm:$0xff] }
  0xec   : > { %763 = vmatpush1.bf16.msra.mxu0 %v4041_v11  ;;  %3619 = vmatprep.subr.bf16.mxu1 %v4078_v47  ;;  %v531_v10 = vpack.c.bf16 %v479_v8, %v477_v7  ;;  %v476_v11 = vld [vmem:[%s4834_s20 + $0xa0] sm:$0xff]  ;;  %v481_v13 = vld [vmem:[%s4834_s20 + $0xc8] sm:$0xff]  ;;  %v483_v14 = vld [vmem:[%s4834_s20 + $0xd8] sm:$0xff] }
  0xed   : > { %764 = vmatprep.subr.bf16.mxu0 %v4042_v12  ;;  %v478_v12 = vld [vmem:[%s4834_s20 + $0xb0] sm:$0xff]  ;;  %v499_v38 = vld [vmem:[%s4834_s20 + $0x158] sm:$0xff]  ;;  %v496_v41 = vld [vmem:[%s4834_s20 + $0x140] sm:$0xff] }
  0xee   : > { %v530_v15 = vpack.c.bf16 %v478_v12, %v476_v11  ;;  %v494_v36 = vld [vmem:[%s4834_s20 + $0x130] sm:$0xff]  ;;  %v501_v43 = vld [vmem:[%s4834_s20 + $0x168] sm:$0xff]  ;;  %v500_v47 = vld [vmem:[%s4834_s20 + $0x160] sm:$0xff] }
  0xef   : > { %3620 = vmatpush3.bf16.msra.mxu1 %v4079_v52  ;;  %v538_v39 = vpack.c.bf16 %v494_v36, %v492_v35  ;;  %v498_v42 = vld [vmem:[%s4834_s20 + $0x150] sm:$0xff]  ;;  %v4082_v49 = vld [vmem:[#allocation7 + $0x68] sm:$0xff]   ;;  %v507_v51 = vld [vmem:[%s4834_s20 + $0x198] sm:$0xff] }
  0xf0   : > { %765 = vmatpush1.bf16.msra.mxu0 %v4044_v16  ;;  %3621 = vmatprep.subr.bf16.mxu1 %v4080_v53  ;;  %v533_v16 = vpack.c.bf16 %v483_v14, %v481_v13  ;;  %v502_v48 = vld [vmem:[%s4834_s20 + $0x170] sm:$0xff]  ;;  %v505_v50 = vld [vmem:[%s4834_s20 + $0x188] sm:$0xff]  ;;  %v504_v57 = vld [vmem:[%s4834_s20 + $0x180] sm:$0xff] }
  0xf1   : > { %766 = vmatprep.subr.bf16.mxu0 %v4045_v17  ;;  %v480_v17 = vld [vmem:[%s4834_s20 + $0xc0] sm:$0xff]  ;;  %v4083_v52 = vld [vmem:[#allocation7 + $0x28] sm:$0xff]   ;;  %v542_v53 = vpack.c.bf16 %v502_v48, %v500_v47  ;;  %v506_v58 = vld [vmem:[%s4834_s20 + $0x190] sm:$0xff] }
  0xf2   : > { %v4086_v59 = vld [vmem:[#allocation7 + $0x78] sm:$0xff]   ;;  %v509_v60 = vld [vmem:[%s4834_s20 + $0x1a8] sm:$0xff]  ;;  %v544_v63 = vpack.c.bf16 %v506_v58, %v504_v57  ;;  %v508_v1 = vld [vmem:[%s4834_s20 + $0x1a0] sm:$0xff] }
  0xf3   : > { %3622 = vmatpush3.bf16.msra.mxu1 %v4081_v56  ;;  %v4085_v56 = vld [vmem:[#allocation7 + $0x30] sm:$0xff]   ;;  %v512_v7 = vld [vmem:[%s4834_s20 + $0x1c0] sm:$0xff]  ;;  %v4089_v47 = vld [vmem:[#allocation8 + $0x8] sm:$0xff]  }
  0xf4   : > { %767 = vmatpush1.bf16.msra.mxu0 %v4047_v18  ;;  %v482_v18 = vld [vmem:[%s4834_s20 + $0xd0] sm:$0xff]  ;;  %3623 = vmatprep.subr.bf16.mxu1 %v4082_v49  ;;  %v516_v13 = vld [vmem:[%s4834_s20 + $0x1e0] sm:$0xff] }
  0xf5   : > { %768 = vmatprep.subr.bf16.mxu0 %v4048_v19  ;;  %v485_v19 = vld [vmem:[%s4834_s20 + $0xe8] sm:$0xff]  ;;  %v510_v2 = vld [vmem:[%s4834_s20 + $0x1b0] sm:$0xff] }
  0xf6   : > { %v546_v5 = vpack.c.bf16 %v510_v2, %v508_v1  ;;  %v514_v8 = vld [vmem:[%s4834_s20 + $0x1d0] sm:$0xff] }
  0xf7   : > { %3624 = vmatpush3.bf16.msra.mxu1 %v4083_v52  ;;  %v548_v11 = vpack.c.bf16 %v514_v8, %v512_v7  ;;  %v518_v14 = vld [vmem:[%s4834_s20 + $0x1f0] sm:$0xff] }
  0xf8   : > { %769 = vmatpush1.bf16.msra.mxu0 %v4050_v20  ;;  %v487_v20 = vld [vmem:[%s4834_s20 + $0xf8] sm:$0xff] }
  0xf9   : > { %770 = vmatprep.subr.bf16.mxu0 %v4051_v21  ;;  %v532_v21 = vpack.c.bf16 %v482_v18, %v480_v17  ;;  %v4088_v18 = vld [vmem:[#allocation8] sm:$0xff]  }
  0xfc   : > { %771 = vmatpush1.bf16.msra.mxu0 %v4053_v22  ;;  %v535_v22 = vpack.c.bf16 %v487_v20, %v485_v19  ;;  %v4922_v20 = vld [vmem:[%s5471_s7] sm:$0xff] }
  0xfd   : > { %772 = vmatprep.subr.bf16.mxu0 %v4054_v23  ;;  %v484_v23 = vld [vmem:[%s4834_s20 + $0xe0] sm:$0xff] }
 0x100   : > { %773 = vmatpush1.bf16.msra.mxu0 %v4056_v24  ;;  %v486_v24 = vld [vmem:[%s4834_s20 + $0xf0] sm:$0xff] }
 0x101   : > { %774 = vmatprep.subr.bf16.mxu0 %v4057_v25  ;;  %v489_v25 = vld [vmem:[%s4834_s20 + $0x108] sm:$0xff] }
 0x104   : > { %775 = vmatpush1.bf16.msra.mxu0 %v4059_v26  ;;  %v491_v26 = vld [vmem:[%s4834_s20 + $0x118] sm:$0xff] }
 0x105   : > { %776 = vmatprep.subr.bf16.mxu0 %v4060_v27  ;;  %v534_v27 = vpack.c.bf16 %v486_v24, %v484_v23 }
 0x108   : > { %777 = vmatpush1.bf16.msra.mxu0 %v4062_v28  ;;  %v537_v28 = vpack.c.bf16 %v491_v26, %v489_v25 }
 0x109   : > { %778 = vmatprep.subr.bf16.mxu0 %v4063_v29  ;;  %v488_v29 = vld [vmem:[%s4834_s20 + $0x100] sm:$0xff] }
 0x10c   : > { %779 = vmatpush1.bf16.msra.mxu0 %v4065_v30  ;;  %v490_v30 = vld [vmem:[%s4834_s20 + $0x110] sm:$0xff] }
 0x10d   : > { %780 = vmatprep.subr.bf16.mxu0 %v4066_v31  ;;  %v493_v31 = vld [vmem:[%s4834_s20 + $0x128] sm:$0xff] }
 0x110   : > { %781 = vmatpush1.bf16.msra.mxu0 %v4068_v32  ;;  %v495_v32 = vld [vmem:[%s4834_s20 + $0x138] sm:$0xff] }
 0x111   : > { %782 = vmatprep.subr.bf16.mxu0 %v4069_v33  ;;  %v536_v33 = vpack.c.bf16 %v490_v30, %v488_v29  ;;  %v539_v34 = vpack.c.bf16 %v495_v32, %v493_v31 }
 0x114   : > { %783 = vmatpush1.bf16.msra.mxu0 %v4071_v37  ;;  %v497_v37 = vld [vmem:[%s4834_s20 + $0x148] sm:$0xff] }
 0x115   : > { %v541_v40 = vpack.c.bf16 %v499_v38, %v497_v37 }
 0x117   : > { %785 = vmatmul.mubr.bf16.vlgmr.msra.gmra.mrb[0].mxu0 %v520_v44  ;;  %v503_v44 = vld [vmem:[%s4834_s20 + $0x178] sm:$0xff] }
 0x118   : > { %794 = vmatprep.mubr.bf16.mxu0 %v523_v45  ;;  %v540_v45 = vpack.c.bf16 %v498_v42, %v496_v41  ;;  %v543_v46 = vpack.c.bf16 %v503_v44, %v501_v43 }
 0x11f   : > { %795 = vmatmul.mubr.bf16.gmra.mrb[4].mxu0 %v522_v54  ;;  %v545_v54 = vpack.c.bf16 %v507_v51, %v505_v50 }
 0x120   : > { %804 = vmatprep.mubr.bf16.mxu0 %v525_v55  ;;  %v4084_v55 = vld [vmem:[#allocation7 + $0x70] sm:$0xff]  }
 0x121   : > { %3625 = vmatprep.subr.bf16.mxu1 %v4084_v55  ;;  %v4090_v55 = vld [vmem:[#allocation8 + $0x10] sm:$0xff]  }
 0x122   : > { %3626 = vmatpush3.bf16.msra.mxu1 %v4085_v56 }
 0x123   : > { %3627 = vmatprep.subr.bf16.mxu1 %v4086_v59 }
 0x127   : > { %805 = vmatmul.mubr.bf16.gmra.mrb[8].mxu0 %v524_v61  ;;  %v511_v61 = vld [vmem:[%s4834_s20 + $0x1b8] sm:$0xff] }
 0x128   : > { %814 = vmatprep.mubr.bf16.mxu0 %v527_v62  ;;  %v4087_v62 = vld [vmem:[#allocation7 + $0x38] sm:$0xff]   ;;  %v547_v0 = vpack.c.bf16 %v511_v61, %v509_v60 }
 0x129   : > { %3628 = vmatpush3.bf16.msra.mxu1 %v4087_v62 }
 0x12a   : > { %3773 = vmatprep.subr.bf16.mxu1 %v4088_v18 }
 0x12f   : > { %815 = vmatmul.mubr.bf16.gmra.mrb[12].mxu0 %v526_v3  ;;  %v513_v3 = vld [vmem:[%s4834_s20 + $0x1c8] sm:$0xff] }
 0x130   : > { %824 = vmatprep.mubr.bf16.mxu0 %v529_v4  ;;  %v515_v4 = vld [vmem:[%s4834_s20 + $0x1d8] sm:$0xff] }
 0x131   : > { %v549_v6 = vpack.c.bf16 %v515_v4, %v513_v3  ;;  %v4091_v3 = vld [vmem:[#allocation8 + $0x18] sm:$0xff]  }
 0x137   : > { %825 = vmatmul.mubr.bf16.gmra.mrb[16].mxu0 %v528_v9  ;;  %v517_v9 = vld [vmem:[%s4834_s20 + $0x1e8] sm:$0xff] }
 0x138   : > { %834 = vmatprep.mubr.bf16.mxu0 %v531_v10  ;;  %v519_v10 = vld [vmem:[%s4834_s20 + $0x1f8] sm:$0xff] }
 0x139   : > { %v551_v12 = vpack.c.bf16 %v519_v10, %v517_v9 }
 0x13f   : > { %835 = vmatmul.mubr.bf16.gmra.mrb[20].mxu0 %v530_v15  ;;  %v550_v15 = vpack.c.bf16 %v518_v14, %v516_v13 }
 0x140   : > { %844 = vmatprep.mubr.bf16.mxu0 %v533_v16  ;;  %v584_v16 = vlaneseq }
 0x142   : > { %v4916_v17 = vshrl.u32 %v584_v16, 7 }
 0x144   : > { %v586_v19 = vsub.s32 0, %v4916_v17 }
 0x147   : > { %845 = vmatmul.mubr.bf16.gmra.mrb[24].mxu0 %v532_v21  ;;  %v455_v21 = vld [vmem:[%s5471_s7 + $0x8] sm:$0xff] }
 0x148   : > { %854 = vmatprep.mubr.bf16.mxu0 %v535_v22  ;;  %v4928_v22 = vrot.slane %v4922_v20, %v586_v19  ;;  %v4930_v23 = vrot.slane %v455_v21, %v586_v19 }
 0x14f   : > { %855 = vmatmul.mubr.bf16.gmra.mrb[28].mxu0 %v534_v27 }
 0x150   : > { %864 = vmatprep.mubr.bf16.mxu0 %v537_v28 }
 0x157   : > { %865 = vmatmul.mubr.bf16.gmra.mrb[32].mxu0 %v536_v33 }
 0x158   : > { %874 = vmatprep.mubr.bf16.mxu0 %v539_v34 }
 0x15f   : > { %875 = vmatmul.mubr.bf16.gmra.mrb[36].mxu0 %v538_v39 }
 0x160   : > { %884 = vmatprep.mubr.bf16.mxu0 %v541_v40 }
 0x167   : > { %885 = vmatmul.mubr.bf16.gmra.mrb[40].mxu0 %v540_v45 }
 0x168   : > { %894 = vmatprep.mubr.bf16.mxu0 %v543_v46 }
 0x16f   : > { %895 = vmatmul.mubr.bf16.gmra.mrb[44].mxu0 %v542_v53 }
 0x170   : > { %904 = vmatprep.mubr.bf16.mxu0 %v545_v54 }
 0x177   : > { %905 = vmatmul.mubr.bf16.gmra.mrb[48].mxu0 %v544_v63 }
 0x178   : > { %914 = vmatprep.mubr.bf16.mxu0 %v547_v0 }
 0x17f   : > { %915 = vmatmul.mubr.bf16.gmra.mrb[52].mxu0 %v546_v5 }
 0x180   : > { %924 = vmatprep.mubr.bf16.mxu0 %v549_v6 }
 0x187   : > { %925 = vmatmul.mubr.bf16.gmra.mrb[56].mxu0 %v548_v11  ;;  %v4092_v11 = vld [vmem:[#allocation8 + $0x20] sm:$0xff]  }
 0x188   : > { %934 = vmatprep.mubr.bf16.mxu0 %v551_v12 }
 0x18f   : > { %935 = vmatmul.mubr.bf16.gmra.mrb[60].mxu0 %v550_v15 }
 0x1ea   : > { %v786_v24 = vpop.f32.mrb[0].mxu0 }
 0x1eb   : > { %v787_v25 = vadd.f32 %v786_v24, %v4928_v22  ;;  %v788_v26 = vpop.f32.mrb[1].mxu0 }
 0x1ec   : > { %v789_v27 = vadd.f32 %v788_v26, %v4930_v23  ;;  %v790_v28 = vpop.f32.mrb[2].mxu0 }
 0x1ed   : > { %v1009_v29 = vmul.f32 0.01, %v787_v25  ;;  %v791_v30 = vadd.f32 %v790_v28, %v4928_v22  ;;  %v792_v31 = vpop.f32.mrb[3].mxu0  ;;  %vm945_vm0 = vcmp.ge.f32.partialorder %v787_v25, 0.0 }
 0x1ee   : > { %v1010_v32 = vmul.f32 0.01, %v789_v27  ;;  %v793_v33 = vadd.f32 %v792_v31, %v4930_v23  ;;  %vm946_vm2 = vcmp.ge.f32.partialorder %v789_v27, 0.0 }
 0x1ef   : > { %vm947_vm1 = vcmp.ge.f32.partialorder %v791_v30, 0.0  ;;  %v1011_v34 = vmul.f32 0.01, %v791_v30  ;;  %v1073_v36 = vsel %vm945_vm0, %v787_v25, %v1009_v29 }
 0x1f0   : > { %v1012_v35 = vmul.f32 0.01, %v793_v33  ;;  %vm948_vm3 = vcmp.ge.f32.partialorder %v793_v33, 0.0  ;;  %v1074_v39 = vsel %vm946_vm2, %v789_v27, %v1010_v32  ;;  %v4093_v27 = vld [vmem:[#allocation8 + $0x28] sm:$0xff]  }
 0x1f1   : > { %v1075_v37 = vsel %vm947_vm1, %v791_v30, %v1011_v34 }
 0x1f2   : > { %v796_v38 = vpop.f32.mrb[4].mxu0  ;;  %v1076_v40 = vsel %vm948_vm3, %v793_v33, %v1012_v35  ;;  %v1137_v41 = vpack.c.bf16 %v1075_v37, %v1073_v36  ;;  %v4094_v35 = vld [vmem:[#allocation8 + $0x30] sm:$0xff]  }
 0x1f3   : > { %v797_v42 = vadd.f32 %v796_v38, %v4928_v22  ;;  %v798_v43 = vpop.f32.mrb[5].mxu0  ;;  %v1138_v44 = vpack.c.bf16 %v1076_v40, %v1074_v39 }
 0x1f4   : > { %v799_v45 = vadd.f32 %v798_v43, %v4930_v23  ;;  %v800_v46 = vpop.f32.mrb[6].mxu0 }
 0x1f5   : > { %v1013_v48 = vmul.f32 0.01, %v797_v42  ;;  %v801_v49 = vadd.f32 %v800_v46, %v4928_v22  ;;  %v802_v50 = vpop.f32.mrb[7].mxu0  ;;  %1333 = vmatprep.mubr.bf16.mxu1 %v1138_v44  ;;  %vm949_vm4 = vcmp.ge.f32.partialorder %v797_v42, 0.0 }
 0x1f6   : > { %v1014_v51 = vmul.f32 0.01, %v799_v45  ;;  %v803_v52 = vadd.f32 %v802_v50, %v4930_v23  ;;  %1334 = vmatmul.mubr.bf16.vlgmr.msra.gmra.mrb[0].mxu1 %v1137_v41  ;;  %vm950_vm5 = vcmp.ge.f32.partialorder %v799_v45, 0.0 }
 0x1f7   : > { %vm951_vm6 = vcmp.ge.f32.partialorder %v801_v49, 0.0  ;;  %v1015_v53 = vmul.f32 0.01, %v801_v49  ;;  %3774 = vmatpush3.bf16.msra.mxu1 %v4088_v18  ;;  %v1077_v56 = vsel %vm949_vm4, %v797_v42, %v1013_v48 }
 0x1f8   : > { %vm952_vm7 = vcmp.ge.f32.partialorder %v803_v52, 0.0  ;;  %v1016_v54 = vmul.f32 0.01, %v803_v52  ;;  %3775 = vmatprep.subr.bf16.mxu1 %v4089_v47  ;;  %v1078_v59 = vsel %vm950_vm5, %v799_v45, %v1014_v51 }
 0x1f9   : > { %v1079_v57 = vsel %vm951_vm6, %v801_v49, %v1015_v53 }
 0x1fa   : > { %v806_v58 = vpop.f32.mrb[8].mxu0  ;;  %v1080_v60 = vsel %vm952_vm7, %v803_v52, %v1016_v54  ;;  %v1139_v61 = vpack.c.bf16 %v1079_v57, %v1077_v56 }
 0x1fb   : > { %v807_v62 = vadd.f32 %v806_v58, %v4928_v22  ;;  %v808_v63 = vpop.f32.mrb[9].mxu0  ;;  %v1140_v0 = vpack.c.bf16 %v1080_v60, %v1078_v59  ;;  %3776 = vmatpush3.bf16.msra.mxu1 %v4089_v47 }
 0x1fc   : > { %v809_v1 = vadd.f32 %v808_v63, %v4930_v23  ;;  %v810_v2 = vpop.f32.mrb[10].mxu0  ;;  %3777 = vmatprep.subr.bf16.mxu1 %v4090_v55 }
 0x1fd   : > { %v1017_v4 = vmul.f32 0.01, %v807_v62  ;;  %v811_v5 = vadd.f32 %v810_v2, %v4928_v22  ;;  %v812_v6 = vpop.f32.mrb[11].mxu0  ;;  %1341 = vmatprep.mubr.bf16.mxu1 %v1140_v0  ;;  %vm953_vm8 = vcmp.ge.f32.partialorder %v807_v62, 0.0 }
 0x1fe   : > { %v1018_v7 = vmul.f32 0.01, %v809_v1  ;;  %v813_v8 = vadd.f32 %v812_v6, %v4930_v23  ;;  %1342 = vmatmul.mubr.bf16.gmra.mrb[4].mxu1 %v1139_v61  ;;  %vm954_vm9 = vcmp.ge.f32.partialorder %v809_v1, 0.0 }
 0x1ff   : > { %vm955_vm10 = vcmp.ge.f32.partialorder %v811_v5, 0.0  ;;  %v1019_v9 = vmul.f32 0.01, %v811_v5  ;;  %3778 = vmatpush3.bf16.msra.mxu1 %v4090_v55  ;;  %v1081_v12 = vsel %vm953_vm8, %v807_v62, %v1017_v4 }
 0x200   : > { %vm956_vm11 = vcmp.ge.f32.partialorder %v813_v8, 0.0  ;;  %v1020_v10 = vmul.f32 0.01, %v813_v8  ;;  %3779 = vmatprep.subr.bf16.mxu1 %v4091_v3  ;;  %v1082_v15 = vsel %vm954_vm9, %v809_v1, %v1018_v7 }
 0x201   : > { %v1083_v13 = vsel %vm955_vm10, %v811_v5, %v1019_v9 }
 0x202   : > { %v816_v14 = vpop.f32.mrb[12].mxu0  ;;  %v1084_v16 = vsel %vm956_vm11, %v813_v8, %v1020_v10  ;;  %v1141_v18 = vpack.c.bf16 %v1083_v13, %v1081_v12 }
 0x203   : > { %v817_v19 = vadd.f32 %v816_v14, %v4928_v22  ;;  %v818_v21 = vpop.f32.mrb[13].mxu0  ;;  %v1142_v24 = vpack.c.bf16 %v1084_v16, %v1082_v15  ;;  %3780 = vmatpush3.bf16.msra.mxu1 %v4091_v3 }
 0x204   : > { %v819_v25 = vadd.f32 %v818_v21, %v4930_v23  ;;  %v820_v26 = vpop.f32.mrb[14].mxu0  ;;  %3781 = vmatprep.subr.bf16.mxu1 %v4092_v11 }
 0x205   : > { %v1021_v28 = vmul.f32 0.01, %v817_v19  ;;  %v821_v29 = vadd.f32 %v820_v26, %v4928_v22  ;;  %v822_v30 = vpop.f32.mrb[15].mxu0  ;;  %1349 = vmatprep.mubr.bf16.mxu1 %v1142_v24  ;;  %vm957_vm12 = vcmp.ge.f32.partialorder %v817_v19, 0.0 }
 0x206   : > { %v1022_v31 = vmul.f32 0.01, %v819_v25  ;;  %v823_v32 = vadd.f32 %v822_v30, %v4930_v23  ;;  %1350 = vmatmul.mubr.bf16.gmra.mrb[8].mxu1 %v1141_v18  ;;  %vm958_vm13 = vcmp.ge.f32.partialorder %v819_v25, 0.0 }
 0x207   : > { %vm959_vm14 = vcmp.ge.f32.partialorder %v821_v29, 0.0  ;;  %v1023_v33 = vmul.f32 0.01, %v821_v29  ;;  %3782 = vmatpush3.bf16.msra.mxu1 %v4092_v11  ;;  %v1085_v36 = vsel %vm957_vm12, %v817_v19, %v1021_v28 }
 0x208   : > { %vm960_vm15 = vcmp.ge.f32.partialorder %v823_v32, 0.0  ;;  %v1024_v34 = vmul.f32 0.01, %v823_v32  ;;  %3783 = vmatprep.subr.bf16.mxu1 %v4093_v27  ;;  %v1086_v39 = vsel %vm958_vm13, %v819_v25, %v1022_v31 }
 0x209   : > { %v1087_v37 = vsel %vm959_vm14, %v821_v29, %v1023_v33 }
 0x20a   : > { %v826_v38 = vpop.f32.mrb[16].mxu0  ;;  %v1088_v40 = vsel %vm960_vm15, %v823_v32, %v1024_v34  ;;  %v1143_v41 = vpack.c.bf16 %v1087_v37, %v1085_v36 }
 0x20b   : > { %v827_v42 = vadd.f32 %v826_v38, %v4928_v22  ;;  %v828_v43 = vpop.f32.mrb[17].mxu0  ;;  %v1144_v44 = vpack.c.bf16 %v1088_v40, %v1086_v39  ;;  %3784 = vmatpush3.bf16.msra.mxu1 %v4093_v27 }
 0x20c   : > { %v829_v45 = vadd.f32 %v828_v43, %v4930_v23  ;;  %v830_v46 = vpop.f32.mrb[18].mxu0  ;;  %3785 = vmatprep.subr.bf16.mxu1 %v4094_v35 }
 0x20d   : > { %v1025_v47 = vmul.f32 0.01, %v827_v42  ;;  %v831_v48 = vadd.f32 %v830_v46, %v4928_v22  ;;  %v832_v49 = vpop.f32.mrb[19].mxu0  ;;  %1357 = vmatprep.mubr.bf16.mxu1 %v1144_v44  ;;  %vm961_vm0 = vcmp.ge.f32.partialorder %v827_v42, 0.0 }
 0x20e   : > { %v1026_v50 = vmul.f32 0.01, %v829_v45  ;;  %v833_v51 = vadd.f32 %v832_v49, %v4930_v23  ;;  %1358 = vmatmul.mubr.bf16.gmra.mrb[12].mxu1 %v1143_v41  ;;  %vm962_vm1 = vcmp.ge.f32.partialorder %v829_v45, 0.0 }
 0x20f   : > { %vm963_vm2 = vcmp.ge.f32.partialorder %v831_v48, 0.0  ;;  %v1027_v52 = vmul.f32 0.01, %v831_v48  ;;  %3786 = vmatpush3.bf16.msra.mxu1 %v4094_v35  ;;  %v1089_v54 = vsel %vm961_vm0, %v827_v42, %v1025_v47 }
 0x210   : > { %vm964_vm3 = vcmp.ge.f32.partialorder %v833_v51, 0.0  ;;  %v1028_v53 = vmul.f32 0.01, %v833_v51  ;;  %v1090_v57 = vsel %vm962_vm1, %v829_v45, %v1026_v50 }
 0x211   : > { %v1091_v55 = vsel %vm963_vm2, %v831_v48, %v1027_v52 }
 0x212   : > { %v836_v56 = vpop.f32.mrb[20].mxu0  ;;  %v1092_v58 = vsel %vm964_vm3, %v833_v51, %v1028_v53  ;;  %v1145_v59 = vpack.c.bf16 %v1091_v55, %v1089_v54 }
 0x213   : > { %v837_v60 = vadd.f32 %v836_v56, %v4928_v22  ;;  %v838_v61 = vpop.f32.mrb[21].mxu0  ;;  %v1146_v62 = vpack.c.bf16 %v1092_v58, %v1090_v57 }
 0x214   : > { %v839_v63 = vadd.f32 %v838_v61, %v4930_v23  ;;  %v840_v0 = vpop.f32.mrb[22].mxu0 }
 0x215   : > { %v1029_v1 = vmul.f32 0.01, %v837_v60  ;;  %v841_v2 = vadd.f32 %v840_v0, %v4928_v22  ;;  %v842_v3 = vpop.f32.mrb[23].mxu0  ;;  %1365 = vmatprep.mubr.bf16.mxu1 %v1146_v62  ;;  %vm965_vm4 = vcmp.ge.f32.partialorder %v837_v60, 0.0 }
 0x216   : > { %v1030_v4 = vmul.f32 0.01, %v839_v63  ;;  %v843_v5 = vadd.f32 %v842_v3, %v4930_v23  ;;  %1366 = vmatmul.mubr.bf16.gmra.mrb[16].mxu1 %v1145_v59  ;;  %vm966_vm5 = vcmp.ge.f32.partialorder %v839_v63, 0.0 }
 0x217   : > { %vm967_vm6 = vcmp.ge.f32.partialorder %v841_v2, 0.0  ;;  %v1031_v6 = vmul.f32 0.01, %v841_v2  ;;  %v1093_v8 = vsel %vm965_vm4, %v837_v60, %v1029_v1 }
 0x218   : > { %vm968_vm7 = vcmp.ge.f32.partialorder %v843_v5, 0.0  ;;  %v1032_v7 = vmul.f32 0.01, %v843_v5  ;;  %v1094_v11 = vsel %vm966_vm5, %v839_v63, %v1030_v4 }
 0x219   : > { %v1095_v9 = vsel %vm967_vm6, %v841_v2, %v1031_v6 }
 0x21a   : > { %v846_v10 = vpop.f32.mrb[24].mxu0  ;;  %v1096_v12 = vsel %vm968_vm7, %v843_v5, %v1032_v7  ;;  %v1147_v13 = vpack.c.bf16 %v1095_v9, %v1093_v8 }
 0x21b   : > { %v847_v14 = vadd.f32 %v846_v10, %v4928_v22  ;;  %v848_v15 = vpop.f32.mrb[25].mxu0  ;;  %v1148_v16 = vpack.c.bf16 %v1096_v12, %v1094_v11 }
 0x21c   : > { %v849_v18 = vadd.f32 %v848_v15, %v4930_v23  ;;  %v850_v19 = vpop.f32.mrb[26].mxu0 }
 0x21d   : > { %v1033_v21 = vmul.f32 0.01, %v847_v14  ;;  %v851_v24 = vadd.f32 %v850_v19, %v4928_v22  ;;  %v852_v25 = vpop.f32.mrb[27].mxu0  ;;  %1373 = vmatprep.mubr.bf16.mxu1 %v1148_v16  ;;  %vm969_vm8 = vcmp.ge.f32.partialorder %v847_v14, 0.0 }
 0x21e   : > { %v1034_v26 = vmul.f32 0.01, %v849_v18  ;;  %v853_v27 = vadd.f32 %v852_v25, %v4930_v23  ;;  %1374 = vmatmul.mubr.bf16.gmra.mrb[20].mxu1 %v1147_v13  ;;  %vm970_vm9 = vcmp.ge.f32.partialorder %v849_v18, 0.0 }
 0x21f   : > { %vm971_vm10 = vcmp.ge.f32.partialorder %v851_v24, 0.0  ;;  %v1035_v28 = vmul.f32 0.01, %v851_v24  ;;  %v1097_v30 = vsel %vm969_vm8, %v847_v14, %v1033_v21 }
 0x220   : > { %vm972_vm11 = vcmp.ge.f32.partialorder %v853_v27, 0.0  ;;  %v1036_v29 = vmul.f32 0.01, %v853_v27  ;;  %v1098_v33 = vsel %vm970_vm9, %v849_v18, %v1034_v26 }
 0x221   : > { %v1099_v31 = vsel %vm971_vm10, %v851_v24, %v1035_v28 }
 0x222   : > { %v856_v32 = vpop.f32.mrb[28].mxu0  ;;  %v1100_v34 = vsel %vm972_vm11, %v853_v27, %v1036_v29  ;;  %v1149_v35 = vpack.c.bf16 %v1099_v31, %v1097_v30 }
 0x223   : > { %v857_v36 = vadd.f32 %v856_v32, %v4928_v22  ;;  %v858_v37 = vpop.f32.mrb[29].mxu0  ;;  %v1150_v38 = vpack.c.bf16 %v1100_v34, %v1098_v33 }
 0x224   : > { %v859_v39 = vadd.f32 %v858_v37, %v4930_v23  ;;  %v860_v40 = vpop.f32.mrb[30].mxu0 }
 0x225   : > { %v1037_v41 = vmul.f32 0.01, %v857_v36  ;;  %v861_v42 = vadd.f32 %v860_v40, %v4928_v22  ;;  %v862_v43 = vpop.f32.mrb[31].mxu0  ;;  %1381 = vmatprep.mubr.bf16.mxu1 %v1150_v38  ;;  %vm973_vm12 = vcmp.ge.f32.partialorder %v857_v36, 0.0 }
 0x226   : > { %v1038_v44 = vmul.f32 0.01, %v859_v39  ;;  %v863_v45 = vadd.f32 %v862_v43, %v4930_v23  ;;  %1382 = vmatmul.mubr.bf16.gmra.mrb[24].mxu1 %v1149_v35  ;;  %vm974_vm13 = vcmp.ge.f32.partialorder %v859_v39, 0.0 }
 0x227   : > { %vm975_vm14 = vcmp.ge.f32.partialorder %v861_v42, 0.0  ;;  %v1039_v46 = vmul.f32 0.01, %v861_v42  ;;  %v1101_v48 = vsel %vm973_vm12, %v857_v36, %v1037_v41 }
 0x228   : > { %vm976_vm15 = vcmp.ge.f32.partialorder %v863_v45, 0.0  ;;  %v1040_v47 = vmul.f32 0.01, %v863_v45  ;;  %v1102_v51 = vsel %vm974_vm13, %v859_v39, %v1038_v44 }
 0x229   : > { %v1103_v49 = vsel %vm975_vm14, %v861_v42, %v1039_v46 }
 0x22a   : > { %v866_v50 = vpop.f32.mrb[32].mxu0  ;;  %v1104_v52 = vsel %vm976_vm15, %v863_v45, %v1040_v47  ;;  %v1151_v53 = vpack.c.bf16 %v1103_v49, %v1101_v48 }
 0x22b   : > { %v867_v54 = vadd.f32 %v866_v50, %v4928_v22  ;;  %v868_v55 = vpop.f32.mrb[33].mxu0  ;;  %v1152_v56 = vpack.c.bf16 %v1104_v52, %v1102_v51 }
 0x22c   : > { %v869_v57 = vadd.f32 %v868_v55, %v4930_v23  ;;  %v870_v58 = vpop.f32.mrb[34].mxu0 }
 0x22d   : > { %v1041_v59 = vmul.f32 0.01, %v867_v54  ;;  %v871_v60 = vadd.f32 %v870_v58, %v4928_v22  ;;  %v872_v61 = vpop.f32.mrb[35].mxu0  ;;  %1389 = vmatprep.mubr.bf16.mxu1 %v1152_v56  ;;  %vm977_vm0 = vcmp.ge.f32.partialorder %v867_v54, 0.0 }
 0x22e   : > { %v1042_v62 = vmul.f32 0.01, %v869_v57  ;;  %v873_v63 = vadd.f32 %v872_v61, %v4930_v23  ;;  %1390 = vmatmul.mubr.bf16.gmra.mrb[28].mxu1 %v1151_v53  ;;  %vm978_vm1 = vcmp.ge.f32.partialorder %v869_v57, 0.0 }
 0x22f   : > { %vm979_vm2 = vcmp.ge.f32.partialorder %v871_v60, 0.0  ;;  %v1043_v0 = vmul.f32 0.01, %v871_v60  ;;  %v1105_v2 = vsel %vm977_vm0, %v867_v54, %v1041_v59 }
 0x230   : > { %vm980_vm3 = vcmp.ge.f32.partialorder %v873_v63, 0.0  ;;  %v1044_v1 = vmul.f32 0.01, %v873_v63  ;;  %v1106_v5 = vsel %vm978_vm1, %v869_v57, %v1042_v62 }
 0x231   : > { %v1107_v3 = vsel %vm979_vm2, %v871_v60, %v1043_v0 }
 0x232   : > { %v876_v4 = vpop.f32.mrb[36].mxu0  ;;  %v1108_v6 = vsel %vm980_vm3, %v873_v63, %v1044_v1  ;;  %v1153_v7 = vpack.c.bf16 %v1107_v3, %v1105_v2 }
 0x233   : > { %v877_v8 = vadd.f32 %v876_v4, %v4928_v22  ;;  %v878_v9 = vpop.f32.mrb[37].mxu0  ;;  %v1154_v10 = vpack.c.bf16 %v1108_v6, %v1106_v5 }
 0x234   : > { %v879_v11 = vadd.f32 %v878_v9, %v4930_v23  ;;  %v880_v12 = vpop.f32.mrb[38].mxu0 }
 0x235   : > { %v1045_v13 = vmul.f32 0.01, %v877_v8  ;;  %v881_v14 = vadd.f32 %v880_v12, %v4928_v22  ;;  %v882_v15 = vpop.f32.mrb[39].mxu0  ;;  %1397 = vmatprep.mubr.bf16.mxu1 %v1154_v10  ;;  %vm981_vm4 = vcmp.ge.f32.partialorder %v877_v8, 0.0 }
 0x236   : > { %v1046_v16 = vmul.f32 0.01, %v879_v11  ;;  %v883_v18 = vadd.f32 %v882_v15, %v4930_v23  ;;  %1398 = vmatmul.mubr.bf16.gmra.mrb[32].mxu1 %v1153_v7  ;;  %vm982_vm5 = vcmp.ge.f32.partialorder %v879_v11, 0.0 }
 0x237   : > { %vm983_vm6 = vcmp.ge.f32.partialorder %v881_v14, 0.0  ;;  %v1047_v19 = vmul.f32 0.01, %v881_v14  ;;  %v1109_v24 = vsel %vm981_vm4, %v877_v8, %v1045_v13 }
 0x238   : > { %vm984_vm7 = vcmp.ge.f32.partialorder %v883_v18, 0.0  ;;  %v1048_v21 = vmul.f32 0.01, %v883_v18  ;;  %v1110_v27 = vsel %vm982_vm5, %v879_v11, %v1046_v16  ;;  %v4095_v16 = vld [vmem:[#allocation8 + $0x38] sm:$0xff]  }
 0x239   : > { %v1111_v25 = vsel %vm983_vm6, %v881_v14, %v1047_v19  ;;  %3787 = vmatprep.subr.bf16.mxu1 %v4095_v16 }
 0x23a   : > { %v886_v26 = vpop.f32.mrb[40].mxu0  ;;  %v1112_v28 = vsel %vm984_vm7, %v883_v18, %v1048_v21  ;;  %v1155_v29 = vpack.c.bf16 %v1111_v25, %v1109_v24  ;;  %3788 = vmatpush3.bf16.msra.mxu1 %v4095_v16 }
 0x23b   : > { %v887_v30 = vadd.f32 %v886_v26, %v4928_v22  ;;  %v888_v31 = vpop.f32.mrb[41].mxu0  ;;  %v1156_v32 = vpack.c.bf16 %v1112_v28, %v1110_v27 }
 0x23c   : > { %v889_v33 = vadd.f32 %v888_v31, %v4930_v23  ;;  %v890_v34 = vpop.f32.mrb[42].mxu0 }
 0x23d   : > { %v1049_v35 = vmul.f32 0.01, %v887_v30  ;;  %v891_v36 = vadd.f32 %v890_v34, %v4928_v22  ;;  %v892_v37 = vpop.f32.mrb[43].mxu0  ;;  %1405 = vmatprep.mubr.bf16.mxu1 %v1156_v32  ;;  %vm985_vm8 = vcmp.ge.f32.partialorder %v887_v30, 0.0 }
 0x23e   : > { %v1050_v38 = vmul.f32 0.01, %v889_v33  ;;  %v893_v39 = vadd.f32 %v892_v37, %v4930_v23  ;;  %1406 = vmatmul.mubr.bf16.gmra.mrb[36].mxu1 %v1155_v29  ;;  %vm986_vm9 = vcmp.ge.f32.partialorder %v889_v33, 0.0 }
 0x23f   : > { %vm987_vm10 = vcmp.ge.f32.partialorder %v891_v36, 0.0  ;;  %v1051_v40 = vmul.f32 0.01, %v891_v36  ;;  %v1113_v42 = vsel %vm985_vm8, %v887_v30, %v1049_v35 }
 0x240   : > { %vm988_vm11 = vcmp.ge.f32.partialorder %v893_v39, 0.0  ;;  %v1052_v41 = vmul.f32 0.01, %v893_v39  ;;  %v1114_v45 = vsel %vm986_vm9, %v889_v33, %v1050_v38 }
 0x241   : > { %v1115_v43 = vsel %vm987_vm10, %v891_v36, %v1051_v40 }
 0x242   : > { %v896_v44 = vpop.f32.mrb[44].mxu0  ;;  %v1116_v46 = vsel %vm988_vm11, %v893_v39, %v1052_v41  ;;  %v1157_v47 = vpack.c.bf16 %v1115_v43, %v1113_v42 }
 0x243   : > { %v897_v48 = vadd.f32 %v896_v44, %v4928_v22  ;;  %v898_v49 = vpop.f32.mrb[45].mxu0  ;;  %v1158_v50 = vpack.c.bf16 %v1116_v46, %v1114_v45 }
 0x244   : > { %v899_v51 = vadd.f32 %v898_v49, %v4930_v23  ;;  %v900_v52 = vpop.f32.mrb[46].mxu0 }
 0x245   : > { %v1053_v53 = vmul.f32 0.01, %v897_v48  ;;  %v901_v54 = vadd.f32 %v900_v52, %v4928_v22  ;;  %v902_v55 = vpop.f32.mrb[47].mxu0  ;;  %1413 = vmatprep.mubr.bf16.mxu1 %v1158_v50  ;;  %vm989_vm12 = vcmp.ge.f32.partialorder %v897_v48, 0.0 }
 0x246   : > { %v1054_v56 = vmul.f32 0.01, %v899_v51  ;;  %v903_v57 = vadd.f32 %v902_v55, %v4930_v23  ;;  %1414 = vmatmul.mubr.bf16.gmra.mrb[40].mxu1 %v1157_v47  ;;  %vm990_vm13 = vcmp.ge.f32.partialorder %v899_v51, 0.0 }
 0x247   : > { %vm991_vm14 = vcmp.ge.f32.partialorder %v901_v54, 0.0  ;;  %v1055_v58 = vmul.f32 0.01, %v901_v54  ;;  %v1117_v60 = vsel %vm989_vm12, %v897_v48, %v1053_v53 }
 0x248   : > { %vm992_vm15 = vcmp.ge.f32.partialorder %v903_v57, 0.0  ;;  %v1056_v59 = vmul.f32 0.01, %v903_v57  ;;  %v1118_v63 = vsel %vm990_vm13, %v899_v51, %v1054_v56 }
 0x249   : > { %v1119_v61 = vsel %vm991_vm14, %v901_v54, %v1055_v58 }
 0x24a   : > { %v906_v62 = vpop.f32.mrb[48].mxu0  ;;  %v1120_v0 = vsel %vm992_vm15, %v903_v57, %v1056_v59  ;;  %v1159_v1 = vpack.c.bf16 %v1119_v61, %v1117_v60 }
 0x24b   : > { %v907_v2 = vadd.f32 %v906_v62, %v4928_v22  ;;  %v908_v3 = vpop.f32.mrb[49].mxu0  ;;  %v1160_v4 = vpack.c.bf16 %v1120_v0, %v1118_v63 }
 0x24c   : > { %v909_v5 = vadd.f32 %v908_v3, %v4930_v23  ;;  %v910_v6 = vpop.f32.mrb[50].mxu0 }
 0x24d   : > { %v1057_v7 = vmul.f32 0.01, %v907_v2  ;;  %v911_v8 = vadd.f32 %v910_v6, %v4928_v22  ;;  %v912_v9 = vpop.f32.mrb[51].mxu0  ;;  %1421 = vmatprep.mubr.bf16.mxu1 %v1160_v4  ;;  %vm993_vm0 = vcmp.ge.f32.partialorder %v907_v2, 0.0 }
 0x24e   : > { %v1058_v10 = vmul.f32 0.01, %v909_v5  ;;  %v913_v11 = vadd.f32 %v912_v9, %v4930_v23  ;;  %1422 = vmatmul.mubr.bf16.gmra.mrb[44].mxu1 %v1159_v1  ;;  %vm994_vm1 = vcmp.ge.f32.partialorder %v909_v5, 0.0 }
 0x24f   : > { %vm995_vm2 = vcmp.ge.f32.partialorder %v911_v8, 0.0  ;;  %v1059_v12 = vmul.f32 0.01, %v911_v8  ;;  %v1121_v14 = vsel %vm993_vm0, %v907_v2, %v1057_v7 }
 0x250   : > { %vm996_vm3 = vcmp.ge.f32.partialorder %v913_v11, 0.0  ;;  %v1060_v13 = vmul.f32 0.01, %v913_v11  ;;  %v1122_v19 = vsel %vm994_vm1, %v909_v5, %v1058_v10 }
 0x251   : > { %v1123_v15 = vsel %vm995_vm2, %v911_v8, %v1059_v12 }
 0x252   : > { %v916_v18 = vpop.f32.mrb[52].mxu0  ;;  %v1124_v21 = vsel %vm996_vm3, %v913_v11, %v1060_v13  ;;  %v1161_v24 = vpack.c.bf16 %v1123_v15, %v1121_v14  ;;  %v1203_v15 = vsub.s32 1, %v4916_v17 }
 0x253   : > { %v917_v25 = vadd.f32 %v916_v18, %v4928_v22  ;;  %v918_v26 = vpop.f32.mrb[53].mxu0  ;;  %v1162_v27 = vpack.c.bf16 %v1124_v21, %v1122_v19  ;;  %v4097_v18 = vld [vmem:[#allocation10 + $0x8] sm:$0xff]  }
 0x254   : > { %v919_v28 = vadd.f32 %v918_v26, %v4930_v23  ;;  %v920_v29 = vpop.f32.mrb[54].mxu0  ;;  %v4998_v16 = vrot.slane %v4922_v20, %v1203_v15 }
 0x255   : > { %v1061_v30 = vmul.f32 0.01, %v917_v25  ;;  %v921_v31 = vadd.f32 %v920_v29, %v4928_v22  ;;  %v922_v32 = vpop.f32.mrb[55].mxu0  ;;  %1429 = vmatprep.mubr.bf16.mxu1 %v1162_v27  ;;  %vm997_vm4 = vcmp.ge.f32.partialorder %v917_v25, 0.0  ;;  %v4099_v29 = vld [vmem:[#allocation10 + $0x18] sm:$0xff]  }
 0x256   : > { %v1062_v33 = vmul.f32 0.01, %v919_v28  ;;  %v923_v34 = vadd.f32 %v922_v32, %v4930_v23  ;;  %1430 = vmatmul.mubr.bf16.gmra.mrb[48].mxu1 %v1161_v24  ;;  %vm998_vm5 = vcmp.ge.f32.partialorder %v919_v28, 0.0 }
 0x257   : > { %vm999_vm6 = vcmp.ge.f32.partialorder %v921_v31, 0.0  ;;  %v1063_v35 = vmul.f32 0.01, %v921_v31  ;;  %v1125_v37 = vsel %vm997_vm4, %v917_v25, %v1061_v30 }
 0x258   : > { %vm1000_vm7 = vcmp.ge.f32.partialorder %v923_v34, 0.0  ;;  %v1064_v36 = vmul.f32 0.01, %v923_v34  ;;  %v1126_v40 = vsel %vm998_vm5, %v919_v28, %v1062_v33  ;;  %v4098_v28 = vld [vmem:[#allocation10 + $0x10] sm:$0xff]  }
 0x259   : > { %v1127_v38 = vsel %vm999_vm6, %v921_v31, %v1063_v35 }
 0x25a   : > { %v926_v39 = vpop.f32.mrb[56].mxu0  ;;  %v1128_v41 = vsel %vm1000_vm7, %v923_v34, %v1064_v36  ;;  %v1163_v42 = vpack.c.bf16 %v1127_v38, %v1125_v37  ;;  %v4100_v34 = vld [vmem:[#allocation10 + $0x20] sm:$0xff]  }
 0x25b   : > { %v927_v43 = vadd.f32 %v926_v39, %v4928_v22  ;;  %v928_v44 = vpop.f32.mrb[57].mxu0  ;;  %v1164_v45 = vpack.c.bf16 %v1128_v41, %v1126_v40 }
 0x25c   : > { %v929_v46 = vadd.f32 %v928_v44, %v4930_v23  ;;  %v930_v47 = vpop.f32.mrb[58].mxu0 }
 0x25d   : > { %v1065_v48 = vmul.f32 0.01, %v927_v43  ;;  %v931_v49 = vadd.f32 %v930_v47, %v4928_v22  ;;  %v932_v50 = vpop.f32.mrb[59].mxu0  ;;  %1437 = vmatprep.mubr.bf16.mxu1 %v1164_v45  ;;  %vm1001_vm8 = vcmp.ge.f32.partialorder %v927_v43, 0.0 }
 0x25e   : > { %v1066_v51 = vmul.f32 0.01, %v929_v46  ;;  %v933_v52 = vadd.f32 %v932_v50, %v4930_v23  ;;  %1438 = vmatmul.mubr.bf16.gmra.mrb[52].mxu1 %v1163_v42  ;;  %vm1002_vm9 = vcmp.ge.f32.partialorder %v929_v46, 0.0 }
 0x25f   : > { %vm1003_vm10 = vcmp.ge.f32.partialorder %v931_v49, 0.0  ;;  %v1067_v53 = vmul.f32 0.01, %v931_v49  ;;  %v1129_v55 = vsel %vm1001_vm8, %v927_v43, %v1065_v48  ;;  %v4101_v43 = vld [vmem:[#allocation10 + $0x28] sm:$0xff]  }
 0x260   : > { %vm1004_vm11 = vcmp.ge.f32.partialorder %v933_v52, 0.0  ;;  %v1068_v54 = vmul.f32 0.01, %v933_v52  ;;  %v1130_v58 = vsel %vm1002_vm9, %v929_v46, %v1066_v51 }
 0x261   : > { %v1131_v56 = vsel %vm1003_vm10, %v931_v49, %v1067_v53  ;;  %v4102_v49 = vld [vmem:[#allocation10 + $0x30] sm:$0xff]  }
 0x262   : > { %v936_v57 = vpop.f32.mrb[60].mxu0  ;;  %v1132_v59 = vsel %vm1004_vm11, %v933_v52, %v1068_v54  ;;  %v1165_v60 = vpack.c.bf16 %v1131_v56, %v1129_v55 }
 0x263   : > { %v937_v61 = vadd.f32 %v936_v57, %v4928_v22  ;;  %v938_v62 = vpop.f32.mrb[61].mxu0  ;;  %v1166_v63 = vpack.c.bf16 %v1132_v59, %v1130_v58  ;;  %v4103_v58 = vld [vmem:[#allocation10 + $0x38] sm:$0xff]  }
 0x264   : > { %v939_v0 = vadd.f32 %v938_v62, %v4930_v23  ;;  %v940_v1 = vpop.f32.mrb[62].mxu0 }
 0x265   : > { %v1069_v2 = vmul.f32 0.01, %v937_v61  ;;  %v941_v3 = vadd.f32 %v940_v1, %v4928_v22  ;;  %v942_v4 = vpop.f32.mrb[63].mxu0  ;;  %1445 = vmatprep.mubr.bf16.mxu1 %v1166_v63  ;;  %vm1005_vm12 = vcmp.ge.f32.partialorder %v937_v61, 0.0  ;;  %v4096_v22 = vld [vmem:[#allocation10] sm:$0xff]  }
 0x266   : > { %v1070_v5 = vmul.f32 0.01, %v939_v0  ;;  %v943_v6 = vadd.f32 %v942_v4, %v4930_v23  ;;  %1446 = vmatmul.mubr.bf16.gmra.mrb[56].mxu1 %v1165_v60  ;;  %vm1006_vm13 = vcmp.ge.f32.partialorder %v939_v0, 0.0  ;;  %3821 = vmatprep.subr.bf16.mxu0 %v4096_v22 }
 0x267   : > { %vm1007_vm14 = vcmp.ge.f32.partialorder %v941_v3, 0.0  ;;  %v1071_v7 = vmul.f32 0.01, %v941_v3  ;;  %v1133_v9 = vsel %vm1005_vm12, %v937_v61, %v1069_v2  ;;  %3822 = vmatpush3.bf16.msra.mxu0 %v4096_v22 }
 0x268   : > { %vm1008_vm15 = vcmp.ge.f32.partialorder %v943_v6, 0.0  ;;  %v1072_v8 = vmul.f32 0.01, %v943_v6  ;;  %v1134_v11 = vsel %vm1006_vm13, %v939_v0, %v1070_v5  ;;  %3823 = vmatprep.subr.bf16.mxu0 %v4097_v18 }
 0x269   : > { %v1135_v10 = vsel %vm1007_vm14, %v941_v3, %v1071_v7 }
 0x26a   : > { %v1136_v12 = vsel %vm1008_vm15, %v943_v6, %v1072_v8  ;;  %v1167_v13 = vpack.c.bf16 %v1135_v10, %v1133_v9 }
 0x26b   : > { %v1168_v14 = vpack.c.bf16 %v1136_v12, %v1134_v11  ;;  %3824 = vmatpush3.bf16.msra.mxu0 %v4097_v18 }
 0x26c   : > { %3825 = vmatprep.subr.bf16.mxu0 %v4098_v28 }
 0x26d   : > { %1453 = vmatprep.mubr.bf16.mxu1 %v1168_v14 }
 0x26e   : > { %1454 = vmatmul.mubr.bf16.gmra.mrb[60].mxu1 %v1167_v13 }
 0x26f   : > { %3826 = vmatpush3.bf16.msra.mxu0 %v4098_v28 }
 0x270   : > { %3827 = vmatprep.subr.bf16.mxu0 %v4099_v29 }
 0x273   : > { %3828 = vmatpush3.bf16.msra.mxu0 %v4099_v29 }
 0x274   : > { %3829 = vmatprep.subr.bf16.mxu0 %v4100_v34 }
 0x277   : > { %3830 = vmatpush3.bf16.msra.mxu0 %v4100_v34 }
 0x278   : > { %3831 = vmatprep.subr.bf16.mxu0 %v4101_v43 }
 0x27b   : > { %3832 = vmatpush3.bf16.msra.mxu0 %v4101_v43 }
 0x27c   : > { %3833 = vmatprep.subr.bf16.mxu0 %v4102_v49 }
 0x27f   : > { %3834 = vmatpush3.bf16.msra.mxu0 %v4102_v49 }
 0x280   : > { %3835 = vmatprep.subr.bf16.mxu0 %v4103_v58 }
 0x283   : > { %3836 = vmatpush3.bf16.msra.mxu0 %v4103_v58 }
 0x2c9   : > { %v3629_v23 = vpop.f32.mrb[0].mxu1 }
 0x2ca   : > { %v3630_v19 = vpop.f32.mrb[1].mxu1 }
 0x2cb   : > { %v3631_v21 = vadd.f32 %v3630_v19, %v3629_v23  ;;  %v3632_v24 = vpop.f32.mrb[2].mxu1 }
 0x2cc   : > { %v3633_v25 = vpop.f32.mrb[3].mxu1 }
 0x2cd   : > { %v1336_v26 = vadd.f32 %v3631_v21, %v4998_v16  ;;  %v3634_v27 = vadd.f32 %v3633_v25, %v3632_v24 }
 0x2cf   : > { %v1494_v30 = vmul.f32 0.01, %v1336_v26  ;;  %v1339_v31 = vadd.f32 %v3634_v27, %v4998_v16  ;;  %vm1462_vm0 = vcmp.ge.f32.partialorder %v1336_v26, 0.0 }
 0x2d1   : > { %vm1463_vm1 = vcmp.ge.f32.partialorder %v1339_v31, 0.0  ;;  %v1495_v20 = vmul.f32 0.01, %v1339_v31  ;;  %v3635_v32 = vpop.f32.mrb[4].mxu1  ;;  %v1526_v37 = vsel %vm1462_vm0, %v1336_v26, %v1494_v30 }
 0x2d2   : > { %v3636_v33 = vpop.f32.mrb[5].mxu1 }
 0x2d3   : > { %v3637_v35 = vadd.f32 %v3636_v33, %v3635_v32  ;;  %v3638_v36 = vpop.f32.mrb[6].mxu1  ;;  %v1527_v38 = vsel %vm1463_vm1, %v1339_v31, %v1495_v20 }
 0x2d4   : > { %v3639_v39 = vpop.f32.mrb[7].mxu1  ;;  %v1558_v40 = vpack.c.bf16 %v1527_v38, %v1526_v37 }
 0x2d5   : > { %v1344_v41 = vadd.f32 %v3637_v35, %v4998_v16  ;;  %v3640_v42 = vadd.f32 %v3639_v39, %v3638_v36 }
 0x2d6   : > { %3789 = vmatprep.mubr.bf16.mxu1 %v1558_v40 }
 0x2d7   : > { %v1496_v44 = vmul.f32 0.01, %v1344_v41  ;;  %v1347_v45 = vadd.f32 %v3640_v42, %v4998_v16  ;;  %vm1464_vm2 = vcmp.ge.f32.partialorder %v1344_v41, 0.0 }
 0x2d9   : > { %vm1465_vm3 = vcmp.ge.f32.partialorder %v1347_v45, 0.0  ;;  %v1497_v46 = vmul.f32 0.01, %v1347_v45  ;;  %v3641_v47 = vpop.f32.mrb[8].mxu1  ;;  %v1528_v50 = vsel %vm1464_vm2, %v1344_v41, %v1496_v44 }
 0x2da   : > { %v3642_v48 = vpop.f32.mrb[9].mxu1 }
 0x2db   : > { %v1529_v51 = vsel %vm1465_vm3, %v1347_v45, %v1497_v46  ;;  %v3643_v52 = vadd.f32 %v3642_v48, %v3641_v47  ;;  %v3644_v53 = vpop.f32.mrb[10].mxu1 }
 0x2dc   : > { %v1559_v54 = vpack.c.bf16 %v1529_v51, %v1528_v50  ;;  %v3645_v55 = vpop.f32.mrb[11].mxu1 }
 0x2dd   : > { %v1352_v56 = vadd.f32 %v3643_v52, %v4998_v16  ;;  %v3646_v57 = vadd.f32 %v3645_v55, %v3644_v53 }
 0x2de   : > { %3790 = vmatmul.mubr.bf16.vlgmr.msra.gmra.mrb[64].mxu1 %v1559_v54 }
 0x2df   : > { %v1498_v59 = vmul.f32 0.01, %v1352_v56  ;;  %v1355_v60 = vadd.f32 %v3646_v57, %v4998_v16  ;;  %vm1466_vm4 = vcmp.ge.f32.partialorder %v1352_v56, 0.0 }
 0x2e1   : > { %vm1467_vm5 = vcmp.ge.f32.partialorder %v1355_v60, 0.0  ;;  %v1499_v61 = vmul.f32 0.01, %v1355_v60  ;;  %v3647_v62 = vpop.f32.mrb[12].mxu1  ;;  %v1530_v2 = vsel %vm1466_vm4, %v1352_v56, %v1498_v59 }
 0x2e2   : > { %v3648_v63 = vpop.f32.mrb[13].mxu1 }
 0x2e3   : > { %v3649_v0 = vadd.f32 %v3648_v63, %v3647_v62  ;;  %v3650_v1 = vpop.f32.mrb[14].mxu1  ;;  %v1531_v3 = vsel %vm1467_vm5, %v1355_v60, %v1499_v61 }
 0x2e4   : > { %v3651_v4 = vpop.f32.mrb[15].mxu1  ;;  %v1560_v5 = vpack.c.bf16 %v1531_v3, %v1530_v2 }
 0x2e5   : > { %v1360_v6 = vadd.f32 %v3649_v0, %v4998_v16  ;;  %v3652_v7 = vadd.f32 %v3651_v4, %v3650_v1 }
 0x2e6   : > { %3793 = vmatprep.mubr.bf16.mxu1 %v1560_v5 }
 0x2e7   : > { %v1500_v8 = vmul.f32 0.01, %v1360_v6  ;;  %v1363_v9 = vadd.f32 %v3652_v7, %v4998_v16  ;;  %vm1468_vm6 = vcmp.ge.f32.partialorder %v1360_v6, 0.0 }
 0x2e9   : > { %vm1469_vm7 = vcmp.ge.f32.partialorder %v1363_v9, 0.0  ;;  %v1501_v10 = vmul.f32 0.01, %v1363_v9  ;;  %v3653_v11 = vpop.f32.mrb[16].mxu1  ;;  %v1532_v22 = vsel %vm1468_vm6, %v1360_v6, %v1500_v8 }
 0x2ea   : > { %v3654_v12 = vpop.f32.mrb[17].mxu1 }
 0x2eb   : > { %v3655_v13 = vadd.f32 %v3654_v12, %v3653_v11  ;;  %v3656_v14 = vpop.f32.mrb[18].mxu1  ;;  %v1533_v15 = vsel %vm1469_vm7, %v1363_v9, %v1501_v10 }
 0x2ec   : > { %v3657_v23 = vpop.f32.mrb[19].mxu1  ;;  %v1561_v18 = vpack.c.bf16 %v1533_v15, %v1532_v22 }
 0x2ed   : > { %v1368_v19 = vadd.f32 %v3655_v13, %v4998_v16  ;;  %v3658_v21 = vadd.f32 %v3657_v23, %v3656_v14 }
 0x2ee   : > { %3794 = vmatmul.mubr.bf16.gmra.mrb[68].mxu1 %v1561_v18 }
 0x2ef   : > { %v1502_v24 = vmul.f32 0.01, %v1368_v19  ;;  %v1371_v25 = vadd.f32 %v3658_v21, %v4998_v16  ;;  %vm1470_vm8 = vcmp.ge.f32.partialorder %v1368_v19, 0.0 }
 0x2f1   : > { %vm1471_vm9 = vcmp.ge.f32.partialorder %v1371_v25, 0.0  ;;  %v1503_v26 = vmul.f32 0.01, %v1371_v25  ;;  %v3659_v27 = vpop.f32.mrb[20].mxu1  ;;  %v1534_v31 = vsel %vm1470_vm8, %v1368_v19, %v1502_v24 }
 0x2f2   : > { %v3660_v28 = vpop.f32.mrb[21].mxu1 }
 0x2f3   : > { %v3661_v29 = vadd.f32 %v3660_v28, %v3659_v27  ;;  %v3662_v30 = vpop.f32.mrb[22].mxu1  ;;  %v1535_v20 = vsel %vm1471_vm9, %v1371_v25, %v1503_v26 }
 0x2f4   : > { %v3663_v32 = vpop.f32.mrb[23].mxu1  ;;  %v1562_v33 = vpack.c.bf16 %v1535_v20, %v1534_v31 }
 0x2f5   : > { %v1376_v34 = vadd.f32 %v3661_v29, %v4998_v16  ;;  %v3664_v35 = vadd.f32 %v3663_v32, %v3662_v30 }
 0x2f6   : > { %3797 = vmatprep.mubr.bf16.mxu1 %v1562_v33 }
 0x2f7   : > { %v1504_v36 = vmul.f32 0.01, %v1376_v34  ;;  %v1379_v37 = vadd.f32 %v3664_v35, %v4998_v16  ;;  %vm1472_vm10 = vcmp.ge.f32.partialorder %v1376_v34, 0.0 }
 0x2f9   : > { %vm1473_vm11 = vcmp.ge.f32.partialorder %v1379_v37, 0.0  ;;  %v1505_v38 = vmul.f32 0.01, %v1379_v37  ;;  %v3665_v39 = vpop.f32.mrb[24].mxu1  ;;  %v1536_v43 = vsel %vm1472_vm10, %v1376_v34, %v1504_v36 }
 0x2fa   : > { %v3666_v40 = vpop.f32.mrb[25].mxu1 }
 0x2fb   : > { %v3667_v41 = vadd.f32 %v3666_v40, %v3665_v39  ;;  %v3668_v42 = vpop.f32.mrb[26].mxu1  ;;  %v1537_v44 = vsel %vm1473_vm11, %v1379_v37, %v1505_v38 }
 0x2fc   : > { %v3669_v45 = vpop.f32.mrb[27].mxu1  ;;  %v1563_v46 = vpack.c.bf16 %v1537_v44, %v1536_v43 }
 0x2fd   : > { %v1384_v47 = vadd.f32 %v3667_v41, %v4998_v16  ;;  %v3670_v48 = vadd.f32 %v3669_v45, %v3668_v42 }
 0x2fe   : > { %3798 = vmatmul.mubr.bf16.gmra.mrb[72].mxu1 %v1563_v46 }
 0x2ff   : > { %v1506_v49 = vmul.f32 0.01, %v1384_v47  ;;  %v1387_v50 = vadd.f32 %v3670_v48, %v4998_v16  ;;  %vm1474_vm12 = vcmp.ge.f32.partialorder %v1384_v47, 0.0 }
 0x301   : > { %vm1475_vm13 = vcmp.ge.f32.partialorder %v1387_v50, 0.0  ;;  %v1507_v51 = vmul.f32 0.01, %v1387_v50  ;;  %v3671_v52 = vpop.f32.mrb[28].mxu1  ;;  %v1538_v56 = vsel %vm1474_vm12, %v1384_v47, %v1506_v49 }
 0x302   : > { %v3672_v53 = vpop.f32.mrb[29].mxu1 }
 0x303   : > { %v3673_v54 = vadd.f32 %v3672_v53, %v3671_v52  ;;  %v3674_v55 = vpop.f32.mrb[30].mxu1  ;;  %v1539_v57 = vsel %vm1475_vm13, %v1387_v50, %v1507_v51 }
 0x304   : > { %v3675_v58 = vpop.f32.mrb[31].mxu1  ;;  %v1564_v59 = vpack.c.bf16 %v1539_v57, %v1538_v56 }
 0x305   : > { %v1392_v60 = vadd.f32 %v3673_v54, %v4998_v16  ;;  %v3676_v61 = vadd.f32 %v3675_v58, %v3674_v55 }
 0x306   : > { %3801 = vmatprep.mubr.bf16.mxu1 %v1564_v59 }
 0x307   : > { %v1508_v62 = vmul.f32 0.01, %v1392_v60  ;;  %v1395_v63 = vadd.f32 %v3676_v61, %v4998_v16  ;;  %vm1476_vm14 = vcmp.ge.f32.partialorder %v1392_v60, 0.0 }
 0x309   : > { %vm1477_vm15 = vcmp.ge.f32.partialorder %v1395_v63, 0.0  ;;  %v1509_v0 = vmul.f32 0.01, %v1395_v63  ;;  %v3677_v1 = vpop.f32.mrb[32].mxu1  ;;  %v1540_v5 = vsel %vm1476_vm14, %v1392_v60, %v1508_v62 }
 0x30a   : > { %v3678_v2 = vpop.f32.mrb[33].mxu1 }
 0x30b   : > { %v3679_v3 = vadd.f32 %v3678_v2, %v3677_v1  ;;  %v3680_v4 = vpop.f32.mrb[34].mxu1  ;;  %v1541_v6 = vsel %vm1477_vm15, %v1395_v63, %v1509_v0 }
 0x30c   : > { %v3681_v7 = vpop.f32.mrb[35].mxu1  ;;  %v1565_v8 = vpack.c.bf16 %v1541_v6, %v1540_v5 }
 0x30d   : > { %v1400_v9 = vadd.f32 %v3679_v3, %v4998_v16  ;;  %v3682_v10 = vadd.f32 %v3681_v7, %v3680_v4 }
 0x30e   : > { %3802 = vmatmul.mubr.bf16.gmra.mrb[76].mxu1 %v1565_v8 }
 0x30f   : > { %v1510_v11 = vmul.f32 0.01, %v1400_v9  ;;  %v1403_v12 = vadd.f32 %v3682_v10, %v4998_v16  ;;  %vm1478_vm0 = vcmp.ge.f32.partialorder %v1400_v9, 0.0 }
 0x311   : > { %vm1479_vm1 = vcmp.ge.f32.partialorder %v1403_v12, 0.0  ;;  %v1511_v13 = vmul.f32 0.01, %v1403_v12  ;;  %v3683_v14 = vpop.f32.mrb[36].mxu1  ;;  %v1542_v18 = vsel %vm1478_vm0, %v1400_v9, %v1510_v11 }
 0x312   : > { %v3684_v22 = vpop.f32.mrb[37].mxu1 }
 0x313   : > { %v3685_v15 = vadd.f32 %v3684_v22, %v3683_v14  ;;  %v3686_v23 = vpop.f32.mrb[38].mxu1  ;;  %v1543_v19 = vsel %vm1479_vm1, %v1403_v12, %v1511_v13 }
 0x314   : > { %v3687_v21 = vpop.f32.mrb[39].mxu1  ;;  %v1566_v24 = vpack.c.bf16 %v1543_v19, %v1542_v18 }
 0x315   : > { %v1408_v25 = vadd.f32 %v3685_v15, %v4998_v16  ;;  %v3688_v26 = vadd.f32 %v3687_v21, %v3686_v23 }
 0x316   : > { %3805 = vmatprep.mubr.bf16.mxu1 %v1566_v24 }
 0x317   : > { %v1512_v27 = vmul.f32 0.01, %v1408_v25  ;;  %v1411_v28 = vadd.f32 %v3688_v26, %v4998_v16  ;;  %vm1480_vm2 = vcmp.ge.f32.partialorder %v1408_v25, 0.0 }
 0x319   : > { %vm1481_vm3 = vcmp.ge.f32.partialorder %v1411_v28, 0.0  ;;  %v1513_v29 = vmul.f32 0.01, %v1411_v28  ;;  %v3689_v30 = vpop.f32.mrb[40].mxu1  ;;  %v1544_v33 = vsel %vm1480_vm2, %v1408_v25, %v1512_v27 }
 0x31a   : > { %v3690_v31 = vpop.f32.mrb[41].mxu1 }
 0x31b   : > { %v3691_v20 = vadd.f32 %v3690_v31, %v3689_v30  ;;  %v3692_v32 = vpop.f32.mrb[42].mxu1  ;;  %v1545_v34 = vsel %vm1481_vm3, %v1411_v28, %v1513_v29 }
 0x31c   : > { %v3693_v35 = vpop.f32.mrb[43].mxu1  ;;  %v1567_v36 = vpack.c.bf16 %v1545_v34, %v1544_v33 }
 0x31d   : > { %v1416_v37 = vadd.f32 %v3691_v20, %v4998_v16  ;;  %v3694_v38 = vadd.f32 %v3693_v35, %v3692_v32 }
 0x31e   : > { %3806 = vmatmul.mubr.bf16.gmra.mrb[80].mxu1 %v1567_v36 }
 0x31f   : > { %v1514_v39 = vmul.f32 0.01, %v1416_v37  ;;  %v1419_v40 = vadd.f32 %v3694_v38, %v4998_v16  ;;  %vm1482_vm4 = vcmp.ge.f32.partialorder %v1416_v37, 0.0 }
 0x321   : > { %vm1483_vm5 = vcmp.ge.f32.partialorder %v1419_v40, 0.0  ;;  %v1515_v41 = vmul.f32 0.01, %v1419_v40  ;;  %v3695_v42 = vpop.f32.mrb[44].mxu1  ;;  %v1546_v46 = vsel %vm1482_vm4, %v1416_v37, %v1514_v39 }
 0x322   : > { %v3696_v43 = vpop.f32.mrb[45].mxu1 }
 0x323   : > { %v3697_v44 = vadd.f32 %v3696_v43, %v3695_v42  ;;  %v3698_v45 = vpop.f32.mrb[46].mxu1  ;;  %v1547_v47 = vsel %vm1483_vm5, %v1419_v40, %v1515_v41 }
 0x324   : > { %v3699_v48 = vpop.f32.mrb[47].mxu1  ;;  %v1568_v49 = vpack.c.bf16 %v1547_v47, %v1546_v46 }
 0x325   : > { %v1424_v50 = vadd.f32 %v3697_v44, %v4998_v16  ;;  %v3700_v51 = vadd.f32 %v3699_v48, %v3698_v45  ;;  %v1592_v48 = vsub.s32 2, %v4916_v17 }
 0x326   : > { %3809 = vmatprep.mubr.bf16.mxu1 %v1568_v49  ;;  %v4104_v49 = vld [vmem:[#allocation11] ss:$8 sps:$4 sm:$0xff]  }
 0x327   : > { %v1516_v52 = vmul.f32 0.01, %v1424_v50  ;;  %v1427_v53 = vadd.f32 %v3700_v51, %v4998_v16  ;;  %vm1484_vm6 = vcmp.ge.f32.partialorder %v1424_v50, 0.0  ;;  %v5037_v51 = vld [vmem:[%s5471_s7] sm:$0xff] }
 0x329   : > { %vm1485_vm7 = vcmp.ge.f32.partialorder %v1427_v53, 0.0  ;;  %v1517_v54 = vmul.f32 0.01, %v1427_v53  ;;  %v3701_v55 = vpop.f32.mrb[48].mxu1  ;;  %v1548_v59 = vsel %vm1484_vm6, %v1424_v50, %v1516_v52  ;;  %v4106_v50 = vld [vmem:[#allocation11 + $0x4] ss:$8 sps:$4 sm:$0xff]   ;;  %v5040_v52 = vrot.slane %v5037_v51, %v1592_v48 }
 0x32a   : > { %v3702_v56 = vpop.f32.mrb[49].mxu1  ;;  %2392 = vmatprep.subr.bf16.mxu1 %v4106_v50 }
 0x32b   : > { %v3703_v57 = vadd.f32 %v3702_v56, %v3701_v55  ;;  %v3704_v58 = vpop.f32.mrb[50].mxu1  ;;  %v1549_v60 = vsel %vm1485_vm7, %v1427_v53, %v1517_v54  ;;  %2393 = vmatpush1.bf16.msra.mxu1 %v4104_v49  ;;  %v4107_v53 = vld [vmem:[#allocation11 + $0x10] ss:$8 sps:$4 sm:$0xff]   ;;  %v4112_v55 = vld [vmem:[#allocation11 + $0x24] ss:$8 sps:$4 sm:$0xff]  }
 0x32c   : > { %v3705_v61 = vpop.f32.mrb[51].mxu1  ;;  %v1569_v62 = vpack.c.bf16 %v1549_v60, %v1548_v59 }
 0x32d   : > { %v1432_v63 = vadd.f32 %v3703_v57, %v4998_v16  ;;  %v3706_v0 = vadd.f32 %v3705_v61, %v3704_v58 }
 0x32e   : > { %3810 = vmatmul.mubr.bf16.gmra.mrb[84].mxu1 %v1569_v62 }
 0x32f   : > { %v1518_v1 = vmul.f32 0.01, %v1432_v63  ;;  %v1435_v2 = vadd.f32 %v3706_v0, %v4998_v16  ;;  %vm1486_vm8 = vcmp.ge.f32.partialorder %v1432_v63, 0.0 }
 0x331   : > { %vm1487_vm9 = vcmp.ge.f32.partialorder %v1435_v2, 0.0  ;;  %v1519_v3 = vmul.f32 0.01, %v1435_v2  ;;  %v3707_v4 = vpop.f32.mrb[52].mxu1  ;;  %v1550_v8 = vsel %vm1486_vm8, %v1432_v63, %v1518_v1  ;;  %v4110_v63 = vld [vmem:[#allocation11 + $0x20] ss:$8 sps:$4 sm:$0xff]  }
 0x332   : > { %v3708_v5 = vpop.f32.mrb[53].mxu1 }
 0x333   : > { %v3709_v6 = vadd.f32 %v3708_v5, %v3707_v4  ;;  %v3710_v7 = vpop.f32.mrb[54].mxu1  ;;  %v1551_v9 = vsel %vm1487_vm9, %v1435_v2, %v1519_v3  ;;  %v4115_v2 = vld [vmem:[#allocation11 + $0x34] ss:$8 sps:$4 sm:$0xff]  }
 0x334   : > { %v3711_v10 = vpop.f32.mrb[55].mxu1  ;;  %v1570_v11 = vpack.c.bf16 %v1551_v9, %v1550_v8 }
 0x335   : > { %v1440_v12 = vadd.f32 %v3709_v6, %v4998_v16  ;;  %v3712_v13 = vadd.f32 %v3711_v10, %v3710_v7  ;;  %v4113_v7 = vld [vmem:[#allocation11 + $0x30] ss:$8 sps:$4 sm:$0xff]  }
 0x336   : > { %3813 = vmatprep.mubr.bf16.mxu1 %v1570_v11  ;;  %v4118_v11 = vld [vmem:[#allocation11 + $0x44] ss:$8 sps:$4 sm:$0xff]  }
 0x337   : > { %v1520_v14 = vmul.f32 0.01, %v1440_v12  ;;  %v1443_v22 = vadd.f32 %v3712_v13, %v4998_v16  ;;  %vm1488_vm10 = vcmp.ge.f32.partialorder %v1440_v12, 0.0  ;;  %v4116_v13 = vld [vmem:[#allocation11 + $0x40] ss:$8 sps:$4 sm:$0xff]  }
 0x339   : > { %vm1489_vm11 = vcmp.ge.f32.partialorder %v1443_v22, 0.0  ;;  %v1521_v15 = vmul.f32 0.01, %v1443_v22  ;;  %v3713_v23 = vpop.f32.mrb[56].mxu1  ;;  %v1552_v24 = vsel %vm1488_vm10, %v1440_v12, %v1520_v14  ;;  %v4121_v14 = vld [vmem:[#allocation11 + $0x54] ss:$8 sps:$4 sm:$0xff]  }
 0x33a   : > { %v3714_v18 = vpop.f32.mrb[57].mxu1 }
 0x33b   : > { %v3715_v19 = vadd.f32 %v3714_v18, %v3713_v23  ;;  %v3716_v21 = vpop.f32.mrb[58].mxu1  ;;  %v1553_v25 = vsel %vm1489_vm11, %v1443_v22, %v1521_v15  ;;  %v4119_v22 = vld [vmem:[#allocation11 + $0x50] ss:$8 sps:$4 sm:$0xff]   ;;  %v4124_v23 = vld [vmem:[#allocation11 + $0x64] ss:$8 sps:$4 sm:$0xff]  }
 0x33c   : > { %v3717_v26 = vpop.f32.mrb[59].mxu1  ;;  %v1571_v27 = vpack.c.bf16 %v1553_v25, %v1552_v24 }
 0x33d   : > { %v1448_v28 = vadd.f32 %v3715_v19, %v4998_v16  ;;  %v3718_v29 = vadd.f32 %v3717_v26, %v3716_v21 }
 0x33e   : > { %3814 = vmatmul.mubr.bf16.gmra.mrb[88].mxu1 %v1571_v27 }
 0x33f   : > { %v1522_v30 = vmul.f32 0.01, %v1448_v28  ;;  %v1451_v31 = vadd.f32 %v3718_v29, %v4998_v16  ;;  %vm1490_vm12 = vcmp.ge.f32.partialorder %v1448_v28, 0.0 }
 0x341   : > { %vm1491_vm13 = vcmp.ge.f32.partialorder %v1451_v31, 0.0  ;;  %v1523_v20 = vmul.f32 0.01, %v1451_v31  ;;  %v3719_v32 = vpop.f32.mrb[60].mxu1  ;;  %v1554_v36 = vsel %vm1490_vm12, %v1448_v28, %v1522_v30  ;;  %v4122_v28 = vld [vmem:[#allocation11 + $0x60] ss:$8 sps:$4 sm:$0xff]  }
 0x342   : > { %v3720_v33 = vpop.f32.mrb[61].mxu1 }
 0x343   : > { %v3721_v34 = vadd.f32 %v3720_v33, %v3719_v32  ;;  %v3722_v35 = vpop.f32.mrb[62].mxu1  ;;  %v1555_v37 = vsel %vm1491_vm13, %v1451_v31, %v1523_v20 }
 0x344   : > { %v3723_v38 = vpop.f32.mrb[63].mxu1  ;;  %v1572_v39 = vpack.c.bf16 %v1555_v37, %v1554_v36 }
 0x345   : > { %v1456_v40 = vadd.f32 %v3721_v34, %v4998_v16  ;;  %v3724_v41 = vadd.f32 %v3723_v38, %v3722_v35 }
 0x346   : > { %3817 = vmatprep.mubr.bf16.mxu1 %v1572_v39 }
 0x347   : > { %v1524_v42 = vmul.f32 0.01, %v1456_v40  ;;  %v1459_v43 = vadd.f32 %v3724_v41, %v4998_v16  ;;  %vm1492_vm14 = vcmp.ge.f32.partialorder %v1456_v40, 0.0  ;;  %v4109_v16 = vld [vmem:[#allocation11 + $0x14] ss:$8 sps:$4 sm:$0xff]  }
 0x348   : > { %2394 = vmatprep.subr.bf16.mxu1 %v4109_v16 }
 0x349   : > { %vm1493_vm15 = vcmp.ge.f32.partialorder %v1459_v43, 0.0  ;;  %v1525_v44 = vmul.f32 0.01, %v1459_v43  ;;  %v1556_v45 = vsel %vm1492_vm14, %v1456_v40, %v1524_v42  ;;  %2395 = vmatpush1.bf16.msra.mxu1 %v4107_v53 }
 0x34a   : > { %2396 = vmatprep.subr.bf16.mxu1 %v4112_v55 }
 0x34b   : > { %v1557_v46 = vsel %vm1493_vm15, %v1459_v43, %v1525_v44 }
 0x34c   : > { %v1573_v47 = vpack.c.bf16 %v1557_v46, %v1556_v45 }
 0x34d   : > { %2397 = vmatpush1.bf16.msra.mxu1 %v4110_v63 }
 0x34e   : > { %3818 = vmatmul.mubr.bf16.gmra.mrb[92].mxu1 %v1573_v47  ;;  %2398 = vmatprep.subr.bf16.mxu1 %v4115_v2 }
 0x351   : > { %2399 = vmatpush1.bf16.msra.mxu1 %v4113_v7 }
 0x352   : > { %2400 = vmatprep.subr.bf16.mxu1 %v4118_v11 }
 0x355   : > { %2401 = vmatpush1.bf16.msra.mxu1 %v4116_v13 }
 0x356   : > { %2402 = vmatprep.subr.bf16.mxu1 %v4121_v14 }
 0x359   : > { %2403 = vmatpush1.bf16.msra.mxu1 %v4119_v22 }
 0x35a   : > { %2404 = vmatprep.subr.bf16.mxu1 %v4124_v23 }
 0x35d   : > { %2405 = vmatpush1.bf16.msra.mxu1 %v4122_v28 }
 0x3b1   : > { %v3791_v54 = vpop.f32.mrb[64].mxu1 }
 0x3b2   : > { %v1685_v56 = vadd.f32 %v3791_v54, %v5040_v52  ;;  %v1676_v57 = vpop.f32.mrb[65].mxu1 }
 0x3b3   : > { %v1677_v58 = vadd.f32 %v1676_v57, %v5040_v52  ;;  %v3792_v59 = vpop.f32.mrb[66].mxu1 }
 0x3b4   : > { %1805 = vst [vmem:[%s5044_s21 + $0x10] sm:$0xff] %v1685_v56  ;;  %v1869_v60 = vmul.f32 0.01, %v1685_v56  ;;  %v1688_v61 = vadd.f32 %v3792_v59, %v5040_v52  ;;  %v1679_v62 = vpop.f32.mrb[67].mxu1  ;;  %vm1837_vm0 = vcmp.ge.f32.partialorder %v1685_v56, 0.0 }
 0x3b5   : > { %1803 = vst [vmem:[%s5044_s21] sm:$0xff] %v1677_v58  ;;  %v1867_v0 = vmul.f32 0.01, %v1677_v58  ;;  %v1680_v1 = vadd.f32 %v1679_v62, %v5040_v52  ;;  %vm1835_vm2 = vcmp.ge.f32.partialorder %v1677_v58, 0.0 }
 0x3b6   : > { %1806 = vst [vmem:[%s5044_s21 + $0x18] sm:$0xff] %v1688_v61  ;;  %vm1838_vm1 = vcmp.ge.f32.partialorder %v1688_v61, 0.0  ;;  %v1870_v3 = vmul.f32 0.01, %v1688_v61  ;;  %v1901_v5 = vsel %vm1837_vm0, %v1685_v56, %v1869_v60 }
 0x3b7   : > { %1804 = vst [vmem:[%s5044_s21 + $0x8] sm:$0xff] %v1680_v1  ;;  %v1868_v4 = vmul.f32 0.01, %v1680_v1  ;;  %vm1836_vm3 = vcmp.ge.f32.partialorder %v1680_v1, 0.0  ;;  %v1899_v9 = vsel %vm1835_vm2, %v1677_v58, %v1867_v0 }
 0x3b8   : > { %v1902_v6 = vsel %vm1838_vm1, %v1688_v61, %v1870_v3 }
 0x3b9   : > { %v1932_v8 = vpack.c.bf16 %v1902_v6, %v1901_v5  ;;  %v1900_v10 = vsel %vm1836_vm3, %v1680_v1, %v1868_v4 }
 0x3ba   : > { %v1931_v12 = vpack.c.bf16 %v1900_v10, %v1899_v9 }
 0x3bc   : > { %3837 = vmatprep.mubr.bf16.mxu0 %v1931_v12 }
 0x3bd   : > { %3838 = vmatmul.mubr.bf16.vlgmr.msra.gmra.mrb[64].mxu0 %v1932_v8 }
 0x3c1   : > { %v3795_v15 = vpop.f32.mrb[68].mxu1 }
 0x3c2   : > { %v1701_v18 = vadd.f32 %v3795_v15, %v5040_v52  ;;  %v1692_v19 = vpop.f32.mrb[69].mxu1 }
 0x3c3   : > { %v1693_v21 = vadd.f32 %v1692_v19, %v5040_v52  ;;  %v3796_v24 = vpop.f32.mrb[70].mxu1 }
 0x3c4   : > { %1809 = vst [vmem:[%s5044_s21 + $0x30] sm:$0xff] %v1701_v18  ;;  %v1873_v25 = vmul.f32 0.01, %v1701_v18  ;;  %v1704_v26 = vadd.f32 %v3796_v24, %v5040_v52  ;;  %v1695_v27 = vpop.f32.mrb[71].mxu1  ;;  %vm1841_vm4 = vcmp.ge.f32.partialorder %v1701_v18, 0.0 }
 0x3c5   : > { %1807 = vst [vmem:[%s5044_s21 + $0x20] sm:$0xff] %v1693_v21  ;;  %v1871_v29 = vmul.f32 0.01, %v1693_v21  ;;  %v1696_v30 = vadd.f32 %v1695_v27, %v5040_v52  ;;  %vm1839_vm5 = vcmp.ge.f32.partialorder %v1693_v21, 0.0 }
 0x3c6   : > { %1810 = vst [vmem:[%s5044_s21 + $0x38] sm:$0xff] %v1704_v26  ;;  %v1874_v31 = vmul.f32 0.01, %v1704_v26  ;;  %vm1842_vm6 = vcmp.ge.f32.partialorder %v1704_v26, 0.0  ;;  %v1905_v32 = vsel %vm1841_vm4, %v1701_v18, %v1873_v25 }
 0x3c7   : > { %1808 = vst [vmem:[%s5044_s21 + $0x28] sm:$0xff] %v1696_v30  ;;  %v1872_v20 = vmul.f32 0.01, %v1696_v30  ;;  %vm1840_vm7 = vcmp.ge.f32.partialorder %v1696_v30, 0.0  ;;  %v1903_v34 = vsel %vm1839_vm5, %v1693_v21, %v1871_v29 }
 0x3c8   : > { %v1906_v33 = vsel %vm1842_vm6, %v1704_v26, %v1874_v31 }
 0x3c9   : > { %v1904_v35 = vsel %vm1840_vm7, %v1696_v30, %v1872_v20  ;;  %v1934_v36 = vpack.c.bf16 %v1906_v33, %v1905_v32 }
 0x3ca   : > { %v1933_v37 = vpack.c.bf16 %v1904_v35, %v1903_v34 }
 0x3cc   : > { %3841 = vmatprep.mubr.bf16.mxu0 %v1933_v37 }
 0x3cd   : > { %3842 = vmatmul.mubr.bf16.gmra.mrb[68].mxu0 %v1934_v36 }
 0x3d1   : > { %v3799_v38 = vpop.f32.mrb[72].mxu1 }
 0x3d2   : > { %v1717_v39 = vadd.f32 %v3799_v38, %v5040_v52  ;;  %v1708_v40 = vpop.f32.mrb[73].mxu1 }
 0x3d3   : > { %v1709_v41 = vadd.f32 %v1708_v40, %v5040_v52  ;;  %v3800_v42 = vpop.f32.mrb[74].mxu1 }
 0x3d4   : > { %1813 = vst [vmem:[%s5044_s21 + $0x50] sm:$0xff] %v1717_v39  ;;  %v1877_v43 = vmul.f32 0.01, %v1717_v39  ;;  %v1720_v44 = vadd.f32 %v3800_v42, %v5040_v52  ;;  %v1711_v45 = vpop.f32.mrb[75].mxu1  ;;  %vm1845_vm8 = vcmp.ge.f32.partialorder %v1717_v39, 0.0 }
 0x3d5   : > { %1811 = vst [vmem:[%s5044_s21 + $0x40] sm:$0xff] %v1709_v41  ;;  %v1875_v46 = vmul.f32 0.01, %v1709_v41  ;;  %v1712_v47 = vadd.f32 %v1711_v45, %v5040_v52  ;;  %vm1843_vm9 = vcmp.ge.f32.partialorder %v1709_v41, 0.0 }
 0x3d6   : > { %1814 = vst [vmem:[%s5044_s21 + $0x58] sm:$0xff] %v1720_v44  ;;  %v1878_v48 = vmul.f32 0.01, %v1720_v44  ;;  %vm1846_vm10 = vcmp.ge.f32.partialorder %v1720_v44, 0.0  ;;  %v1909_v50 = vsel %vm1845_vm8, %v1717_v39, %v1877_v43 }
 0x3d7   : > { %1812 = vst [vmem:[%s5044_s21 + $0x48] sm:$0xff] %v1712_v47  ;;  %v1876_v49 = vmul.f32 0.01, %v1712_v47  ;;  %vm1844_vm11 = vcmp.ge.f32.partialorder %v1712_v47, 0.0  ;;  %v1907_v53 = vsel %vm1843_vm9, %v1709_v41, %v1875_v46 }
 0x3d8   : > { %v1910_v16 = vsel %vm1846_vm10, %v1720_v44, %v1878_v48 }
 0x3d9   : > { %v1908_v54 = vsel %vm1844_vm11, %v1712_v47, %v1876_v49  ;;  %v1936_v55 = vpack.c.bf16 %v1910_v16, %v1909_v50 }
 0x3da   : > { %v1935_v56 = vpack.c.bf16 %v1908_v54, %v1907_v53 }
 0x3dc   : > { %3845 = vmatprep.mubr.bf16.mxu0 %v1935_v56 }
 0x3dd   : > { %3846 = vmatmul.mubr.bf16.gmra.mrb[72].mxu0 %v1936_v55 }
 0x3e1   : > { %v3803_v57 = vpop.f32.mrb[76].mxu1 }
 0x3e2   : > { %v1733_v58 = vadd.f32 %v3803_v57, %v5040_v52  ;;  %v1724_v59 = vpop.f32.mrb[77].mxu1 }
 0x3e3   : > { %v1725_v60 = vadd.f32 %v1724_v59, %v5040_v52  ;;  %v3804_v61 = vpop.f32.mrb[78].mxu1 }
 0x3e4   : > { %1817 = vst [vmem:[%s5044_s21 + $0x70] sm:$0xff] %v1733_v58  ;;  %v1881_v62 = vmul.f32 0.01, %v1733_v58  ;;  %v1736_v63 = vadd.f32 %v3804_v61, %v5040_v52  ;;  %v1727_v0 = vpop.f32.mrb[79].mxu1  ;;  %vm1849_vm12 = vcmp.ge.f32.partialorder %v1733_v58, 0.0 }
 0x3e5   : > { %1815 = vst [vmem:[%s5044_s21 + $0x60] sm:$0xff] %v1725_v60  ;;  %v1879_v1 = vmul.f32 0.01, %v1725_v60  ;;  %v1728_v2 = vadd.f32 %v1727_v0, %v5040_v52  ;;  %vm1847_vm13 = vcmp.ge.f32.partialorder %v1725_v60, 0.0 }
 0x3e6   : > { %1818 = vst [vmem:[%s5044_s21 + $0x78] sm:$0xff] %v1736_v63  ;;  %v1882_v3 = vmul.f32 0.01, %v1736_v63  ;;  %vm1850_vm14 = vcmp.ge.f32.partialorder %v1736_v63, 0.0  ;;  %v1913_v5 = vsel %vm1849_vm12, %v1733_v58, %v1881_v62  ;;  %v4125_v62 = vld [vmem:[#allocation11 + $0x70] ss:$8 sps:$4 sm:$0xff]  }
 0x3e7   : > { %1816 = vst [vmem:[%s5044_s21 + $0x68] sm:$0xff] %v1728_v2  ;;  %v1880_v4 = vmul.f32 0.01, %v1728_v2  ;;  %vm1848_vm15 = vcmp.ge.f32.partialorder %v1728_v2, 0.0  ;;  %v1911_v7 = vsel %vm1847_vm13, %v1725_v60, %v1879_v1  ;;  %v4127_v60 = vld [vmem:[#allocation11 + $0x74] ss:$8 sps:$4 sm:$0xff]  }
 0x3e8   : > { %v1914_v6 = vsel %vm1850_vm14, %v1736_v63, %v1882_v3  ;;  %2406 = vmatprep.subr.bf16.mxu1 %v4127_v60 }
 0x3e9   : > { %v1912_v8 = vsel %vm1848_vm15, %v1728_v2, %v1880_v4  ;;  %v1938_v9 = vpack.c.bf16 %v1914_v6, %v1913_v5  ;;  %2407 = vmatpush1.bf16.msra.mxu1 %v4125_v62  ;;  %v4502_v6 = vmov 0  }
 0x3ea   : > { %v1937_v10 = vpack.c.bf16 %v1912_v8, %v1911_v7  ;;  %2424 = vmatprep.mubr.bf16.mxu1 %v4502_v6 }
 0x3ec   : > { %3849 = vmatprep.mubr.bf16.mxu0 %v1937_v10 }
 0x3ed   : > { %3850 = vmatmul.mubr.bf16.gmra.mrb[76].mxu0 %v1938_v9 }
 0x3f1   : > { %v3807_v11 = vpop.f32.mrb[80].mxu1 }
 0x3f2   : > { %v1749_v12 = vadd.f32 %v3807_v11, %v5040_v52  ;;  %v1740_v13 = vpop.f32.mrb[81].mxu1 }
 0x3f3   : > { %v1741_v14 = vadd.f32 %v1740_v13, %v5040_v52  ;;  %v3808_v22 = vpop.f32.mrb[82].mxu1 }
 0x3f4   : > { %1821 = vst [vmem:[%s5044_s21 + $0x90] sm:$0xff] %v1749_v12  ;;  %v1885_v15 = vmul.f32 0.01, %v1749_v12  ;;  %v1752_v23 = vadd.f32 %v3808_v22, %v5040_v52  ;;  %v1743_v18 = vpop.f32.mrb[83].mxu1  ;;  %vm1853_vm0 = vcmp.ge.f32.partialorder %v1749_v12, 0.0 }
 0x3f5   : > { %1819 = vst [vmem:[%s5044_s21 + $0x80] sm:$0xff] %v1741_v14  ;;  %v1883_v19 = vmul.f32 0.01, %v1741_v14  ;;  %v1744_v21 = vadd.f32 %v1743_v18, %v5040_v52  ;;  %vm1851_vm1 = vcmp.ge.f32.partialorder %v1741_v14, 0.0 }
 0x3f6   : > { %1822 = vst [vmem:[%s5044_s21 + $0x98] sm:$0xff] %v1752_v23  ;;  %v1886_v24 = vmul.f32 0.01, %v1752_v23  ;;  %vm1854_vm2 = vcmp.ge.f32.partialorder %v1752_v23, 0.0  ;;  %v1917_v26 = vsel %vm1853_vm0, %v1749_v12, %v1885_v15 }
 0x3f7   : > { %1820 = vst [vmem:[%s5044_s21 + $0x88] sm:$0xff] %v1744_v21  ;;  %v1884_v25 = vmul.f32 0.01, %v1744_v21  ;;  %vm1852_vm3 = vcmp.ge.f32.partialorder %v1744_v21, 0.0  ;;  %v1915_v28 = vsel %vm1851_vm1, %v1741_v14, %v1883_v19 }
 0x3f8   : > { %v1918_v27 = vsel %vm1854_vm2, %v1752_v23, %v1886_v24 }
 0x3f9   : > { %v1916_v29 = vsel %vm1852_vm3, %v1744_v21, %v1884_v25  ;;  %v1940_v30 = vpack.c.bf16 %v1918_v27, %v1917_v26 }
 0x3fa   : > { %v1939_v31 = vpack.c.bf16 %v1916_v29, %v1915_v28  ;;  %v1965_v28 = vsub.s32 3, %v4916_v17 }
 0x3fc   : > { %3853 = vmatprep.mubr.bf16.mxu0 %v1939_v31 }
 0x3fd   : > { %3854 = vmatmul.mubr.bf16.gmra.mrb[80].mxu0 %v1940_v30 }
 0x401   : > { %v3811_v20 = vpop.f32.mrb[84].mxu1 }
 0x402   : > { %v1765_v32 = vadd.f32 %v3811_v20, %v5040_v52  ;;  %v1756_v33 = vpop.f32.mrb[85].mxu1 }
 0x403   : > { %v1757_v34 = vadd.f32 %v1756_v33, %v5040_v52  ;;  %v3812_v35 = vpop.f32.mrb[86].mxu1 }
 0x404   : > { %1825 = vst [vmem:[%s5044_s21 + $0xb0] sm:$0xff] %v1765_v32  ;;  %v1889_v36 = vmul.f32 0.01, %v1765_v32  ;;  %v1768_v37 = vadd.f32 %v3812_v35, %v5040_v52  ;;  %v1759_v38 = vpop.f32.mrb[87].mxu1  ;;  %vm1857_vm4 = vcmp.ge.f32.partialorder %v1765_v32, 0.0 }
 0x405   : > { %1823 = vst [vmem:[%s5044_s21 + $0xa0] sm:$0xff] %v1757_v34  ;;  %v1887_v39 = vmul.f32 0.01, %v1757_v34  ;;  %v1760_v40 = vadd.f32 %v1759_v38, %v5040_v52  ;;  %vm1855_vm5 = vcmp.ge.f32.partialorder %v1757_v34, 0.0 }
 0x406   : > { %1826 = vst [vmem:[%s5044_s21 + $0xb8] sm:$0xff] %v1768_v37  ;;  %v1890_v41 = vmul.f32 0.01, %v1768_v37  ;;  %vm1858_vm6 = vcmp.ge.f32.partialorder %v1768_v37, 0.0  ;;  %v1921_v43 = vsel %vm1857_vm4, %v1765_v32, %v1889_v36  ;;  %v4128_v36 = vld [vmem:[#allocation13] ss:$8 sps:$4 sm:$0xff]  }
 0x407   : > { %1824 = vst [vmem:[%s5044_s21 + $0xa8] sm:$0xff] %v1760_v40  ;;  %v1888_v42 = vmul.f32 0.01, %v1760_v40  ;;  %vm1856_vm7 = vcmp.ge.f32.partialorder %v1760_v40, 0.0  ;;  %v1919_v45 = vsel %vm1855_vm5, %v1757_v34, %v1887_v39  ;;  %v4130_v39 = vld [vmem:[#allocation13 + $0x4] ss:$8 sps:$4 sm:$0xff]  }
 0x408   : > { %v1922_v44 = vsel %vm1858_vm6, %v1768_v37, %v1890_v41  ;;  %3009 = vmatprep.subr.bf16.mxu0 %v4130_v39  ;;  %v4133_v41 = vld [vmem:[#allocation13 + $0x14] ss:$8 sps:$4 sm:$0xff]   ;;  %3869 = vmatprep.subr.bf16.mxu1 %v4130_v39 }
 0x409   : > { %v1920_v46 = vsel %vm1856_vm7, %v1760_v40, %v1888_v42  ;;  %v1942_v47 = vpack.c.bf16 %v1922_v44, %v1921_v43  ;;  %3010 = vmatpush1.bf16.msra.mxu0 %v4128_v36  ;;  %v4131_v44 = vld [vmem:[#allocation13 + $0x10] ss:$8 sps:$4 sm:$0xff]  }
 0x40a   : > { %v1941_v48 = vpack.c.bf16 %v1920_v46, %v1919_v45  ;;  %3011 = vmatprep.subr.bf16.mxu0 %v4133_v41 }
 0x40c   : > { %3857 = vmatprep.mubr.bf16.mxu0 %v1941_v48  ;;  %v4136_v48 = vld [vmem:[#allocation13 + $0x24] ss:$8 sps:$4 sm:$0xff]  }
 0x40d   : > { %3858 = vmatmul.mubr.bf16.gmra.mrb[84].mxu0 %v1942_v47 }
 0x40e   : > { %3012 = vmatpush1.bf16.msra.mxu0 %v4131_v44 }
 0x40f   : > { %3013 = vmatprep.subr.bf16.mxu0 %v4136_v48 }
 0x411   : > { %v3815_v49 = vpop.f32.mrb[88].mxu1 }
 0x412   : > { %v1781_v50 = vadd.f32 %v3815_v49, %v5040_v52  ;;  %v1772_v16 = vpop.f32.mrb[89].mxu1 }
 0x413   : > { %v1773_v53 = vadd.f32 %v1772_v16, %v5040_v52  ;;  %v3816_v54 = vpop.f32.mrb[90].mxu1  ;;  %v4139_v16 = vld [vmem:[#allocation13 + $0x34] ss:$8 sps:$4 sm:$0xff]  }
 0x414   : > { %1829 = vst [vmem:[%s5044_s21 + $0xd0] sm:$0xff] %v1781_v50  ;;  %v1893_v55 = vmul.f32 0.01, %v1781_v50  ;;  %v1784_v56 = vadd.f32 %v3816_v54, %v5040_v52  ;;  %v1775_v57 = vpop.f32.mrb[91].mxu1  ;;  %vm1861_vm8 = vcmp.ge.f32.partialorder %v1781_v50, 0.0 }
 0x415   : > { %1827 = vst [vmem:[%s5044_s21 + $0xc0] sm:$0xff] %v1773_v53  ;;  %v1891_v58 = vmul.f32 0.01, %v1773_v53  ;;  %v1776_v59 = vadd.f32 %v1775_v57, %v5040_v52  ;;  %vm1859_vm9 = vcmp.ge.f32.partialorder %v1773_v53, 0.0 }
 0x416   : > { %1830 = vst [vmem:[%s5044_s21 + $0xd8] sm:$0xff] %v1784_v56  ;;  %v1894_v61 = vmul.f32 0.01, %v1784_v56  ;;  %vm1862_vm10 = vcmp.ge.f32.partialorder %v1784_v56, 0.0  ;;  %v1925_v0 = vsel %vm1861_vm8, %v1781_v50, %v1893_v55  ;;  %v4134_v50 = vld [vmem:[#allocation13 + $0x20] ss:$8 sps:$4 sm:$0xff]  }
 0x417   : > { %1828 = vst [vmem:[%s5044_s21 + $0xc8] sm:$0xff] %v1776_v59  ;;  %v1892_v63 = vmul.f32 0.01, %v1776_v59  ;;  %vm1860_vm11 = vcmp.ge.f32.partialorder %v1776_v59, 0.0  ;;  %v1923_v2 = vsel %vm1859_vm9, %v1773_v53, %v1891_v58  ;;  %3014 = vmatpush1.bf16.msra.mxu0 %v4134_v50  ;;  %v4137_v53 = vld [vmem:[#allocation13 + $0x30] ss:$8 sps:$4 sm:$0xff]  }
 0x418   : > { %v1926_v1 = vsel %vm1862_vm10, %v1784_v56, %v1894_v61  ;;  %3015 = vmatprep.subr.bf16.mxu0 %v4139_v16  ;;  %v4142_v55 = vld [vmem:[#allocation13 + $0x44] ss:$8 sps:$4 sm:$0xff]  }
 0x419   : > { %v1924_v3 = vsel %vm1860_vm11, %v1776_v59, %v1892_v63  ;;  %v1944_v4 = vpack.c.bf16 %v1926_v1, %v1925_v0  ;;  %v4140_v63 = vld [vmem:[#allocation13 + $0x40] ss:$8 sps:$4 sm:$0xff]  }
 0x41a   : > { %v1943_v5 = vpack.c.bf16 %v1924_v3, %v1923_v2  ;;  %v4145_v2 = vld [vmem:[#allocation13 + $0x54] ss:$8 sps:$4 sm:$0xff]  }
 0x41b   : > { %3016 = vmatpush1.bf16.msra.mxu0 %v4137_v53 }
 0x41c   : > { %3861 = vmatprep.mubr.bf16.mxu0 %v1943_v5  ;;  %3017 = vmatprep.subr.bf16.mxu0 %v4142_v55 }
 0x41d   : > { %3862 = vmatmul.mubr.bf16.gmra.mrb[88].mxu0 %v1944_v4 }
 0x41f   : > { %3018 = vmatpush1.bf16.msra.mxu0 %v4140_v63 }
 0x420   : > { %3019 = vmatprep.subr.bf16.mxu0 %v4145_v2 }
 0x421   : > { %v3819_v7 = vpop.f32.mrb[92].mxu1 }
 0x422   : > { %v1797_v8 = vadd.f32 %v3819_v7, %v5040_v52  ;;  %v1788_v9 = vpop.f32.mrb[93].mxu1 }
 0x423   : > { %v1789_v10 = vadd.f32 %v1788_v9, %v5040_v52  ;;  %v3820_v11 = vpop.f32.mrb[94].mxu1 }
 0x424   : > { %1833 = vst [vmem:[%s5044_s21 + $0xf0] sm:$0xff] %v1797_v8  ;;  %v1897_v12 = vmul.f32 0.01, %v1797_v8  ;;  %v1800_v13 = vadd.f32 %v3820_v11, %v5040_v52  ;;  %v1791_v14 = vpop.f32.mrb[95].mxu1  ;;  %vm1865_vm12 = vcmp.ge.f32.partialorder %v1797_v8, 0.0 }
 0x425   : > { %1831 = vst [vmem:[%s5044_s21 + $0xe0] sm:$0xff] %v1789_v10  ;;  %v1895_v22 = vmul.f32 0.01, %v1789_v10  ;;  %v1792_v15 = vadd.f32 %v1791_v14, %v5040_v52  ;;  %vm1863_vm13 = vcmp.ge.f32.partialorder %v1789_v10, 0.0  ;;  %v5111_v52 = vrot.slane %v5037_v51, %v1965_v28  ;;  %v4146_v14 = vld [vmem:[#allocation13 + $0x60] ss:$8 sps:$4 sm:$0xff]  }
 0x426   : > { %1834 = vst [vmem:[%s5044_s21 + $0xf8] sm:$0xff] %v1800_v13  ;;  %v1898_v23 = vmul.f32 0.01, %v1800_v13  ;;  %vm1866_vm14 = vcmp.ge.f32.partialorder %v1800_v13, 0.0  ;;  %v1929_v19 = vsel %vm1865_vm12, %v1797_v8, %v1897_v12  ;;  %v4143_v8 = vld [vmem:[#allocation13 + $0x50] ss:$8 sps:$4 sm:$0xff]  }
 0x427   : > { %1832 = vst [vmem:[%s5044_s21 + $0xe8] sm:$0xff] %v1792_v15  ;;  %v1896_v18 = vmul.f32 0.01, %v1792_v15  ;;  %vm1864_vm15 = vcmp.ge.f32.partialorder %v1792_v15, 0.0  ;;  %v1927_v24 = vsel %vm1863_vm13, %v1789_v10, %v1895_v22  ;;  %v4148_v12 = vld [vmem:[#allocation13 + $0x64] ss:$8 sps:$4 sm:$0xff]   ;;  %3020 = vmatpush1.bf16.msra.mxu0 %v4143_v8 }
 0x428   : > { %v1930_v21 = vsel %vm1866_vm14, %v1800_v13, %v1898_v23  ;;  %3021 = vmatprep.subr.bf16.mxu0 %v4148_v12  ;;  %v4151_v22 = vld [vmem:[#allocation13 + $0x74] ss:$8 sps:$4 sm:$0xff]   ;;  %s4377_s21 = scalar_lea.vmem %s5257_s19, 4096 }
 0x429   : > { %v1928_v25 = vsel %vm1864_vm15, %v1792_v15, %v1896_v18  ;;  %v1946_v26 = vpack.c.bf16 %v1930_v21, %v1929_v19  ;;  %v4149_v15 = vld [vmem:[#allocation13 + $0x70] ss:$8 sps:$4 sm:$0xff]   ;;  %v4154_v18 = vld [vmem:[#allocation13 + $0x84] ss:$8 sps:$4 sm:$0xff]   ;;  %p4378_p6 = scmp.ne.s32.totalorder %s5257_s19, %s4377_s21  ;;  %p4385_p12 = scmp.lt.s32.totalorder %s4383_s29, %s4377_s21 }
 0x42a   : > { %v1945_v27 = vpack.c.bf16 %v1928_v25, %v1927_v24 }
 0x42b   : > { %3022 = vmatpush1.bf16.msra.mxu0 %v4146_v14  ;;  %p4379_p10 = pnand %p4378_p6, %p5508_p5  ;;  %p4386_p13 = por %p4385_p12, %p4384_p11 }
 0x42c   : > { %3865 = vmatprep.mubr.bf16.mxu0 %v1945_v27  ;;  %3023 = vmatprep.subr.bf16.mxu0 %v4151_v22 }
 0x42d   : > { %3866 = vmatmul.mubr.bf16.gmra.mrb[92].mxu0 %v1946_v26  ;;  %p4380_p1 = pneg %p4379_p10 }
 0x42f   : > { %3024 = vmatpush1.bf16.msra.mxu0 %v4149_v15  ;;  %p4387_p8 = pnand %p4386_p13, %p4380_p1 }
 0x430   : > { %3025 = vmatprep.subr.bf16.mxu0 %v4154_v18 }
 0x490   : > { %v3839_v29 = vpop.f32.mrb[64].mxu0 }
 0x491   : > { %v2058_v30 = vadd.f32 %v3839_v29, %v5111_v52  ;;  %v2049_v31 = vpop.f32.mrb[65].mxu0  ;;  %v4152_v29 = vld [vmem:[#allocation13 + $0x80] ss:$8 sps:$4 sm:$0xff]  }
 0x492   : > { %v2050_v20 = vadd.f32 %v2049_v31, %v5111_v52  ;;  %v3840_v32 = vpop.f32.mrb[66].mxu0  ;;  %3026 = vmatpush1.bf16.msra.mxu0 %v4152_v29 }
 0x493   : > { %v2210_v33 = vmul.f32 0.01, %v2058_v30  ;;  %v2061_v34 = vadd.f32 %v3840_v32, %v5111_v52  ;;  %v2052_v35 = vpop.f32.mrb[67].mxu0  ;;  %vm2178_vm0 = vcmp.ge.f32.partialorder %v2058_v30, 0.0 }
 0x494   : > { %v2208_v37 = vmul.f32 0.01, %v2050_v20  ;;  %v2053_v38 = vadd.f32 %v2052_v35, %v5111_v52  ;;  %vm2176_vm1 = vcmp.ge.f32.partialorder %v2050_v20, 0.0 }
 0x495   : > { %vm2179_vm2 = vcmp.ge.f32.partialorder %v2061_v34, 0.0  ;;  %v2211_v51 = vmul.f32 0.01, %v2061_v34  ;;  %v2242_v42 = vsel %vm2178_vm0, %v2058_v30, %v2210_v33 }
 0x496   : > { %vm2177_vm3 = vcmp.ge.f32.partialorder %v2053_v38, 0.0  ;;  %v2209_v40 = vmul.f32 0.01, %v2053_v38  ;;  %v2240_v45 = vsel %vm2176_vm1, %v2050_v20, %v2208_v37  ;;  %v4157_v20 = vld [vmem:[#allocation13 + $0x94] ss:$8 sps:$4 sm:$0xff]  }
 0x497   : > { %v2243_v43 = vsel %vm2179_vm2, %v2061_v34, %v2211_v51  ;;  %3027 = vmatprep.subr.bf16.mxu0 %v4157_v20  ;;  %v4160_v51 = vld [vmem:[#allocation13 + $0xa4] ss:$8 sps:$4 sm:$0xff]  }
 0x498   : > { %v2241_v46 = vsel %vm2177_vm3, %v2053_v38, %v2209_v40  ;;  %v2273_v47 = vpack.c.bf16 %v2243_v43, %v2242_v42  ;;  %v4163_v42 = vld [vmem:[#allocation13 + $0xb4] ss:$8 sps:$4 sm:$0xff]   ;;  %v4161_v43 = vld [vmem:[#allocation13 + $0xb0] ss:$8 sps:$4 sm:$0xff]  }
 0x499   : > { %v2272_v49 = vpack.c.bf16 %v2241_v46, %v2240_v45  ;;  %v4166_v45 = vld [vmem:[#allocation13 + $0xc4] ss:$8 sps:$4 sm:$0xff]  }
 0x49b   : > { %2425 = vmatmul.mubr.bf16.vlgmr.msra.gmra.mrb[96].mxu1 %v2272_v49 }
 0x49c   : > { %2434 = vmatprep.mubr.bf16.mxu1 %v4502_v6  ;;  %3885 = vmatpush1.bf16.msra.mxu1 %v4128_v36  ;;  %v4155_v36 = vld [vmem:[#allocation13 + $0x90] ss:$8 sps:$4 sm:$0xff]  }
 0x49d   : > { %3870 = vmatprep.subr.bf16.mxu1 %v4133_v41  ;;  %3028 = vmatpush1.bf16.msra.mxu0 %v4155_v36  ;;  %v4158_v41 = vld [vmem:[#allocation13 + $0xa0] ss:$8 sps:$4 sm:$0xff]  }
 0x49e   : > { %3029 = vmatprep.subr.bf16.mxu0 %v4160_v51 }
 0x4a0   : > { %v3843_v54 = vpop.f32.mrb[68].mxu0  ;;  %3886 = vmatpush1.bf16.msra.mxu1 %v4131_v44 }
 0x4a1   : > { %v2074_v56 = vadd.f32 %v3843_v54, %v5111_v52  ;;  %v2065_v57 = vpop.f32.mrb[69].mxu0  ;;  %3871 = vmatprep.subr.bf16.mxu1 %v4136_v48  ;;  %3030 = vmatpush1.bf16.msra.mxu0 %v4158_v41  ;;  %v4164_v54 = vld [vmem:[#allocation13 + $0xc0] ss:$8 sps:$4 sm:$0xff]  }
 0x4a2   : > { %v2066_v58 = vadd.f32 %v2065_v57, %v5111_v52  ;;  %v3844_v59 = vpop.f32.mrb[70].mxu0  ;;  %3031 = vmatprep.subr.bf16.mxu0 %v4163_v42 }
 0x4a3   : > { %v2214_v60 = vmul.f32 0.01, %v2074_v56  ;;  %v2077_v61 = vadd.f32 %v3844_v59, %v5111_v52  ;;  %v2068_v62 = vpop.f32.mrb[71].mxu0  ;;  %2435 = vmatmul.mubr.bf16.gmra.mrb[100].mxu1 %v2273_v47  ;;  %vm2182_vm4 = vcmp.ge.f32.partialorder %v2074_v56, 0.0 }
 0x4a4   : > { %v2212_v0 = vmul.f32 0.01, %v2066_v58  ;;  %v2069_v1 = vadd.f32 %v2068_v62, %v5111_v52  ;;  %2444 = vmatprep.mubr.bf16.mxu1 %v4502_v6  ;;  %vm2180_vm5 = vcmp.ge.f32.partialorder %v2066_v58, 0.0  ;;  %3887 = vmatpush1.bf16.msra.mxu1 %v4134_v50 }
 0x4a5   : > { %vm2183_vm6 = vcmp.ge.f32.partialorder %v2077_v61, 0.0  ;;  %v2215_v3 = vmul.f32 0.01, %v2077_v61  ;;  %3872 = vmatprep.subr.bf16.mxu1 %v4139_v16  ;;  %v2246_v5 = vsel %vm2182_vm4, %v2074_v56, %v2214_v60  ;;  %3032 = vmatpush1.bf16.msra.mxu0 %v4161_v43 }
 0x4a6   : > { %vm2181_vm7 = vcmp.ge.f32.partialorder %v2069_v1, 0.0  ;;  %v2213_v4 = vmul.f32 0.01, %v2069_v1  ;;  %v2244_v9 = vsel %vm2180_vm5, %v2066_v58, %v2212_v0  ;;  %3033 = vmatprep.subr.bf16.mxu0 %v4166_v45 }
 0x4a7   : > { %v2247_v7 = vsel %vm2183_vm6, %v2077_v61, %v2215_v3 }
 0x4a8   : > { %v2245_v10 = vsel %vm2181_vm7, %v2069_v1, %v2213_v4  ;;  %v2275_v11 = vpack.c.bf16 %v2247_v7, %v2246_v5  ;;  %3888 = vmatpush1.bf16.msra.mxu1 %v4137_v53 }
 0x4a9   : > { %v2274_v13 = vpack.c.bf16 %v2245_v10, %v2244_v9  ;;  %3873 = vmatprep.subr.bf16.mxu1 %v4142_v55  ;;  %3034 = vmatpush1.bf16.msra.mxu0 %v4164_v54 }
 0x4ab   : > { %2445 = vmatmul.mubr.bf16.gmra.mrb[104].mxu1 %v2274_v13 }
 0x4ac   : > { %2454 = vmatprep.mubr.bf16.mxu1 %v4502_v6  ;;  %3889 = vmatpush1.bf16.msra.mxu1 %v4140_v63 }
 0x4ad   : > { %3874 = vmatprep.subr.bf16.mxu1 %v4145_v2 }
 0x4b0   : > { %v3847_v23 = vpop.f32.mrb[72].mxu0  ;;  %3890 = vmatpush1.bf16.msra.mxu1 %v4143_v8 }
 0x4b1   : > { %v2090_v19 = vadd.f32 %v3847_v23, %v5111_v52  ;;  %v2081_v21 = vpop.f32.mrb[73].mxu0  ;;  %3875 = vmatprep.subr.bf16.mxu1 %v4148_v12 }
 0x4b2   : > { %v2082_v24 = vadd.f32 %v2081_v21, %v5111_v52  ;;  %v3848_v25 = vpop.f32.mrb[74].mxu0 }
 0x4b3   : > { %v2218_v26 = vmul.f32 0.01, %v2090_v19  ;;  %v2093_v27 = vadd.f32 %v3848_v25, %v5111_v52  ;;  %v2084_v28 = vpop.f32.mrb[75].mxu0  ;;  %2455 = vmatmul.mubr.bf16.gmra.mrb[108].mxu1 %v2275_v11  ;;  %vm2186_vm8 = vcmp.ge.f32.partialorder %v2090_v19, 0.0 }
 0x4b4   : > { %v2216_v30 = vmul.f32 0.01, %v2082_v24  ;;  %v2085_v31 = vadd.f32 %v2084_v28, %v5111_v52  ;;  %2464 = vmatprep.mubr.bf16.mxu1 %v4502_v6  ;;  %vm2184_vm9 = vcmp.ge.f32.partialorder %v2082_v24, 0.0  ;;  %3891 = vmatpush1.bf16.msra.mxu1 %v4146_v14 }
 0x4b5   : > { %vm2187_vm10 = vcmp.ge.f32.partialorder %v2093_v27, 0.0  ;;  %v2219_v32 = vmul.f32 0.01, %v2093_v27  ;;  %3876 = vmatprep.subr.bf16.mxu1 %v4151_v22  ;;  %v2250_v34 = vsel %vm2186_vm8, %v2090_v19, %v2218_v26 }
 0x4b6   : > { %vm2185_vm11 = vcmp.ge.f32.partialorder %v2085_v31, 0.0  ;;  %v2217_v33 = vmul.f32 0.01, %v2085_v31  ;;  %v2248_v37 = vsel %vm2184_vm9, %v2082_v24, %v2216_v30 }
 0x4b7   : > { %v2251_v35 = vsel %vm2187_vm10, %v2093_v27, %v2219_v32 }
 0x4b8   : > { %v2249_v38 = vsel %vm2185_vm11, %v2085_v31, %v2217_v33  ;;  %v2277_v39 = vpack.c.bf16 %v2251_v35, %v2250_v34  ;;  %3892 = vmatpush1.bf16.msra.mxu1 %v4149_v15 }
 0x4b9   : > { %v2276_v40 = vpack.c.bf16 %v2249_v38, %v2248_v37  ;;  %3877 = vmatprep.subr.bf16.mxu1 %v4154_v18 }
 0x4bb   : > { %2465 = vmatmul.mubr.bf16.gmra.mrb[112].mxu1 %v2276_v40  ;;  %v4167_v40 = vld [vmem:[#allocation13 + $0xd0] ss:$8 sps:$4 sm:$0xff]  }
 0x4bc   : > { %2474 = vmatprep.mubr.bf16.mxu1 %v4502_v6  ;;  %3893 = vmatpush1.bf16.msra.mxu1 %v4152_v29 }
 0x4bd   : > { %3878 = vmatprep.subr.bf16.mxu1 %v4157_v20 }
 0x4c0   : > { %v3851_v44 = vpop.f32.mrb[76].mxu0  ;;  %3894 = vmatpush1.bf16.msra.mxu1 %v4155_v36 }
 0x4c1   : > { %v2106_v46 = vadd.f32 %v3851_v44, %v5111_v52  ;;  %v2097_v47 = vpop.f32.mrb[77].mxu0  ;;  %3879 = vmatprep.subr.bf16.mxu1 %v4160_v51  ;;  %v4169_v51 = vld [vmem:[#allocation13 + $0xd4] ss:$8 sps:$4 sm:$0xff]  }
 0x4c2   : > { %v2098_v48 = vadd.f32 %v2097_v47, %v5111_v52  ;;  %v3852_v49 = vpop.f32.mrb[78].mxu0  ;;  %3035 = vmatprep.subr.bf16.mxu0 %v4169_v51 }
 0x4c3   : > { %v2222_v50 = vmul.f32 0.01, %v2106_v46  ;;  %v2109_v16 = vadd.f32 %v3852_v49, %v5111_v52  ;;  %v2100_v53 = vpop.f32.mrb[79].mxu0  ;;  %2475 = vmatmul.mubr.bf16.gmra.mrb[116].mxu1 %v2277_v39  ;;  %vm2190_vm12 = vcmp.ge.f32.partialorder %v2106_v46, 0.0  ;;  %3036 = vmatpush1.bf16.msra.mxu0 %v4167_v40 }
 0x4c4   : > { %v2220_v55 = vmul.f32 0.01, %v2098_v48  ;;  %v2101_v56 = vadd.f32 %v2100_v53, %v5111_v52  ;;  %2484 = vmatprep.mubr.bf16.mxu1 %v4502_v6  ;;  %vm2188_vm13 = vcmp.ge.f32.partialorder %v2098_v48, 0.0  ;;  %3895 = vmatpush1.bf16.msra.mxu1 %v4158_v41 }
 0x4c5   : > { %vm2191_vm14 = vcmp.ge.f32.partialorder %v2109_v16, 0.0  ;;  %v2223_v57 = vmul.f32 0.01, %v2109_v16  ;;  %3880 = vmatprep.subr.bf16.mxu1 %v4163_v42  ;;  %v2254_v59 = vsel %vm2190_vm12, %v2106_v46, %v2222_v50  ;;  %v4172_v42 = vld [vmem:[#allocation13 + $0xe4] ss:$8 sps:$4 sm:$0xff]  }
 0x4c6   : > { %vm2189_vm15 = vcmp.ge.f32.partialorder %v2101_v56, 0.0  ;;  %v2221_v58 = vmul.f32 0.01, %v2101_v56  ;;  %v2252_v61 = vsel %vm2188_vm13, %v2098_v48, %v2220_v55  ;;  %3037 = vmatprep.subr.bf16.mxu0 %v4172_v42 }
 0x4c7   : > { %v2255_v60 = vsel %vm2191_vm14, %v2109_v16, %v2223_v57 }
 0x4c8   : > { %v2253_v62 = vsel %vm2189_vm15, %v2101_v56, %v2221_v58  ;;  %v2279_v63 = vpack.c.bf16 %v2255_v60, %v2254_v59  ;;  %3896 = vmatpush1.bf16.msra.mxu1 %v4161_v43  ;;  %v4173_v56 = vld [vmem:[#allocation13 + $0xf0] ss:$8 sps:$4 sm:$0xff]  }
 0x4c9   : > { %v2278_v0 = vpack.c.bf16 %v2253_v62, %v2252_v61  ;;  %3881 = vmatprep.subr.bf16.mxu1 %v4166_v45  ;;  %v4170_v45 = vld [vmem:[#allocation13 + $0xe0] ss:$8 sps:$4 sm:$0xff]  }
 0x4ca   : > { %3038 = vmatpush1.bf16.msra.mxu0 %v4170_v45 }
 0x4cb   : > { %2485 = vmatmul.mubr.bf16.gmra.mrb[120].mxu1 %v2278_v0 }
 0x4cc   : > { %2494 = vmatprep.mubr.bf16.mxu1 %v4502_v6  ;;  %3897 = vmatpush1.bf16.msra.mxu1 %v4164_v54  ;;  %v4175_v54 = vld [vmem:[#allocation13 + $0xf4] ss:$8 sps:$4 sm:$0xff]  }
 0x4cd   : > { %3882 = vmatprep.subr.bf16.mxu1 %v4169_v51  ;;  %3039 = vmatprep.subr.bf16.mxu0 %v4175_v54 }
 0x4ce   : > { %3040 = vmatpush1.bf16.msra.mxu0 %v4173_v56 }
 0x4d0   : > { %v3855_v1 = vpop.f32.mrb[80].mxu0  ;;  %3898 = vmatpush1.bf16.msra.mxu1 %v4167_v40 }
 0x4d1   : > { %v2122_v2 = vadd.f32 %v3855_v1, %v5111_v52  ;;  %v2113_v3 = vpop.f32.mrb[81].mxu0  ;;  %3883 = vmatprep.subr.bf16.mxu1 %v4172_v42 }
 0x4d2   : > { %v2114_v4 = vadd.f32 %v2113_v3, %v5111_v52  ;;  %v3856_v5 = vpop.f32.mrb[82].mxu0 }
 0x4d3   : > { %v2226_v7 = vmul.f32 0.01, %v2122_v2  ;;  %v2125_v8 = vadd.f32 %v3856_v5, %v5111_v52  ;;  %v2116_v9 = vpop.f32.mrb[83].mxu0  ;;  %2495 = vmatmul.mubr.bf16.gmra.mrb[124].mxu1 %v2279_v63  ;;  %vm2194_vm0 = vcmp.ge.f32.partialorder %v2122_v2, 0.0 }
 0x4d4   : > { %v2224_v10 = vmul.f32 0.01, %v2114_v4  ;;  %v2117_v11 = vadd.f32 %v2116_v9, %v5111_v52  ;;  %2504 = vmatprep.mubr.bf16.mxu1 %v4502_v6  ;;  %vm2192_vm1 = vcmp.ge.f32.partialorder %v2114_v4, 0.0  ;;  %3899 = vmatpush1.bf16.msra.mxu1 %v4170_v45 }
 0x4d5   : > { %vm2195_vm2 = vcmp.ge.f32.partialorder %v2125_v8, 0.0  ;;  %v2227_v12 = vmul.f32 0.01, %v2125_v8  ;;  %v2258_v14 = vsel %vm2194_vm0, %v2122_v2, %v2226_v7  ;;  %3884 = vmatprep.subr.bf16.mxu1 %v4175_v54 }
 0x4d6   : > { %vm2193_vm3 = vcmp.ge.f32.partialorder %v2117_v11, 0.0  ;;  %v2225_v13 = vmul.f32 0.01, %v2117_v11  ;;  %v2256_v15 = vsel %vm2192_vm1, %v2114_v4, %v2224_v10 }
 0x4d7   : > { %v2259_v22 = vsel %vm2195_vm2, %v2125_v8, %v2227_v12 }
 0x4d8   : > { %v2257_v23 = vsel %vm2193_vm3, %v2117_v11, %v2225_v13  ;;  %v2281_v18 = vpack.c.bf16 %v2259_v22, %v2258_v14  ;;  %3900 = vmatpush1.bf16.msra.mxu1 %v4173_v56 }
 0x4d9   : > { %v2280_v19 = vpack.c.bf16 %v2257_v23, %v2256_v15 }
 0x4db   : > { %2505 = vmatmul.mubr.bf16.gmra.mrb[128].mxu1 %v2280_v19  ;;  %v2306_v19 = vsub.s32 4, %v4916_v17 }
 0x4dc   : > { %2514 = vmatprep.mubr.bf16.mxu1 %v4502_v6 }
 0x4e0   : > { %v3859_v21 = vpop.f32.mrb[84].mxu0 }
 0x4e1   : > { %v2138_v24 = vadd.f32 %v3859_v21, %v5111_v52  ;;  %v2129_v25 = vpop.f32.mrb[85].mxu0 }
 0x4e2   : > { %v2130_v26 = vadd.f32 %v2129_v25, %v5111_v52  ;;  %v3860_v27 = vpop.f32.mrb[86].mxu0 }
 0x4e3   : > { %v2230_v28 = vmul.f32 0.01, %v2138_v24  ;;  %v2141_v29 = vadd.f32 %v3860_v27, %v5111_v52  ;;  %v2132_v30 = vpop.f32.mrb[87].mxu0  ;;  %2515 = vmatmul.mubr.bf16.gmra.mrb[132].mxu1 %v2281_v18  ;;  %vm2198_vm4 = vcmp.ge.f32.partialorder %v2138_v24, 0.0 }
 0x4e4   : > { %v2228_v31 = vmul.f32 0.01, %v2130_v26  ;;  %v2133_v20 = vadd.f32 %v2132_v30, %v5111_v52  ;;  %2524 = vmatprep.mubr.bf16.mxu1 %v4502_v6  ;;  %vm2196_vm5 = vcmp.ge.f32.partialorder %v2130_v26, 0.0 }
 0x4e5   : > { %vm2199_vm6 = vcmp.ge.f32.partialorder %v2141_v29, 0.0  ;;  %v2231_v32 = vmul.f32 0.01, %v2141_v29  ;;  %v2262_v34 = vsel %vm2198_vm4, %v2138_v24, %v2230_v28  ;;  %v5172_v24 = vld [vmem:[%s5471_s7 + $0x8] sm:$0xff] }
 0x4e6   : > { %vm2197_vm7 = vcmp.ge.f32.partialorder %v2133_v20, 0.0  ;;  %v2229_v33 = vmul.f32 0.01, %v2133_v20  ;;  %v2260_v36 = vsel %vm2196_vm5, %v2130_v26, %v2228_v31  ;;  %v5175_v25 = vrot.slane %v5172_v24, %v2306_v19 }
 0x4e7   : > { %v2263_v35 = vsel %vm2199_vm6, %v2141_v29, %v2231_v32 }
 0x4e8   : > { %v2261_v37 = vsel %vm2197_vm7, %v2133_v20, %v2229_v33  ;;  %v2283_v38 = vpack.c.bf16 %v2263_v35, %v2262_v34 }
 0x4e9   : > { %v2282_v39 = vpack.c.bf16 %v2261_v37, %v2260_v36 }
 0x4eb   : > { %2525 = vmatmul.mubr.bf16.gmra.mrb[136].mxu1 %v2282_v39 }
 0x4ec   : > { %2534 = vmatprep.mubr.bf16.mxu1 %v4502_v6 }
 0x4f0   : > { %v3863_v41 = vpop.f32.mrb[88].mxu0 }
 0x4f1   : > { %v2154_v43 = vadd.f32 %v3863_v41, %v5111_v52  ;;  %v2145_v44 = vpop.f32.mrb[89].mxu0 }
 0x4f2   : > { %v2146_v46 = vadd.f32 %v2145_v44, %v5111_v52  ;;  %v3864_v47 = vpop.f32.mrb[90].mxu0 }
 0x4f3   : > { %v2234_v48 = vmul.f32 0.01, %v2154_v43  ;;  %v2157_v49 = vadd.f32 %v3864_v47, %v5111_v52  ;;  %v2148_v50 = vpop.f32.mrb[91].mxu0  ;;  %2535 = vmatmul.mubr.bf16.gmra.mrb[140].mxu1 %v2283_v38  ;;  %vm2202_vm8 = vcmp.ge.f32.partialorder %v2154_v43, 0.0 }
 0x4f4   : > { %v2232_v16 = vmul.f32 0.01, %v2146_v46  ;;  %v2149_v53 = vadd.f32 %v2148_v50, %v5111_v52  ;;  %2544 = vmatprep.mubr.bf16.mxu1 %v4502_v6  ;;  %vm2200_vm9 = vcmp.ge.f32.partialorder %v2146_v46, 0.0 }
 0x4f5   : > { %vm2203_vm10 = vcmp.ge.f32.partialorder %v2157_v49, 0.0  ;;  %v2235_v55 = vmul.f32 0.01, %v2157_v49  ;;  %v2266_v58 = vsel %vm2202_vm8, %v2154_v43, %v2234_v48 }
 0x4f6   : > { %vm2201_vm11 = vcmp.ge.f32.partialorder %v2149_v53, 0.0  ;;  %v2233_v57 = vmul.f32 0.01, %v2149_v53  ;;  %v2264_v60 = vsel %vm2200_vm9, %v2146_v46, %v2232_v16 }
 0x4f7   : > { %v2267_v59 = vsel %vm2203_vm10, %v2157_v49, %v2235_v55 }
 0x4f8   : > { %v2265_v61 = vsel %vm2201_vm11, %v2149_v53, %v2233_v57  ;;  %v2285_v62 = vpack.c.bf16 %v2267_v59, %v2266_v58 }
 0x4f9   : > { %v2284_v63 = vpack.c.bf16 %v2265_v61, %v2264_v60 }
 0x4fb   : > { %2545 = vmatmul.mubr.bf16.gmra.mrb[144].mxu1 %v2284_v63 }
 0x4fc   : > { %2554 = vmatprep.mubr.bf16.mxu1 %v4502_v6 }
 0x500   : > { %v3867_v0 = vpop.f32.mrb[92].mxu0 }
 0x501   : > { %v2170_v1 = vadd.f32 %v3867_v0, %v5111_v52  ;;  %v2161_v2 = vpop.f32.mrb[93].mxu0 }
 0x502   : > { %v2162_v3 = vadd.f32 %v2161_v2, %v5111_v52  ;;  %v3868_v4 = vpop.f32.mrb[94].mxu0 }
 0x503   : > { %v2238_v5 = vmul.f32 0.01, %v2170_v1  ;;  %v2173_v7 = vadd.f32 %v3868_v4, %v5111_v52  ;;  %v2164_v8 = vpop.f32.mrb[95].mxu0  ;;  %2555 = vmatmul.mubr.bf16.gmra.mrb[148].mxu1 %v2285_v62  ;;  %vm2206_vm12 = vcmp.ge.f32.partialorder %v2170_v1, 0.0 }
 0x504   : > { %v2236_v9 = vmul.f32 0.01, %v2162_v3  ;;  %v2165_v10 = vadd.f32 %v2164_v8, %v5111_v52  ;;  %2564 = vmatprep.mubr.bf16.mxu1 %v4502_v6  ;;  %vm2204_vm13 = vcmp.ge.f32.partialorder %v2162_v3, 0.0  ;;  %v5164_v52 = vld [vmem:[%s5471_s7] sm:$0xff] }
 0x505   : > { %vm2207_vm14 = vcmp.ge.f32.partialorder %v2173_v7, 0.0  ;;  %v2239_v11 = vmul.f32 0.01, %v2173_v7  ;;  %v2270_v13 = vsel %vm2206_vm12, %v2170_v1, %v2238_v5  ;;  %v5167_v21 = vrot.slane %v5164_v52, %v2306_v19 }
 0x506   : > { %vm2205_vm15 = vcmp.ge.f32.partialorder %v2165_v10, 0.0  ;;  %v2237_v12 = vmul.f32 0.01, %v2165_v10  ;;  %v2268_v22 = vsel %vm2204_vm13, %v2162_v3, %v2236_v9 }
 0x507   : > { %v2271_v14 = vsel %vm2207_vm14, %v2173_v7, %v2239_v11 }
 0x508   : > { %v2269_v15 = vsel %vm2205_vm15, %v2165_v10, %v2237_v12  ;;  %v2287_v23 = vpack.c.bf16 %v2271_v14, %v2270_v13 }
 0x509   : > { %v2286_v18 = vpack.c.bf16 %v2269_v15, %v2268_v22 }
 0x50b   : > { %2565 = vmatmul.mubr.bf16.gmra.mrb[152].mxu1 %v2286_v18 }
 0x50c   : > { %2574 = vmatprep.mubr.bf16.mxu1 %v4502_v6 }
 0x513   : > { %2575 = vmatmul.mubr.bf16.gmra.mrb[156].mxu1 %v2287_v23 }
 0x56e   : > { %v2426_v6 = vpop.f32.mrb[96].mxu1 }
 0x56f   : > { %v2427_v26 = vadd.f32 %v2426_v6, %v5167_v21  ;;  %v2428_v27 = vpop.f32.mrb[97].mxu1 }
 0x570   : > { %v2429_v28 = vadd.f32 %v2428_v27, %v5175_v25  ;;  %v2430_v29 = vpop.f32.mrb[98].mxu1 }
 0x571   : > { %v2649_v30 = vmul.f32 0.01, %v2427_v26  ;;  %v2431_v31 = vadd.f32 %v2430_v29, %v5167_v21  ;;  %v2432_v20 = vpop.f32.mrb[99].mxu1  ;;  %vm2585_vm0 = vcmp.ge.f32.partialorder %v2427_v26, 0.0 }
 0x572   : > { %v2650_v32 = vmul.f32 0.01, %v2429_v28  ;;  %v2433_v33 = vadd.f32 %v2432_v20, %v5175_v25  ;;  %vm2586_vm1 = vcmp.ge.f32.partialorder %v2429_v28, 0.0 }
 0x573   : > { %vm2587_vm2 = vcmp.ge.f32.partialorder %v2431_v31, 0.0  ;;  %v2651_v34 = vmul.f32 0.01, %v2431_v31  ;;  %v2713_v36 = vsel %vm2585_vm0, %v2427_v26, %v2649_v30 }
 0x574   : > { %vm2588_vm3 = vcmp.ge.f32.partialorder %v2433_v33, 0.0  ;;  %v2652_v35 = vmul.f32 0.01, %v2433_v33  ;;  %v2714_v51 = vsel %vm2586_vm1, %v2429_v28, %v2650_v32 }
 0x575   : > { %v2715_v37 = vsel %vm2587_vm2, %v2431_v31, %v2651_v34 }
 0x576   : > { %v2777_v38 = vpack.c.bf16 %v2715_v37, %v2713_v36  ;;  %v2436_v39 = vpop.f32.mrb[100].mxu1  ;;  %v2716_v40 = vsel %vm2588_vm3, %v2433_v33, %v2652_v35 }
 0x577   : > { %v2437_v41 = vadd.f32 %v2436_v39, %v5167_v21  ;;  %v2438_v42 = vpop.f32.mrb[101].mxu1  ;;  %v2778_v43 = vpack.c.bf16 %v2716_v40, %v2714_v51 }
 0x578   : > { %v2439_v44 = vadd.f32 %v2438_v42, %v5175_v25  ;;  %v2440_v45 = vpop.f32.mrb[102].mxu1 }
 0x579   : > { %v2653_v46 = vmul.f32 0.01, %v2437_v41  ;;  %v2441_v47 = vadd.f32 %v2440_v45, %v5167_v21  ;;  %v2442_v48 = vpop.f32.mrb[103].mxu1  ;;  %3041 = vmatprep.mubr.bf16.mxu0 %v2778_v43  ;;  %vm2589_vm4 = vcmp.ge.f32.partialorder %v2437_v41, 0.0 }
 0x57a   : > { %v2654_v49 = vmul.f32 0.01, %v2439_v44  ;;  %v2443_v50 = vadd.f32 %v2442_v48, %v5175_v25  ;;  %3042 = vmatmul.mubr.bf16.vlgmr.msra.gmra.mrb[96].mxu0 %v2777_v38  ;;  %vm2590_vm5 = vcmp.ge.f32.partialorder %v2439_v44, 0.0 }
 0x57b   : > { %vm2591_vm6 = vcmp.ge.f32.partialorder %v2441_v47, 0.0  ;;  %v2655_v16 = vmul.f32 0.01, %v2441_v47  ;;  %v2717_v54 = vsel %vm2589_vm4, %v2437_v41, %v2653_v46 }
 0x57c   : > { %vm2592_vm7 = vcmp.ge.f32.partialorder %v2443_v50, 0.0  ;;  %v2656_v53 = vmul.f32 0.01, %v2443_v50  ;;  %v2718_v57 = vsel %vm2590_vm5, %v2439_v44, %v2654_v49 }
 0x57d   : > { %v2719_v55 = vsel %vm2591_vm6, %v2441_v47, %v2655_v16 }
 0x57e   : > { %v2446_v56 = vpop.f32.mrb[104].mxu1  ;;  %v2720_v58 = vsel %vm2592_vm7, %v2443_v50, %v2656_v53  ;;  %v2779_v59 = vpack.c.bf16 %v2719_v55, %v2717_v54 }
 0x57f   : > { %v2447_v60 = vadd.f32 %v2446_v56, %v5167_v21  ;;  %v2448_v61 = vpop.f32.mrb[105].mxu1  ;;  %v2780_v62 = vpack.c.bf16 %v2720_v58, %v2718_v57 }
 0x580   : > { %v2449_v63 = vadd.f32 %v2448_v61, %v5175_v25  ;;  %v2450_v0 = vpop.f32.mrb[106].mxu1 }
 0x581   : > { %v2657_v1 = vmul.f32 0.01, %v2447_v60  ;;  %v2451_v2 = vadd.f32 %v2450_v0, %v5167_v21  ;;  %v2452_v3 = vpop.f32.mrb[107].mxu1  ;;  %3051 = vmatprep.mubr.bf16.mxu0 %v2780_v62  ;;  %vm2593_vm8 = vcmp.ge.f32.partialorder %v2447_v60, 0.0 }
 0x582   : > { %v2658_v4 = vmul.f32 0.01, %v2449_v63  ;;  %v2453_v5 = vadd.f32 %v2452_v3, %v5175_v25  ;;  %3052 = vmatmul.mubr.bf16.gmra.mrb[100].mxu0 %v2779_v59  ;;  %vm2594_vm9 = vcmp.ge.f32.partialorder %v2449_v63, 0.0 }
 0x583   : > { %vm2595_vm10 = vcmp.ge.f32.partialorder %v2451_v2, 0.0  ;;  %v2659_v7 = vmul.f32 0.01, %v2451_v2  ;;  %v2721_v9 = vsel %vm2593_vm8, %v2447_v60, %v2657_v1 }
 0x584   : > { %vm2596_vm11 = vcmp.ge.f32.partialorder %v2453_v5, 0.0  ;;  %v2660_v8 = vmul.f32 0.01, %v2453_v5  ;;  %v2722_v12 = vsel %vm2594_vm9, %v2449_v63, %v2658_v4 }
 0x585   : > { %v2723_v10 = vsel %vm2595_vm10, %v2451_v2, %v2659_v7 }
 0x586   : > { %v2456_v11 = vpop.f32.mrb[108].mxu1  ;;  %v2724_v13 = vsel %vm2596_vm11, %v2453_v5, %v2660_v8  ;;  %v2781_v14 = vpack.c.bf16 %v2723_v10, %v2721_v9 }
 0x587   : > { %v2457_v22 = vadd.f32 %v2456_v11, %v5167_v21  ;;  %v2458_v15 = vpop.f32.mrb[109].mxu1  ;;  %v2782_v23 = vpack.c.bf16 %v2724_v13, %v2722_v12 }
 0x588   : > { %v2459_v18 = vadd.f32 %v2458_v15, %v5175_v25  ;;  %v2460_v19 = vpop.f32.mrb[110].mxu1 }
 0x589   : > { %v2661_v6 = vmul.f32 0.01, %v2457_v22  ;;  %v2461_v26 = vadd.f32 %v2460_v19, %v5167_v21  ;;  %v2462_v27 = vpop.f32.mrb[111].mxu1  ;;  %3061 = vmatprep.mubr.bf16.mxu0 %v2782_v23  ;;  %vm2597_vm12 = vcmp.ge.f32.partialorder %v2457_v22, 0.0 }
 0x58a   : > { %v2662_v28 = vmul.f32 0.01, %v2459_v18  ;;  %v2463_v29 = vadd.f32 %v2462_v27, %v5175_v25  ;;  %3062 = vmatmul.mubr.bf16.gmra.mrb[104].mxu0 %v2781_v14  ;;  %vm2598_vm13 = vcmp.ge.f32.partialorder %v2459_v18, 0.0 }
 0x58b   : > { %vm2599_vm14 = vcmp.ge.f32.partialorder %v2461_v26, 0.0  ;;  %v2663_v30 = vmul.f32 0.01, %v2461_v26  ;;  %v2725_v20 = vsel %vm2597_vm12, %v2457_v22, %v2661_v6 }
 0x58c   : > { %vm2600_vm15 = vcmp.ge.f32.partialorder %v2463_v29, 0.0  ;;  %v2664_v31 = vmul.f32 0.01, %v2463_v29  ;;  %v2726_v34 = vsel %vm2598_vm13, %v2459_v18, %v2662_v28 }
 0x58d   : > { %v2727_v32 = vsel %vm2599_vm14, %v2461_v26, %v2663_v30 }
 0x58e   : > { %v2466_v33 = vpop.f32.mrb[112].mxu1  ;;  %v2728_v35 = vsel %vm2600_vm15, %v2463_v29, %v2664_v31  ;;  %v2783_v36 = vpack.c.bf16 %v2727_v32, %v2725_v20 }
 0x58f   : > { %v2467_v37 = vadd.f32 %v2466_v33, %v5167_v21  ;;  %v2468_v38 = vpop.f32.mrb[113].mxu1  ;;  %v2784_v39 = vpack.c.bf16 %v2728_v35, %v2726_v34 }
 0x590   : > { %v2469_v51 = vadd.f32 %v2468_v38, %v5175_v25  ;;  %v2470_v40 = vpop.f32.mrb[114].mxu1 }
 0x591   : > { %v2665_v41 = vmul.f32 0.01, %v2467_v37  ;;  %v2471_v42 = vadd.f32 %v2470_v40, %v5167_v21  ;;  %v2472_v43 = vpop.f32.mrb[115].mxu1  ;;  %3071 = vmatprep.mubr.bf16.mxu0 %v2784_v39  ;;  %vm2601_vm0 = vcmp.ge.f32.partialorder %v2467_v37, 0.0 }
 0x592   : > { %v2666_v44 = vmul.f32 0.01, %v2469_v51  ;;  %v2473_v45 = vadd.f32 %v2472_v43, %v5175_v25  ;;  %3072 = vmatmul.mubr.bf16.gmra.mrb[108].mxu0 %v2783_v36  ;;  %vm2602_vm1 = vcmp.ge.f32.partialorder %v2469_v51, 0.0 }
 0x593   : > { %vm2603_vm2 = vcmp.ge.f32.partialorder %v2471_v42, 0.0  ;;  %v2667_v46 = vmul.f32 0.01, %v2471_v42  ;;  %v2729_v48 = vsel %vm2601_vm0, %v2467_v37, %v2665_v41 }
 0x594   : > { %vm2604_vm3 = vcmp.ge.f32.partialorder %v2473_v45, 0.0  ;;  %v2668_v47 = vmul.f32 0.01, %v2473_v45  ;;  %v2730_v16 = vsel %vm2602_vm1, %v2469_v51, %v2666_v44 }
 0x595   : > { %v2731_v49 = vsel %vm2603_vm2, %v2471_v42, %v2667_v46 }
 0x596   : > { %v2476_v50 = vpop.f32.mrb[116].mxu1  ;;  %v2732_v53 = vsel %vm2604_vm3, %v2473_v45, %v2668_v47  ;;  %v2785_v54 = vpack.c.bf16 %v2731_v49, %v2729_v48 }
 0x597   : > { %v2477_v55 = vadd.f32 %v2476_v50, %v5167_v21  ;;  %v2478_v56 = vpop.f32.mrb[117].mxu1  ;;  %v2786_v57 = vpack.c.bf16 %v2732_v53, %v2730_v16 }
 0x598   : > { %v2479_v58 = vadd.f32 %v2478_v56, %v5175_v25  ;;  %v2480_v59 = vpop.f32.mrb[118].mxu1 }
 0x599   : > { %v2669_v60 = vmul.f32 0.01, %v2477_v55  ;;  %v2481_v61 = vadd.f32 %v2480_v59, %v5167_v21  ;;  %v2482_v62 = vpop.f32.mrb[119].mxu1  ;;  %3081 = vmatprep.mubr.bf16.mxu0 %v2786_v57  ;;  %vm2605_vm4 = vcmp.ge.f32.partialorder %v2477_v55, 0.0 }
 0x59a   : > { %v2670_v63 = vmul.f32 0.01, %v2479_v58  ;;  %v2483_v0 = vadd.f32 %v2482_v62, %v5175_v25  ;;  %3082 = vmatmul.mubr.bf16.gmra.mrb[112].mxu0 %v2785_v54  ;;  %vm2606_vm5 = vcmp.ge.f32.partialorder %v2479_v58, 0.0 }
 0x59b   : > { %vm2607_vm6 = vcmp.ge.f32.partialorder %v2481_v61, 0.0  ;;  %v2671_v1 = vmul.f32 0.01, %v2481_v61  ;;  %v2733_v3 = vsel %vm2605_vm4, %v2477_v55, %v2669_v60 }
 0x59c   : > { %vm2608_vm7 = vcmp.ge.f32.partialorder %v2483_v0, 0.0  ;;  %v2672_v2 = vmul.f32 0.01, %v2483_v0  ;;  %v2734_v7 = vsel %vm2606_vm5, %v2479_v58, %v2670_v63 }
 0x59d   : > { %v2735_v4 = vsel %vm2607_vm6, %v2481_v61, %v2671_v1 }
 0x59e   : > { %v2486_v5 = vpop.f32.mrb[120].mxu1  ;;  %v2736_v8 = vsel %vm2608_vm7, %v2483_v0, %v2672_v2  ;;  %v2787_v9 = vpack.c.bf16 %v2735_v4, %v2733_v3 }
 0x59f   : > { %v2487_v10 = vadd.f32 %v2486_v5, %v5167_v21  ;;  %v2488_v11 = vpop.f32.mrb[121].mxu1  ;;  %v2788_v12 = vpack.c.bf16 %v2736_v8, %v2734_v7 }
 0x5a0   : > { %v2489_v13 = vadd.f32 %v2488_v11, %v5175_v25  ;;  %v2490_v14 = vpop.f32.mrb[122].mxu1 }
 0x5a1   : > { %v2673_v22 = vmul.f32 0.01, %v2487_v10  ;;  %v2491_v15 = vadd.f32 %v2490_v14, %v5167_v21  ;;  %v2492_v23 = vpop.f32.mrb[123].mxu1  ;;  %3091 = vmatprep.mubr.bf16.mxu0 %v2788_v12  ;;  %vm2609_vm8 = vcmp.ge.f32.partialorder %v2487_v10, 0.0 }
 0x5a2   : > { %v2674_v18 = vmul.f32 0.01, %v2489_v13  ;;  %v2493_v19 = vadd.f32 %v2492_v23, %v5175_v25  ;;  %3092 = vmatmul.mubr.bf16.gmra.mrb[116].mxu0 %v2787_v9  ;;  %vm2610_vm9 = vcmp.ge.f32.partialorder %v2489_v13, 0.0 }
 0x5a3   : > { %vm2611_vm10 = vcmp.ge.f32.partialorder %v2491_v15, 0.0  ;;  %v2675_v6 = vmul.f32 0.01, %v2491_v15  ;;  %v2737_v27 = vsel %vm2609_vm8, %v2487_v10, %v2673_v22 }
 0x5a4   : > { %vm2612_vm11 = vcmp.ge.f32.partialorder %v2493_v19, 0.0  ;;  %v2676_v26 = vmul.f32 0.01, %v2493_v19  ;;  %v2738_v30 = vsel %vm2610_vm9, %v2489_v13, %v2674_v18 }
 0x5a5   : > { %v2739_v28 = vsel %vm2611_vm10, %v2491_v15, %v2675_v6 }
 0x5a6   : > { %v2496_v29 = vpop.f32.mrb[124].mxu1  ;;  %v2740_v31 = vsel %vm2612_vm11, %v2493_v19, %v2676_v26  ;;  %v2789_v20 = vpack.c.bf16 %v2739_v28, %v2737_v27 }
 0x5a7   : > { %v2497_v32 = vadd.f32 %v2496_v29, %v5167_v21  ;;  %v2498_v33 = vpop.f32.mrb[125].mxu1  ;;  %v2790_v34 = vpack.c.bf16 %v2740_v31, %v2738_v30 }
 0x5a8   : > { %v2499_v35 = vadd.f32 %v2498_v33, %v5175_v25  ;;  %v2500_v36 = vpop.f32.mrb[126].mxu1 }
 0x5a9   : > { %v2677_v37 = vmul.f32 0.01, %v2497_v32  ;;  %v2501_v38 = vadd.f32 %v2500_v36, %v5167_v21  ;;  %v2502_v39 = vpop.f32.mrb[127].mxu1  ;;  %3101 = vmatprep.mubr.bf16.mxu0 %v2790_v34  ;;  %vm2613_vm12 = vcmp.ge.f32.partialorder %v2497_v32, 0.0 }
 0x5aa   : > { %v2678_v51 = vmul.f32 0.01, %v2499_v35  ;;  %v2503_v40 = vadd.f32 %v2502_v39, %v5175_v25  ;;  %3102 = vmatmul.mubr.bf16.gmra.mrb[120].mxu0 %v2789_v20  ;;  %vm2614_vm13 = vcmp.ge.f32.partialorder %v2499_v35, 0.0 }
 0x5ab   : > { %vm2615_vm14 = vcmp.ge.f32.partialorder %v2501_v38, 0.0  ;;  %v2679_v41 = vmul.f32 0.01, %v2501_v38  ;;  %v2741_v43 = vsel %vm2613_vm12, %v2497_v32, %v2677_v37 }
 0x5ac   : > { %vm2616_vm15 = vcmp.ge.f32.partialorder %v2503_v40, 0.0  ;;  %v2680_v42 = vmul.f32 0.01, %v2503_v40  ;;  %v2742_v46 = vsel %vm2614_vm13, %v2499_v35, %v2678_v51 }
 0x5ad   : > { %v2743_v44 = vsel %vm2615_vm14, %v2501_v38, %v2679_v41 }
 0x5ae   : > { %v2506_v45 = vpop.f32.mrb[128].mxu1  ;;  %v2744_v47 = vsel %vm2616_vm15, %v2503_v40, %v2680_v42  ;;  %v2791_v48 = vpack.c.bf16 %v2743_v44, %v2741_v43 }
 0x5af   : > { %v2507_v49 = vadd.f32 %v2506_v45, %v5167_v21  ;;  %v2508_v50 = vpop.f32.mrb[129].mxu1  ;;  %v2792_v16 = vpack.c.bf16 %v2744_v47, %v2742_v46 }
 0x5b0   : > { %v2509_v53 = vadd.f32 %v2508_v50, %v5175_v25  ;;  %v2510_v54 = vpop.f32.mrb[130].mxu1 }
 0x5b1   : > { %v2681_v55 = vmul.f32 0.01, %v2507_v49  ;;  %v2511_v56 = vadd.f32 %v2510_v54, %v5167_v21  ;;  %v2512_v57 = vpop.f32.mrb[131].mxu1  ;;  %3111 = vmatprep.mubr.bf16.mxu0 %v2792_v16  ;;  %vm2617_vm0 = vcmp.ge.f32.partialorder %v2507_v49, 0.0 }
 0x5b2   : > { %v2682_v58 = vmul.f32 0.01, %v2509_v53  ;;  %v2513_v59 = vadd.f32 %v2512_v57, %v5175_v25  ;;  %3112 = vmatmul.mubr.bf16.gmra.mrb[124].mxu0 %v2791_v48  ;;  %vm2618_vm1 = vcmp.ge.f32.partialorder %v2509_v53, 0.0 }
 0x5b3   : > { %vm2619_vm2 = vcmp.ge.f32.partialorder %v2511_v56, 0.0  ;;  %v2683_v60 = vmul.f32 0.01, %v2511_v56  ;;  %v2745_v62 = vsel %vm2617_vm0, %v2507_v49, %v2681_v55 }
 0x5b4   : > { %vm2620_vm3 = vcmp.ge.f32.partialorder %v2513_v59, 0.0  ;;  %v2684_v61 = vmul.f32 0.01, %v2513_v59  ;;  %v2746_v1 = vsel %vm2618_vm1, %v2509_v53, %v2682_v58 }
 0x5b5   : > { %v2747_v63 = vsel %vm2619_vm2, %v2511_v56, %v2683_v60 }
 0x5b6   : > { %v2516_v0 = vpop.f32.mrb[132].mxu1  ;;  %v2748_v2 = vsel %vm2620_vm3, %v2513_v59, %v2684_v61  ;;  %v2793_v3 = vpack.c.bf16 %v2747_v63, %v2745_v62 }
 0x5b7   : > { %v2517_v4 = vadd.f32 %v2516_v0, %v5167_v21  ;;  %v2518_v5 = vpop.f32.mrb[133].mxu1  ;;  %v2794_v7 = vpack.c.bf16 %v2748_v2, %v2746_v1 }
 0x5b8   : > { %v2519_v8 = vadd.f32 %v2518_v5, %v5175_v25  ;;  %v2520_v9 = vpop.f32.mrb[134].mxu1 }
 0x5b9   : > { %v2685_v10 = vmul.f32 0.01, %v2517_v4  ;;  %v2521_v11 = vadd.f32 %v2520_v9, %v5167_v21  ;;  %v2522_v12 = vpop.f32.mrb[135].mxu1  ;;  %3121 = vmatprep.mubr.bf16.mxu0 %v2794_v7  ;;  %vm2621_vm4 = vcmp.ge.f32.partialorder %v2517_v4, 0.0 }
 0x5ba   : > { %v2686_v13 = vmul.f32 0.01, %v2519_v8  ;;  %v2523_v14 = vadd.f32 %v2522_v12, %v5175_v25  ;;  %3122 = vmatmul.mubr.bf16.gmra.mrb[128].mxu0 %v2793_v3  ;;  %vm2622_vm5 = vcmp.ge.f32.partialorder %v2519_v8, 0.0 }
 0x5bb   : > { %vm2623_vm6 = vcmp.ge.f32.partialorder %v2521_v11, 0.0  ;;  %v2687_v22 = vmul.f32 0.01, %v2521_v11  ;;  %v2749_v23 = vsel %vm2621_vm4, %v2517_v4, %v2685_v10 }
 0x5bc   : > { %vm2624_vm7 = vcmp.ge.f32.partialorder %v2523_v14, 0.0  ;;  %v2688_v15 = vmul.f32 0.01, %v2523_v14  ;;  %v2750_v6 = vsel %vm2622_vm5, %v2519_v8, %v2686_v13 }
 0x5bd   : > { %v2751_v18 = vsel %vm2623_vm6, %v2521_v11, %v2687_v22 }
 0x5be   : > { %v2526_v19 = vpop.f32.mrb[136].mxu1  ;;  %v2752_v26 = vsel %vm2624_vm7, %v2523_v14, %v2688_v15  ;;  %v2795_v27 = vpack.c.bf16 %v2751_v18, %v2749_v23 }
 0x5bf   : > { %v2527_v28 = vadd.f32 %v2526_v19, %v5167_v21  ;;  %v2528_v29 = vpop.f32.mrb[137].mxu1  ;;  %v2796_v30 = vpack.c.bf16 %v2752_v26, %v2750_v6 }
 0x5c0   : > { %v2529_v31 = vadd.f32 %v2528_v29, %v5175_v25  ;;  %v2530_v20 = vpop.f32.mrb[138].mxu1 }
 0x5c1   : > { %v2689_v32 = vmul.f32 0.01, %v2527_v28  ;;  %v2531_v33 = vadd.f32 %v2530_v20, %v5167_v21  ;;  %v2532_v34 = vpop.f32.mrb[139].mxu1  ;;  %3131 = vmatprep.mubr.bf16.mxu0 %v2796_v30  ;;  %vm2625_vm8 = vcmp.ge.f32.partialorder %v2527_v28, 0.0 }
 0x5c2   : > { %v2690_v35 = vmul.f32 0.01, %v2529_v31  ;;  %v2533_v36 = vadd.f32 %v2532_v34, %v5175_v25  ;;  %3132 = vmatmul.mubr.bf16.gmra.mrb[132].mxu0 %v2795_v27  ;;  %vm2626_vm9 = vcmp.ge.f32.partialorder %v2529_v31, 0.0 }
 0x5c3   : > { %vm2627_vm10 = vcmp.ge.f32.partialorder %v2531_v33, 0.0  ;;  %v2691_v37 = vmul.f32 0.01, %v2531_v33  ;;  %v2753_v39 = vsel %vm2625_vm8, %v2527_v28, %v2689_v32 }
 0x5c4   : > { %vm2628_vm11 = vcmp.ge.f32.partialorder %v2533_v36, 0.0  ;;  %v2692_v38 = vmul.f32 0.01, %v2533_v36  ;;  %v2754_v41 = vsel %vm2626_vm9, %v2529_v31, %v2690_v35 }
 0x5c5   : > { %v2755_v51 = vsel %vm2627_vm10, %v2531_v33, %v2691_v37 }
 0x5c6   : > { %v2536_v40 = vpop.f32.mrb[140].mxu1  ;;  %v2756_v42 = vsel %vm2628_vm11, %v2533_v36, %v2692_v38  ;;  %v2797_v43 = vpack.c.bf16 %v2755_v51, %v2753_v39 }
 0x5c7   : > { %v2537_v44 = vadd.f32 %v2536_v40, %v5167_v21  ;;  %v2538_v45 = vpop.f32.mrb[141].mxu1  ;;  %v2798_v46 = vpack.c.bf16 %v2756_v42, %v2754_v41 }
 0x5c8   : > { %v2539_v47 = vadd.f32 %v2538_v45, %v5175_v25  ;;  %v2540_v48 = vpop.f32.mrb[142].mxu1 }
 0x5c9   : > { %v2693_v49 = vmul.f32 0.01, %v2537_v44  ;;  %v2541_v50 = vadd.f32 %v2540_v48, %v5167_v21  ;;  %v2542_v16 = vpop.f32.mrb[143].mxu1  ;;  %3141 = vmatprep.mubr.bf16.mxu0 %v2798_v46  ;;  %vm2629_vm12 = vcmp.ge.f32.partialorder %v2537_v44, 0.0 }
 0x5ca   : > { %v2694_v53 = vmul.f32 0.01, %v2539_v47  ;;  %v2543_v54 = vadd.f32 %v2542_v16, %v5175_v25  ;;  %3142 = vmatmul.mubr.bf16.gmra.mrb[136].mxu0 %v2797_v43  ;;  %vm2630_vm13 = vcmp.ge.f32.partialorder %v2539_v47, 0.0 }
 0x5cb   : > { %vm2631_vm14 = vcmp.ge.f32.partialorder %v2541_v50, 0.0  ;;  %v2695_v55 = vmul.f32 0.01, %v2541_v50  ;;  %v2757_v57 = vsel %vm2629_vm12, %v2537_v44, %v2693_v49 }
 0x5cc   : > { %vm2632_vm15 = vcmp.ge.f32.partialorder %v2543_v54, 0.0  ;;  %v2696_v56 = vmul.f32 0.01, %v2543_v54  ;;  %v2758_v60 = vsel %vm2630_vm13, %v2539_v47, %v2694_v53 }
 0x5cd   : > { %v2759_v58 = vsel %vm2631_vm14, %v2541_v50, %v2695_v55 }
 0x5ce   : > { %v2546_v59 = vpop.f32.mrb[144].mxu1  ;;  %v2760_v61 = vsel %vm2632_vm15, %v2543_v54, %v2696_v56  ;;  %v2799_v62 = vpack.c.bf16 %v2759_v58, %v2757_v57 }
 0x5cf   : > { %v2547_v63 = vadd.f32 %v2546_v59, %v5167_v21  ;;  %v2548_v0 = vpop.f32.mrb[145].mxu1  ;;  %v2800_v1 = vpack.c.bf16 %v2760_v61, %v2758_v60 }
 0x5d0   : > { %v2549_v2 = vadd.f32 %v2548_v0, %v5175_v25  ;;  %v2550_v3 = vpop.f32.mrb[146].mxu1 }
 0x5d1   : > { %v2697_v4 = vmul.f32 0.01, %v2547_v63  ;;  %v2551_v5 = vadd.f32 %v2550_v3, %v5167_v21  ;;  %v2552_v7 = vpop.f32.mrb[147].mxu1  ;;  %3151 = vmatprep.mubr.bf16.mxu0 %v2800_v1  ;;  %vm2633_vm0 = vcmp.ge.f32.partialorder %v2547_v63, 0.0 }
 0x5d2   : > { %v2698_v8 = vmul.f32 0.01, %v2549_v2  ;;  %v2553_v9 = vadd.f32 %v2552_v7, %v5175_v25  ;;  %3152 = vmatmul.mubr.bf16.gmra.mrb[140].mxu0 %v2799_v62  ;;  %vm2634_vm1 = vcmp.ge.f32.partialorder %v2549_v2, 0.0 }
 0x5d3   : > { %vm2635_vm2 = vcmp.ge.f32.partialorder %v2551_v5, 0.0  ;;  %v2699_v10 = vmul.f32 0.01, %v2551_v5  ;;  %v2761_v12 = vsel %vm2633_vm0, %v2547_v63, %v2697_v4 }
 0x5d4   : > { %vm2636_vm3 = vcmp.ge.f32.partialorder %v2553_v9, 0.0  ;;  %v2700_v11 = vmul.f32 0.01, %v2553_v9  ;;  %v2762_v22 = vsel %vm2634_vm1, %v2549_v2, %v2698_v8 }
 0x5d5   : > { %v2763_v13 = vsel %vm2635_vm2, %v2551_v5, %v2699_v10 }
 0x5d6   : > { %v2556_v14 = vpop.f32.mrb[148].mxu1  ;;  %v2764_v15 = vsel %vm2636_vm3, %v2553_v9, %v2700_v11  ;;  %v2801_v23 = vpack.c.bf16 %v2763_v13, %v2761_v12  ;;  %v2843_v12 = vsub.s32 5, %v4916_v17 }
 0x5d7   : > { %v2557_v18 = vadd.f32 %v2556_v14, %v5167_v21  ;;  %v2558_v19 = vpop.f32.mrb[149].mxu1  ;;  %v2802_v6 = vpack.c.bf16 %v2764_v15, %v2762_v22 }
 0x5d8   : > { %v2559_v26 = vadd.f32 %v2558_v19, %v5175_v25  ;;  %v2560_v27 = vpop.f32.mrb[150].mxu1  ;;  %v5246_v13 = vrot.slane %v5172_v24, %v2843_v12 }
 0x5d9   : > { %v2701_v28 = vmul.f32 0.01, %v2557_v18  ;;  %v2561_v29 = vadd.f32 %v2560_v27, %v5167_v21  ;;  %v2562_v30 = vpop.f32.mrb[151].mxu1  ;;  %3161 = vmatprep.mubr.bf16.mxu0 %v2802_v6  ;;  %vm2637_vm4 = vcmp.ge.f32.partialorder %v2557_v18, 0.0 }
 0x5da   : > { %v2702_v31 = vmul.f32 0.01, %v2559_v26  ;;  %v2563_v20 = vadd.f32 %v2562_v30, %v5175_v25  ;;  %3162 = vmatmul.mubr.bf16.gmra.mrb[144].mxu0 %v2801_v23  ;;  %vm2638_vm5 = vcmp.ge.f32.partialorder %v2559_v26, 0.0 }
 0x5db   : > { %vm2639_vm6 = vcmp.ge.f32.partialorder %v2561_v29, 0.0  ;;  %v2703_v32 = vmul.f32 0.01, %v2561_v29  ;;  %v2765_v34 = vsel %vm2637_vm4, %v2557_v18, %v2701_v28 }
 0x5dc   : > { %vm2640_vm7 = vcmp.ge.f32.partialorder %v2563_v20, 0.0  ;;  %v2704_v33 = vmul.f32 0.01, %v2563_v20  ;;  %v2766_v37 = vsel %vm2638_vm5, %v2559_v26, %v2702_v31 }
 0x5dd   : > { %v2767_v35 = vsel %vm2639_vm6, %v2561_v29, %v2703_v32 }
 0x5de   : > { %v2566_v36 = vpop.f32.mrb[152].mxu1  ;;  %v2768_v38 = vsel %vm2640_vm7, %v2563_v20, %v2704_v33  ;;  %v2803_v39 = vpack.c.bf16 %v2767_v35, %v2765_v34 }
 0x5df   : > { %v2567_v51 = vadd.f32 %v2566_v36, %v5167_v21  ;;  %v2568_v40 = vpop.f32.mrb[153].mxu1  ;;  %v2804_v41 = vpack.c.bf16 %v2768_v38, %v2766_v37 }
 0x5e0   : > { %v2569_v42 = vadd.f32 %v2568_v40, %v5175_v25  ;;  %v2570_v43 = vpop.f32.mrb[154].mxu1 }
 0x5e1   : > { %v2705_v44 = vmul.f32 0.01, %v2567_v51  ;;  %v2571_v45 = vadd.f32 %v2570_v43, %v5167_v21  ;;  %v2572_v46 = vpop.f32.mrb[155].mxu1  ;;  %3171 = vmatprep.mubr.bf16.mxu0 %v2804_v41  ;;  %vm2641_vm8 = vcmp.ge.f32.partialorder %v2567_v51, 0.0 }
 0x5e2   : > { %v2706_v47 = vmul.f32 0.01, %v2569_v42  ;;  %v2573_v48 = vadd.f32 %v2572_v46, %v5175_v25  ;;  %3172 = vmatmul.mubr.bf16.gmra.mrb[148].mxu0 %v2803_v39  ;;  %vm2642_vm9 = vcmp.ge.f32.partialorder %v2569_v42, 0.0 }
 0x5e3   : > { %vm2643_vm10 = vcmp.ge.f32.partialorder %v2571_v45, 0.0  ;;  %v2707_v49 = vmul.f32 0.01, %v2571_v45  ;;  %v2769_v16 = vsel %vm2641_vm8, %v2567_v51, %v2705_v44 }
 0x5e4   : > { %vm2644_vm11 = vcmp.ge.f32.partialorder %v2573_v48, 0.0  ;;  %v2708_v50 = vmul.f32 0.01, %v2573_v48  ;;  %v2770_v56 = vsel %vm2642_vm9, %v2569_v42, %v2706_v47 }
 0x5e5   : > { %v2771_v53 = vsel %vm2643_vm10, %v2571_v45, %v2707_v49 }
 0x5e6   : > { %v2805_v54 = vpack.c.bf16 %v2771_v53, %v2769_v16  ;;  %v2576_v55 = vpop.f32.mrb[156].mxu1  ;;  %v2772_v57 = vsel %vm2644_vm11, %v2573_v48, %v2708_v50 }
 0x5e7   : > { %v2577_v58 = vadd.f32 %v2576_v55, %v5167_v21  ;;  %v2578_v59 = vpop.f32.mrb[157].mxu1  ;;  %v2806_v60 = vpack.c.bf16 %v2772_v57, %v2770_v56 }
 0x5e8   : > { %v2579_v61 = vadd.f32 %v2578_v59, %v5175_v25  ;;  %v2580_v62 = vpop.f32.mrb[158].mxu1 }
 0x5e9   : > { %v2709_v63 = vmul.f32 0.01, %v2577_v58  ;;  %v2581_v0 = vadd.f32 %v2580_v62, %v5167_v21  ;;  %v2582_v1 = vpop.f32.mrb[159].mxu1  ;;  %3181 = vmatprep.mubr.bf16.mxu1 %v2806_v60  ;;  %vm2645_vm12 = vcmp.ge.f32.partialorder %v2577_v58, 0.0 }
 0x5ea   : > { %v2710_v2 = vmul.f32 0.01, %v2579_v61  ;;  %v2583_v3 = vadd.f32 %v2582_v1, %v5175_v25  ;;  %3182 = vmatmul.mubr.bf16.vlgmr.msra.gmra.mrb[160].mxu1 %v2805_v54  ;;  %vm2646_vm13 = vcmp.ge.f32.partialorder %v2579_v61, 0.0  ;;  %v5243_v25 = vrot.slane %v5164_v52, %v2843_v12 }
 0x5eb   : > { %vm2647_vm14 = vcmp.ge.f32.partialorder %v2581_v0, 0.0  ;;  %v2711_v4 = vmul.f32 0.01, %v2581_v0  ;;  %v2773_v7 = vsel %vm2645_vm12, %v2577_v58, %v2709_v63 }
 0x5ec   : > { %vm2648_vm15 = vcmp.ge.f32.partialorder %v2583_v3, 0.0  ;;  %v2712_v5 = vmul.f32 0.01, %v2583_v3  ;;  %v2774_v9 = vsel %vm2646_vm13, %v2579_v61, %v2710_v2 }
 0x5ed   : > { %v2775_v8 = vsel %vm2647_vm14, %v2581_v0, %v2711_v4 }
 0x5ee   : > { %v2776_v10 = vsel %vm2648_vm15, %v2583_v3, %v2712_v5  ;;  %v2807_v11 = vpack.c.bf16 %v2775_v8, %v2773_v7 }
 0x5ef   : > { %v2808_v21 = vpack.c.bf16 %v2776_v10, %v2774_v9 }
 0x5f1   : > { %3191 = vmatprep.mubr.bf16.mxu1 %v2808_v21 }
 0x5f2   : > { %3192 = vmatmul.mubr.bf16.gmra.mrb[164].mxu1 %v2807_v11 }
 0x64d   : > { %v3043_v14 = vpop.f32.mrb[96].mxu0 }
 0x64e   : > { %v3044_v22 = vadd.f32 %v3043_v14, %v5243_v25  ;;  %v3045_v15 = vpop.f32.mrb[97].mxu0 }
 0x64f   : > { %v3046_v23 = vadd.f32 %v3045_v15, %v5246_v13  ;;  %v3047_v18 = vpop.f32.mrb[98].mxu0 }
 0x650   : > { %3202 = vst [vmem:[%s5261_s26] sm:$0xff] %v3044_v22  ;;  %v3048_v17 = vadd.f32 %v3047_v18, %v5243_v25  ;;  %v3049_v52 = vpop.f32.mrb[99].mxu0 }
 0x651   : > { %3203 = vst [vmem:[%s5261_s26 + $0x8] sm:$0xff] %v3046_v23  ;;  %v3050_v24 = vadd.f32 %v3049_v52, %v5246_v13 }
 0x652   : > { %4390 = shalt.err (!%p4387_p8)
}
 0x653   : > { %s4391_s28 = scalar_lea.hbm %s5255_s17, 4096  ;;  %s4395_s22 = scalar_lea.hbm %s5473_s9, 8192 }
 0x654   : > { %p4392_p7 = scmp.ne.s32.totalorder %s5255_s17, %s4391_s28  ;;  %p4396_p3 = scmp.lt.u32.totalorder %s5255_s17, %s5473_s9 }
 0x655   : > { %p4397_p0 = scmp.lt.u32.totalorder %s4395_s22, %s4391_s28  ;;  %p4399_p6 = scmp.lt.u32.totalorder %s4391_s28, %s5255_s17 }
 0x656   : > { %p4393_p9 = pnand %p4392_p7, %p5508_p5 }
 0x657   : > { %p4398_p2 = por %p4397_p0, %p4396_p3 }
 0x658   : > { %p4394_p4 = pneg %p4393_p9 }
 0x659   : > { %p4400_p10 = por %p4399_p6, %p4398_p2 }
 0x65b   : > { %p4401_p1 = pnand %p4400_p10, %p4394_p4 }
 0x65d   : > { %4404 = shalt.err (!%p4401_p1)
}
 0x65e   : > { %s4504_s21 = smov 128   ;;  %s4505_s13 = smov 8   ;;  %3204 = vst [vmem:[%s5261_s26 + $0x10] sm:$0xff] %v3048_v17  ;;  %3205 = vst [vmem:[%s5261_s26 + $0x18] sm:$0xff] %v3050_v24  ;;  %v3053_v19 = vpop.f32.mrb[100].mxu0 }
 0x65f   : > { %3928 = dma.vmem_to_hbm [thread:$0]  (%p5508_p5), %s5257_s19, 4096, %s5255_s17, %s3272_s18, %s4504_s21, %s4504_s21, %s4505_s13   ;;  %v3054_v6 = vadd.f32 %v3053_v19, %v5243_v25  ;;  %v3055_v26 = vpop.f32.mrb[101].mxu0 }
 0x660   : > { %v3056_v27 = vadd.f32 %v3055_v26, %v5246_v13  ;;  %v3057_v28 = vpop.f32.mrb[102].mxu0  ;;  %s3611_s19 = sshll.u32 %s4580_s15, 13  ;;  %s3286_s17 = sshll.u32 %s5261_s26, 4  ;;  %s5416_s17 = int_to_ptr.vmem [resolvable:$true] %s3286_s17 }
 0x661   : > { %3206 = vst [vmem:[%s5261_s26 + $0x20] sm:$0xff] %v3054_v6  ;;  %v3058_v29 = vadd.f32 %v3057_v28, %v5243_v25  ;;  %v3059_v30 = vpop.f32.mrb[103].mxu0  ;;  %s5509_s28 = sld [smem:[#allocation24_spill]]  ;;  %s3267_s15 = scalar_lea.sflag [#allocation4], %s4828_s1 }
 0x662   : > { %3207 = vst [vmem:[%s5261_s26 + $0x28] sm:$0xff] %v3056_v27  ;;  %v3060_v31 = vadd.f32 %v3059_v30, %v5246_v13  ;;  %v3063_v20 = vpop.f32.mrb[104].mxu0  ;;  %s4405_s16 = scalar_lea.vmem %s5416_s17, 8192  ;;  %s4506_s22 = smov [#allocation14]  }
 0x663   : > { %3208 = vst [vmem:[%s5261_s26 + $0x30] sm:$0xff] %v3058_v29  ;;  %v3064_v32 = vadd.f32 %v3063_v20, %v5243_v25  ;;  %v3065_v33 = vpop.f32.mrb[105].mxu0  ;;  %p4406_p11 = scmp.ne.s32.totalorder %s5416_s17, %s4405_s16  ;;  %s4409_s8 = sshll.u32 %s4506_s22, 4  ;;  %s4410_s8 = int_to_ptr.vmem [resolvable:$false] %s4409_s8 }
 0x664   : > { %3209 = vst [vmem:[%s5261_s26 + $0x38] sm:$0xff] %v3060_v31  ;;  %v3066_v34 = vadd.f32 %v3065_v33, %v5246_v13  ;;  %v3067_v35 = vpop.f32.mrb[106].mxu0  ;;  %s4411_s24 = scalar_lea.vmem %s4410_s8, 16384  ;;  %p4412_p8 = scmp.lt.s32.totalorder %s5416_s17, %s4410_s8 }
 0x665   : > { %3210 = vst [vmem:[%s5261_s26 + $0x40] sm:$0xff] %v3064_v32  ;;  %v3068_v36 = vadd.f32 %v3067_v35, %v5243_v25  ;;  %v3069_v37 = vpop.f32.mrb[107].mxu0  ;;  %p4407_p12 = pnand %p4406_p11, %p5508_p5  ;;  %p4413_p7 = scmp.lt.s32.totalorder %s4411_s24, %s4405_s16 }
 0x666   : > { %3211 = vst [vmem:[%s5261_s26 + $0x48] sm:$0xff] %v3066_v34  ;;  %v3070_v38 = vadd.f32 %v3069_v37, %v5246_v13  ;;  %v3073_v39 = vpop.f32.mrb[108].mxu0 }
 0x667   : > { %3212 = vst [vmem:[%s5261_s26 + $0x50] sm:$0xff] %v3068_v36  ;;  %v3074_v51 = vadd.f32 %v3073_v39, %v5243_v25  ;;  %v3075_v40 = vpop.f32.mrb[109].mxu0  ;;  %s5414_s20 = scalar_lea.hbm %s5509_s28, %s3611_s19  ;;  %p4408_p13 = pneg %p4407_p12 }
 0x668   : > { %3213 = vst [vmem:[%s5261_s26 + $0x58] sm:$0xff] %v3070_v38  ;;  %v3076_v41 = vadd.f32 %v3075_v40, %v5246_v13  ;;  %v3077_v42 = vpop.f32.mrb[110].mxu0  ;;  %p4414_p9 = por %p4413_p7, %p4412_p8 }
 0x669   : > { %3214 = vst [vmem:[%s5261_s26 + $0x60] sm:$0xff] %v3074_v51  ;;  %v3078_v43 = vadd.f32 %v3077_v42, %v5243_v25  ;;  %v3079_v44 = vpop.f32.mrb[111].mxu0 }
 0x66a   : > { %3215 = vst [vmem:[%s5261_s26 + $0x68] sm:$0xff] %v3076_v41  ;;  %v3080_v45 = vadd.f32 %v3079_v44, %v5246_v13  ;;  %p4415_p4 = pnand %p4414_p9, %p4408_p13 }
 0x66b   : > { %3216 = vst [vmem:[%s5261_s26 + $0x70] sm:$0xff] %v3078_v43 }
 0x66c   : > { %3217 = vst [vmem:[%s5261_s26 + $0x78] sm:$0xff] %v3080_v45 }
 0x66d   : > { %v3083_v46 = vpop.f32.mrb[112].mxu0 }
 0x66e   : > { %v3084_v47 = vadd.f32 %v3083_v46, %v5243_v25  ;;  %v3085_v48 = vpop.f32.mrb[113].mxu0 }
 0x66f   : > { %v3086_v49 = vadd.f32 %v3085_v48, %v5246_v13  ;;  %v3087_v50 = vpop.f32.mrb[114].mxu0 }
 0x670   : > { %3218 = vst [vmem:[%s5261_s26 + $0x80] sm:$0xff] %v3084_v47  ;;  %v3088_v16 = vadd.f32 %v3087_v50, %v5243_v25  ;;  %v3089_v53 = vpop.f32.mrb[115].mxu0 }
 0x671   : > { %3219 = vst [vmem:[%s5261_s26 + $0x88] sm:$0xff] %v3086_v49  ;;  %v3090_v54 = vadd.f32 %v3089_v53, %v5246_v13 }
 0x672   : > { %3220 = vst [vmem:[%s5261_s26 + $0x90] sm:$0xff] %v3088_v16 }
 0x673   : > { %3221 = vst [vmem:[%s5261_s26 + $0x98] sm:$0xff] %v3090_v54 }
 0x675   : > { %v3093_v55 = vpop.f32.mrb[116].mxu0 }
 0x676   : > { %v3094_v56 = vadd.f32 %v3093_v55, %v5243_v25  ;;  %v3095_v57 = vpop.f32.mrb[117].mxu0 }
 0x677   : > { %v3096_v58 = vadd.f32 %v3095_v57, %v5246_v13  ;;  %v3097_v59 = vpop.f32.mrb[118].mxu0 }
 0x678   : > { %3222 = vst [vmem:[%s5261_s26 + $0xa0] sm:$0xff] %v3094_v56  ;;  %v3098_v60 = vadd.f32 %v3097_v59, %v5243_v25  ;;  %v3099_v61 = vpop.f32.mrb[119].mxu0 }
 0x679   : > { %3223 = vst [vmem:[%s5261_s26 + $0xa8] sm:$0xff] %v3096_v58  ;;  %v3100_v62 = vadd.f32 %v3099_v61, %v5246_v13 }
 0x67a   : > { %3224 = vst [vmem:[%s5261_s26 + $0xb0] sm:$0xff] %v3098_v60 }
 0x67b   : > { %3225 = vst [vmem:[%s5261_s26 + $0xb8] sm:$0xff] %v3100_v62 }
 0x67d   : > { %v3103_v63 = vpop.f32.mrb[120].mxu0 }
 0x67e   : > { %v3104_v0 = vadd.f32 %v3103_v63, %v5243_v25  ;;  %v3105_v1 = vpop.f32.mrb[121].mxu0 }
 0x67f   : > { %v3106_v2 = vadd.f32 %v3105_v1, %v5246_v13  ;;  %v3107_v3 = vpop.f32.mrb[122].mxu0 }
 0x680   : > { %3226 = vst [vmem:[%s5261_s26 + $0xc0] sm:$0xff] %v3104_v0  ;;  %v3108_v4 = vadd.f32 %v3107_v3, %v5243_v25  ;;  %v3109_v5 = vpop.f32.mrb[123].mxu0 }
 0x681   : > { %3227 = vst [vmem:[%s5261_s26 + $0xc8] sm:$0xff] %v3106_v2  ;;  %v3110_v7 = vadd.f32 %v3109_v5, %v5246_v13 }
 0x682   : > { %3228 = vst [vmem:[%s5261_s26 + $0xd0] sm:$0xff] %v3108_v4 }
 0x683   : > { %3229 = vst [vmem:[%s5261_s26 + $0xd8] sm:$0xff] %v3110_v7 }
 0x685   : > { %v3113_v8 = vpop.f32.mrb[124].mxu0 }
 0x686   : > { %v3114_v9 = vadd.f32 %v3113_v8, %v5243_v25  ;;  %v3115_v10 = vpop.f32.mrb[125].mxu0 }
 0x687   : > { %v3116_v11 = vadd.f32 %v3115_v10, %v5246_v13  ;;  %v3117_v21 = vpop.f32.mrb[126].mxu0 }
 0x688   : > { %3230 = vst [vmem:[%s5261_s26 + $0xe0] sm:$0xff] %v3114_v9  ;;  %v3118_v12 = vadd.f32 %v3117_v21, %v5243_v25  ;;  %v3119_v14 = vpop.f32.mrb[127].mxu0 }
 0x689   : > { %3231 = vst [vmem:[%s5261_s26 + $0xe8] sm:$0xff] %v3116_v11  ;;  %v3120_v22 = vadd.f32 %v3119_v14, %v5246_v13 }
 0x68a   : > { %3232 = vst [vmem:[%s5261_s26 + $0xf0] sm:$0xff] %v3118_v12 }
 0x68b   : > { %3233 = vst [vmem:[%s5261_s26 + $0xf8] sm:$0xff] %v3120_v22 }
 0x68d   : > { %v3123_v15 = vpop.f32.mrb[128].mxu0 }
 0x68e   : > { %v3124_v23 = vadd.f32 %v3123_v15, %v5243_v25  ;;  %v3125_v18 = vpop.f32.mrb[129].mxu0 }
 0x68f   : > { %v3126_v17 = vadd.f32 %v3125_v18, %v5246_v13  ;;  %v3127_v52 = vpop.f32.mrb[130].mxu0 }
 0x690   : > { %3234 = vst [vmem:[%s5261_s26 + $0x100] sm:$0xff] %v3124_v23  ;;  %v3128_v24 = vadd.f32 %v3127_v52, %v5243_v25  ;;  %v3129_v19 = vpop.f32.mrb[131].mxu0 }
 0x691   : > { %3235 = vst [vmem:[%s5261_s26 + $0x108] sm:$0xff] %v3126_v17  ;;  %v3130_v6 = vadd.f32 %v3129_v19, %v5246_v13 }
 0x692   : > { %3236 = vst [vmem:[%s5261_s26 + $0x110] sm:$0xff] %v3128_v24 }
 0x693   : > { %3237 = vst [vmem:[%s5261_s26 + $0x118] sm:$0xff] %v3130_v6 }
 0x695   : > { %v3133_v26 = vpop.f32.mrb[132].mxu0 }
 0x696   : > { %v3134_v27 = vadd.f32 %v3133_v26, %v5243_v25  ;;  %v3135_v28 = vpop.f32.mrb[133].mxu0 }
 0x697   : > { %v3136_v29 = vadd.f32 %v3135_v28, %v5246_v13  ;;  %v3137_v30 = vpop.f32.mrb[134].mxu0 }
 0x698   : > { %3238 = vst [vmem:[%s5261_s26 + $0x120] sm:$0xff] %v3134_v27  ;;  %v3138_v31 = vadd.f32 %v3137_v30, %v5243_v25  ;;  %v3139_v20 = vpop.f32.mrb[135].mxu0 }
 0x699   : > { %3239 = vst [vmem:[%s5261_s26 + $0x128] sm:$0xff] %v3136_v29  ;;  %v3140_v32 = vadd.f32 %v3139_v20, %v5246_v13 }
 0x69a   : > { %3240 = vst [vmem:[%s5261_s26 + $0x130] sm:$0xff] %v3138_v31 }
 0x69b   : > { %3241 = vst [vmem:[%s5261_s26 + $0x138] sm:$0xff] %v3140_v32 }
 0x69d   : > { %v3143_v33 = vpop.f32.mrb[136].mxu0 }
 0x69e   : > { %v3144_v34 = vadd.f32 %v3143_v33, %v5243_v25  ;;  %v3145_v35 = vpop.f32.mrb[137].mxu0 }
 0x69f   : > { %v3146_v36 = vadd.f32 %v3145_v35, %v5246_v13  ;;  %v3147_v37 = vpop.f32.mrb[138].mxu0 }
 0x6a0   : > { %3242 = vst [vmem:[%s5261_s26 + $0x140] sm:$0xff] %v3144_v34  ;;  %v3148_v38 = vadd.f32 %v3147_v37, %v5243_v25  ;;  %v3149_v39 = vpop.f32.mrb[139].mxu0 }
 0x6a1   : > { %3243 = vst [vmem:[%s5261_s26 + $0x148] sm:$0xff] %v3146_v36  ;;  %v3150_v51 = vadd.f32 %v3149_v39, %v5246_v13 }
 0x6a2   : > { %3244 = vst [vmem:[%s5261_s26 + $0x150] sm:$0xff] %v3148_v38 }
 0x6a3   : > { %3245 = vst [vmem:[%s5261_s26 + $0x158] sm:$0xff] %v3150_v51 }
 0x6a5   : > { %v3153_v40 = vpop.f32.mrb[140].mxu0 }
 0x6a6   : > { %v3154_v41 = vadd.f32 %v3153_v40, %v5243_v25  ;;  %v3155_v42 = vpop.f32.mrb[141].mxu0 }
 0x6a7   : > { %v3156_v43 = vadd.f32 %v3155_v42, %v5246_v13  ;;  %v3157_v44 = vpop.f32.mrb[142].mxu0 }
 0x6a8   : > { %3246 = vst [vmem:[%s5261_s26 + $0x160] sm:$0xff] %v3154_v41  ;;  %v3158_v45 = vadd.f32 %v3157_v44, %v5243_v25  ;;  %v3159_v46 = vpop.f32.mrb[143].mxu0 }
 0x6a9   : > { %3247 = vst [vmem:[%s5261_s26 + $0x168] sm:$0xff] %v3156_v43  ;;  %v3160_v47 = vadd.f32 %v3159_v46, %v5246_v13 }
 0x6aa   : > { %3248 = vst [vmem:[%s5261_s26 + $0x170] sm:$0xff] %v3158_v45 }
 0x6ab   : > { %3249 = vst [vmem:[%s5261_s26 + $0x178] sm:$0xff] %v3160_v47 }
 0x6ad   : > { %v3163_v48 = vpop.f32.mrb[144].mxu0 }
 0x6ae   : > { %v3164_v49 = vadd.f32 %v3163_v48, %v5243_v25  ;;  %v3165_v50 = vpop.f32.mrb[145].mxu0 }
 0x6af   : > { %v3166_v16 = vadd.f32 %v3165_v50, %v5246_v13  ;;  %v3167_v53 = vpop.f32.mrb[146].mxu0 }
 0x6b0   : > { %3250 = vst [vmem:[%s5261_s26 + $0x180] sm:$0xff] %v3164_v49  ;;  %v3168_v54 = vadd.f32 %v3167_v53, %v5243_v25  ;;  %v3169_v55 = vpop.f32.mrb[147].mxu0 }
 0x6b1   : > { %3251 = vst [vmem:[%s5261_s26 + $0x188] sm:$0xff] %v3166_v16  ;;  %v3170_v56 = vadd.f32 %v3169_v55, %v5246_v13 }
 0x6b2   : > { %3252 = vst [vmem:[%s5261_s26 + $0x190] sm:$0xff] %v3168_v54 }
 0x6b3   : > { %3253 = vst [vmem:[%s5261_s26 + $0x198] sm:$0xff] %v3170_v56 }
 0x6b5   : > { %v3173_v57 = vpop.f32.mrb[148].mxu0 }
 0x6b6   : > { %v3174_v58 = vadd.f32 %v3173_v57, %v5243_v25  ;;  %v3175_v59 = vpop.f32.mrb[149].mxu0 }
 0x6b7   : > { %v3176_v60 = vadd.f32 %v3175_v59, %v5246_v13  ;;  %v3177_v61 = vpop.f32.mrb[150].mxu0 }
 0x6b8   : > { %3254 = vst [vmem:[%s5261_s26 + $0x1a0] sm:$0xff] %v3174_v58  ;;  %v3178_v62 = vadd.f32 %v3177_v61, %v5243_v25  ;;  %v3179_v63 = vpop.f32.mrb[151].mxu0 }
 0x6b9   : > { %3255 = vst [vmem:[%s5261_s26 + $0x1a8] sm:$0xff] %v3176_v60  ;;  %v3180_v0 = vadd.f32 %v3179_v63, %v5246_v13 }
 0x6ba   : > { %3256 = vst [vmem:[%s5261_s26 + $0x1b0] sm:$0xff] %v3178_v62 }
 0x6bb   : > { %3257 = vst [vmem:[%s5261_s26 + $0x1b8] sm:$0xff] %v3180_v0 }
 0x6bd   : > { %v3183_v1 = vpop.f32.mrb[160].mxu1 }
 0x6be   : > { %v3184_v2 = vadd.f32 %v3183_v1, %v5243_v25  ;;  %v3185_v3 = vpop.f32.mrb[161].mxu1 }
 0x6bf   : > { %v3186_v4 = vadd.f32 %v3185_v3, %v5246_v13  ;;  %v3187_v5 = vpop.f32.mrb[162].mxu1 }
 0x6c0   : > { %3258 = vst [vmem:[%s5261_s26 + $0x1c0] sm:$0xff] %v3184_v2  ;;  %v3188_v7 = vadd.f32 %v3187_v5, %v5243_v25  ;;  %v3189_v8 = vpop.f32.mrb[163].mxu1 }
 0x6c1   : > { %3259 = vst [vmem:[%s5261_s26 + $0x1c8] sm:$0xff] %v3186_v4  ;;  %v3190_v9 = vadd.f32 %v3189_v8, %v5246_v13 }
 0x6c2   : > { %3260 = vst [vmem:[%s5261_s26 + $0x1d0] sm:$0xff] %v3188_v7 }
 0x6c3   : > { %3261 = vst [vmem:[%s5261_s26 + $0x1d8] sm:$0xff] %v3190_v9 }
 0x6c5   : > { %v3193_v10 = vpop.f32.mrb[164].mxu1 }
 0x6c6   : > { %v3194_v11 = vadd.f32 %v3193_v10, %v5243_v25  ;;  %v3195_v21 = vpop.f32.mrb[165].mxu1 }
 0x6c7   : > { %v3196_v12 = vadd.f32 %v3195_v21, %v5246_v13  ;;  %v3197_v14 = vpop.f32.mrb[166].mxu1 }
 0x6c8   : > { %3262 = vst [vmem:[%s5261_s26 + $0x1e0] sm:$0xff] %v3194_v11  ;;  %v3198_v22 = vadd.f32 %v3197_v14, %v5243_v25  ;;  %v3199_v15 = vpop.f32.mrb[167].mxu1 }
 0x6c9   : > { %3263 = vst [vmem:[%s5261_s26 + $0x1e8] sm:$0xff] %v3196_v12  ;;  %v3200_v23 = vadd.f32 %v3199_v15, %v5246_v13 }
 0x6ca   : > { %3264 = vst [vmem:[%s5261_s26 + $0x1f0] sm:$0xff] %v3198_v22 }
 0x6cb   : > { %3265 = vst [vmem:[%s5261_s26 + $0x1f8] sm:$0xff] %v3200_v23 }
 0x6cc   : > { %4418 = shalt.err (!%p4415_p4)
}
 0x6cd   : > { %s4419_s26 = scalar_lea.hbm %s5414_s20, 8192  ;;  %s4423_s19 = scalar_lea.hbm %s5509_s28, 16384 }
 0x6ce   : > { %p4420_p3 = scmp.ne.s32.totalorder %s5414_s20, %s4419_s26  ;;  %p4424_p6 = scmp.lt.u32.totalorder %s5414_s20, %s5509_s28 }
 0x6cf   : > { %p4425_p10 = scmp.lt.u32.totalorder %s4423_s19, %s4419_s26  ;;  %p4427_p11 = scmp.lt.u32.totalorder %s4419_s26, %s5414_s20 }
 0x6d0   : > { %p4421_p0 = pnand %p4420_p3, %p5508_p5 }
 0x6d1   : > { %p4426_p1 = por %p4425_p10, %p4424_p6 }
 0x6d2   : > { %p4422_p2 = pneg %p4421_p0 }
 0x6d3   : > { %p4428_p12 = por %p4427_p11, %p4426_p1 }
 0x6d5   : > { %p4429_p13 = pnand %p4428_p12, %p4422_p2 }
 0x6d7   : > { %4432 = shalt.err (!%p4429_p13)
}
 0x6d8   : > { %s4507_s16 = smov 256   ;;  %s4508_s22 = smov 16  }
 0x6d9   : > { %3927 = dma.vmem_to_hbm [thread:$0]  (%p5508_p5), %s5416_s17, 8192, %s5414_s20, %s3267_s15, %s4507_s16, %s4507_s16, %s4508_s22  }
 0x6da PF: > { %s3317_s8 = sand.u32 1, %s4475_s30   ;;  %p5510_p8 = scmp.ne.s32.totalorder %s5499_s23, 0 }
 0x6db   : > { %p5511_p7 = scmp.ge.s32.totalorder %s4487_s12, 2  ;;  %s3318_s24 = scalar_lea.sflag [#allocation4], %s3317_s8 }
 0x6dd   : > { %p3955_p9 = pnand %p5511_p7, %p5510_p8 }
 0x6df   : > { %4466 = dma.done.wait (!%p3955_p9), %s3318_s24, 8192  }
 0x6e0   : > { %4468 = vsyncadd (!%p3955_p9), %s3318_s24, 4294959104  ;;  %s3327_s26 = scalar_lea.sflag [#allocation16], %s3317_s8 }
 0x6e1   : > { %4470 = dma.done.wait (!%p3955_p9), %s3327_s26, 4096  }
 0x6e2   : > { %4472 = vsyncadd (!%p3955_p9), %s3327_s26, 4294963200  ;;  %p29_p5 = scmp.ge.s32.totalorder %s4749_s27, 4   ;;  %s5512_s30 = smov %s4479_s10 }
 0x6e3   : > { %s5513_s10 = smov %s4483_s11  ;;  %s5514_s11 = smov %s4760_s25 }
 0x6e4   : > { %s5515_s12 = smov %s4749_s27  ;;  %31 = sbr.rel (!%p29_p5) target bundleno = 13 (0xd), region = 138 }
 0x6eb   :  { %3332 = vsyncpa [#allocation3], 1 }
 0x6ec   :  { %3334 = vsyncpa [#allocation3 + $0x1], 1 }
 0x6ed   :  { %3335 = vsyncpa [#allocation6], 1 }
 0x6ee   :  { %3336 = vsyncpa [#allocation9], 1 }
 0x6ef   :  { %3337 = vsyncpa [#allocation12], 1 }
 0x6f0   :  { %3338 = vsyncpa [#allocation4], 1 }
 0x6f1   :  { %3340 = vsyncpa [#allocation4 + $0x1], 1 }
 0x6f2   :  { %3341 = vsyncpa [#allocation16], 1 }
 0x6f3   :  { %3343 = vsyncpa [#allocation16 + $0x1], 1 }

</bundles_post_ra>
